<compile_context>
chip_gen: v7x
topology: tpu7x:2x2x1
jax: 0.10.0
libtpu: 0.0.40
codegen_flags: <defaults>
</compile_context>

<pallas_src>
import jax
import jax.numpy as jnp
from jax import lax
from jax.experimental import pallas as pl
from jax.experimental.pallas import tpu as pltpu


def gru_att_kernel(emb_ref, len_ref,
                   wih_ref, whh_ref, bi_ref, bhn_ref,
                   wa1_ref, ba1_ref, wa2_ref, wp_ref, bp_ref,
                   out_ref,
                   gif_r, gif_z, gif_n, gib_r, gib_z, gib_n,
                   fwd_ref, bwd_ref):
    T, B, E = emb_ref.shape
    H = whh_ref.shape[2]

    lens = len_ref[...]                                   # (B, 1) int32
    emb = emb_ref[...]                                    # (T, B, E)

    # ---- hoisted input projection: all time steps, all gates, both
    #      directions — off the serial recurrence chain, MXU-friendly. ----
    gate_refs = (gif_r, gif_z, gif_n, gib_r, gib_z, gib_n)
    for g, gref in enumerate(gate_refs):
        gref[...] = (jnp.einsum("tbe,eh->tbh", emb, wih_ref[g],
                                preferred_element_type=jnp.float32)
                     + bi_ref[g])

    # ---- hoist all loop-invariant weight/bias reads out of the loop ----
    whh = [whh_ref[g] for g in range(6)]                  # 6 x (H, H)
    bhn_f = bhn_ref[0]                                    # (1, H)
    bhn_b = bhn_ref[1]

    def cell(h, gi_r, gi_z, gi_n, w_r, w_z, w_n, b_n):
        # PyTorch GRU cell; gi_* already contain b_ih (+ b_hh for r/z).
        r = jax.nn.sigmoid(gi_r + jnp.dot(h, w_r, preferred_element_type=jnp.float32))
        z = jax.nn.sigmoid(gi_z + jnp.dot(h, w_z, preferred_element_type=jnp.float32))
        n = jnp.tanh(gi_n + r * (jnp.dot(h, w_n, preferred_element_type=jnp.float32) + b_n))
        return (1.0 - z) * n + z * h

    h0 = jnp.zeros((B, H), jnp.float32)

    # ---- fused bidirectional recurrence: forward chain at t, backward chain
    #      at T-1-t per iteration (two independent chains interleave).
    #      Packed semantics: only t < len updates the state; padded output
    #      rows are exactly 0 (matches pad_packed_sequence). ----
    def step(t, carry):
        h_f, h_b = carry
        tb = T - 1 - t

        hf_new = cell(h_f, gif_r[t], gif_z[t], gif_n[t],
                      whh[0], whh[1], whh[2], bhn_f)
        valid_f = t < lens                                # (B, 1) bool
        h_f = jnp.where(valid_f, hf_new, h_f)
        fwd_ref[t] = jnp.where(valid_f, hf_new, 0.0)

        hb_new = cell(h_b, gib_r[tb], gib_z[tb], gib_n[tb],
                      whh[3], whh[4], whh[5], bhn_b)
        valid_b = tb < lens
        h_b = jnp.where(valid_b, hb_new, h_b)
        bwd_ref[tb] = jnp.where(valid_b, hb_new, 0.0)
        return (h_f, h_b)

    lax.fori_loop(0, T, step, (h0, h0), unroll=True)

    # ---- attention over time; softmax includes padded rows (their GRU
    #      output is 0 but their score tanh(b1)@w2 is not), exactly like the
    #      torch module. The 2H concat is never materialized: matmuls are
    #      split into lane-aligned per-direction halves. ----
    seq_f = fwd_ref[...]                                  # (T, B, H)
    seq_b = bwd_ref[...]

    hid = jnp.tanh(
        jnp.einsum("tbh,ha->tba", seq_f, wa1_ref[0], preferred_element_type=jnp.float32)
        + jnp.einsum("tbh,ha->tba", seq_b, wa1_ref[1], preferred_element_type=jnp.float32)
        + ba1_ref[...])                                   # (T, B, A)

    # Linear(A -> 1, no bias) as VPU multiply + lane reduction.
    scores = jnp.sum(hid * wa2_ref[...], axis=-1, keepdims=True)      # (T, B, 1)

    m = jnp.max(scores, axis=0, keepdims=True)
    e = jnp.exp(scores - m)
    att = e * pl.reciprocal(jnp.sum(e, axis=0, keepdims=True), approx=True)

    feat_f = jnp.sum(seq_f * att, axis=0)                 # (B, H)
    feat_b = jnp.sum(seq_b * att, axis=0)                 # (B, H)

    # ---- pred head: Dropout -> Linear -> Sigmoid ----
    # TODO(synk): dropout implemented as identity (inference/eval semantics).
    logits = (jnp.dot(feat_f, wp_ref[0], preferred_element_type=jnp.float32)
              + jnp.dot(feat_b, wp_ref[1], preferred_element_type=jnp.float32)
              + bp_ref[...])
    out_ref[...] = jax.nn.sigmoid(logits)


def gru_att_forward(tokens, lengths, params):
    B, T = tokens.shape
    H = params["whh_f"].shape[0]
    n_out = params["wp"].shape[1]

    # Embedding lookup (gather) is glue done in XLA; the recurrent / matmul
    # hot path is in-kernel.
    emb = jnp.take(params["embed"], tokens, axis=0)            # (B, T, E)
    emb = jnp.transpose(emb, (1, 0, 2)).astype(jnp.float32)    # (T, B, E)
    lens = lengths.reshape(B, 1).astype(jnp.int32)

    def g(w, i):                                               # torch gate order [r | z | n]
        return w[:, i * H:(i + 1) * H]

    wih = jnp.stack([g(params["wih_f"], 0), g(params["wih_f"], 1), g(params["wih_f"], 2),
                     g(params["wih_b"], 0), g(params["wih_b"], 1), g(params["wih_b"], 2)])
    whh = jnp.stack([g(params["whh_f"], 0), g(params["whh_f"], 1), g(params["whh_f"], 2),
                     g(params["whh_b"], 0), g(params["whh_b"], 1), g(params["whh_b"], 2)])
    # hoisted biases: r/z gates fold b_ih + b_hh; n gate keeps b_hh separate
    # (it is scaled by r inside the cell).
    bi = jnp.stack([g(params["bih_f"], 0) + g(params["bhh_f"], 0),
                    g(params["bih_f"], 1) + g(params["bhh_f"], 1),
                    g(params["bih_f"], 2),
                    g(params["bih_b"], 0) + g(params["bhh_b"], 0),
                    g(params["bih_b"], 1) + g(params["bhh_b"], 1),
                    g(params["bih_b"], 2)])                    # (6, 1, H)
    bhn = jnp.stack([g(params["bhh_f"], 2), g(params["bhh_b"], 2)])   # (2, 1, H)
    wa1 = jnp.stack([params["wa1"][:H], params["wa1"][H:]])           # (2, H, A)
    wa2 = params["wa2"].T                                             # (1, A)
    wp = jnp.stack([params["wp"][:H], params["wp"][H:]])              # (2, H, n_out)

    # TODO(synk): at production sizes (large B/T/H) add a batch grid axis with
    # BlockSpec tiling over B + dimension_semantics=("parallel",) so the
    # sequence scratch fits v7x's 64 MiB VMEM and both TensorCores are used.
    vmem = pl.BlockSpec(memory_space=pltpu.MemorySpace.VMEM)
    return pl.pallas_call(
        gru_att_kernel,
        out_shape=jax.ShapeDtypeStruct((B, n_out), jnp.float32),
        in_specs=[vmem] * 11,
        out_specs=vmem,
        scratch_shapes=[pltpu.VMEM((T, B, H), jnp.float32) for _ in range(8)],
    )(emb, lens, wih, whh, bi, bhn, wa1, params["ba1"], wa2, wp, params["bp"])


def reference_forward(tokens, lengths, params):
    """Pure-JAX mirror of the PyTorch forward (eval-mode dropout)."""
    B, T = tokens.shape
    H = params["whh_f"].shape[0]
    hp = lax.Precision.HIGHEST
    emb = jnp.take(params["embed"], tokens, axis=0).astype(jnp.float32)  # (B, T, E)
    lens = lengths.astype(jnp.int32)

    def direction(wih, whh, bih, bhh, reverse):
        h = jnp.zeros((B, H), jnp.float32)
        out = jnp.zeros((T, B, H), jnp.float32)
        ts = range(T - 1, -1, -1) if reverse else range(T)
        for t in ts:
            x_t = emb[:, t, :]
            gi = jnp.dot(x_t, wih, precision=hp) + bih
            gh = jnp.dot(h, whh, precision=hp) + bhh
            r = jax.nn.sigmoid(gi[:, :H] + gh[:, :H])
            z = jax.nn.sigmoid(gi[:, H:2 * H] + gh[:, H:2 * H])
            n = jnp.tanh(gi[:, 2 * H:] + r * gh[:, 2 * H:])
            h_new = (1.0 - z) * n + z * h
            valid = (t < lens)[:, None]
            h = jnp.where(valid, h_new, h)
            out = out.at[t].set(jnp.where(valid, h_new, 0.0))
        return out

    fwd = direction(params["wih_f"], params["whh_f"], params["bih_f"], params["bhh_f"], False)
    bwd = direction(params["wih_b"], params["whh_b"], params["bih_b"], params["bhh_b"], True)
    gru_out = jnp.concatenate([fwd, bwd], axis=-1)                       # (T, B, 2H)
    hid = jnp.tanh(jnp.einsum("tbh,ha->tba", gru_out, params["wa1"],
                              precision=hp) + params["ba1"])
    scores = jnp.einsum("tba,ao->tbo", hid, params["wa2"], precision=hp)
    att = jax.nn.softmax(scores, axis=0)
    feature = jnp.sum(gru_out * att, axis=0)
    return jax.nn.sigmoid(jnp.dot(feature, params["wp"], precision=hp) + params["bp"])


if __name__ == "__main__":
    # Small shapes consistent with the module: vocab=70 tokens, seq=8, hidden=32.
    V, E, H, A, n_out = 70, 32, 32, 32, 1
    B, T = 2, 8

    key = jax.random.PRNGKey(0)
    ks = jax.random.split(key, 16)

    def u(k, shape, s=0.1):
        return jax.random.uniform(k, shape, jnp.float32, -s, s)

    params = {
        "embed": u(ks[0], (V, E)).at[0].set(0.0),   # padding_idx=0 -> zero row
        "wih_f": u(ks[1], (E, 3 * H)), "whh_f": u(ks[2], (H, 3 * H)),
        "bih_f": u(ks[3], (1, 3 * H)), "bhh_f": u(ks[4], (1, 3 * H)),
        "wih_b": u(ks[5], (E, 3 * H)), "whh_b": u(ks[6], (H, 3 * H)),
        "bih_b": u(ks[7], (1, 3 * H)), "bhh_b": u(ks[8], (1, 3 * H)),
        "wa1": u(ks[9], (2 * H, A)), "ba1": u(ks[10], (1, A)),
        "wa2": u(ks[11], (A, 1)),
        "wp": u(ks[12], (2 * H, n_out)), "bp": u(ks[13], (1, n_out)),
    }

    lengths = jnp.array([T, 5], dtype=jnp.int32)
    tokens = jax.random.randint(ks[14], (B, T), 1, V, dtype=jnp.int32)
    pos = jnp.arange(T)[None, :]
    tokens = jnp.where(pos < lengths[:, None], tokens, 0)   # pad tail with padding_idx 0

    out = jax.jit(gru_att_forward)(tokens, lengths, params)
    out = jax.block_until_ready(out)

    ref = reference_forward(tokens, lengths, params)
    assert out.shape == (B, n_out)
    assert bool(jnp.all(jnp.isfinite(out)))
    assert bool(jnp.allclose(out, ref, atol=2e-3, rtol=2e-3))
    print("KERNEL_OK")
</pallas_src>

<mosaic_0001>
module attributes {stable_mosaic.version = 11 : i64} {
  func.func @gru_att_kernel(%arg0: memref<8x2x32xf32, #tpu.memory_space<vmem>>, %arg1: memref<2x1xi32, #tpu.memory_space<vmem>>, %arg2: memref<6x32x32xf32, #tpu.memory_space<vmem>>, %arg3: memref<6x32x32xf32, #tpu.memory_space<vmem>>, %arg4: memref<6x1x32xf32, #tpu.memory_space<vmem>>, %arg5: memref<2x1x32xf32, #tpu.memory_space<vmem>>, %arg6: memref<2x32x32xf32, #tpu.memory_space<vmem>>, %arg7: memref<1x32xf32, #tpu.memory_space<vmem>>, %arg8: memref<1x32xf32, #tpu.memory_space<vmem>>, %arg9: memref<2x32x1xf32, #tpu.memory_space<vmem>>, %arg10: memref<1x1xf32, #tpu.memory_space<vmem>>, %arg11: memref<2x1xf32, #tpu.memory_space<vmem>>, %arg12: memref<8x2x32xf32, #tpu.memory_space<vmem>>, %arg13: memref<8x2x32xf32, #tpu.memory_space<vmem>>, %arg14: memref<8x2x32xf32, #tpu.memory_space<vmem>>, %arg15: memref<8x2x32xf32, #tpu.memory_space<vmem>>, %arg16: memref<8x2x32xf32, #tpu.memory_space<vmem>>, %arg17: memref<8x2x32xf32, #tpu.memory_space<vmem>>, %arg18: memref<8x2x32xf32, #tpu.memory_space<vmem>>, %arg19: memref<8x2x32xf32, #tpu.memory_space<vmem>>) attributes {dimension_semantics = [], scalar_prefetch = 0 : i64, scratch_operands = 8 : i64, tpu.core_type = #tpu.core_type<tc>} {
    %c0 = arith.constant 0 : index
    %c0_0 = arith.constant 0 : index
    %0 = vector.load %arg1[%c0, %c0_0] : memref<2x1xi32, #tpu.memory_space<vmem>>, vector<2x1xi32>
    %c0_1 = arith.constant 0 : index
    %c0_2 = arith.constant 0 : index
    %c0_3 = arith.constant 0 : index
    %1 = vector.load %arg0[%c0_1, %c0_2, %c0_3] : memref<8x2x32xf32, #tpu.memory_space<vmem>>, vector<8x2x32xf32>
    %c0_4 = arith.constant 0 : index
    %c0_5 = arith.constant 0 : index
    %c0_6 = arith.constant 0 : index
    %2 = vector.load %arg2[%c0_4, %c0_5, %c0_6] : memref<6x32x32xf32, #tpu.memory_space<vmem>>, vector<1x32x32xf32>
    %3 = vector.shape_cast %2 : vector<1x32x32xf32> to vector<32x32xf32>
    "tpu.trace_start"() <{level = 10 : i32, message = "tbe,eh->tbh"}> : () -> ()
    %cst = arith.constant dense<0.000000e+00> : vector<8x2x32xf32>
    %4 = tpu.matmul %1, %3, %cst {dimension_numbers = #tpu.dot_dimension_numbers<[2], [0], [0, 1], [1], [0, 0, 0, 1, 1, 1], [], []>} : vector<8x2x32xf32>, vector<32x32xf32>, vector<8x2x32xf32> -> vector<8x2x32xf32>
    "tpu.trace_stop"() : () -> ()
    %c0_7 = arith.constant 0 : index
    %c0_8 = arith.constant 0 : index
    %c0_9 = arith.constant 0 : index
    %5 = vector.load %arg4[%c0_7, %c0_8, %c0_9] : memref<6x1x32xf32, #tpu.memory_space<vmem>>, vector<1x1x32xf32>
    %6 = vector.shape_cast %5 : vector<1x1x32xf32> to vector<1x32xf32>
    %7 = vector.shape_cast %6 : vector<1x32xf32> to vector<1x1x32xf32>
    %8 = vector.broadcast %7 : vector<1x1x32xf32> to vector<8x2x32xf32>
    %9 = arith.addf %4, %8 : vector<8x2x32xf32>
    %c0_10 = arith.constant 0 : index
    %c0_11 = arith.constant 0 : index
    %c0_12 = arith.constant 0 : index
    %10 = vector.load %arg12[%c0_10, %c0_11, %c0_12] : memref<8x2x32xf32, #tpu.memory_space<vmem>>, vector<8x2x32xf32>
    tpu.vector_store %arg12[%c0_10, %c0_11, %c0_12], %9 {strides = array<i32>} : memref<8x2x32xf32, #tpu.memory_space<vmem>>, vector<8x2x32xf32>,
    %c1 = arith.constant 1 : index
    %c0_13 = arith.constant 0 : index
    %c0_14 = arith.constant 0 : index
    %11 = vector.load %arg2[%c1, %c0_13, %c0_14] : memref<6x32x32xf32, #tpu.memory_space<vmem>>, vector<1x32x32xf32>
    %12 = vector.shape_cast %11 : vector<1x32x32xf32> to vector<32x32xf32>
    "tpu.trace_start"() <{level = 10 : i32, message = "tbe,eh->tbh"}> : () -> ()
    %cst_15 = arith.constant dense<0.000000e+00> : vector<8x2x32xf32>
    %13 = tpu.matmul %1, %12, %cst_15 {dimension_numbers = #tpu.dot_dimension_numbers<[2], [0], [0, 1], [1], [0, 0, 0, 1, 1, 1], [], []>} : vector<8x2x32xf32>, vector<32x32xf32>, vector<8x2x32xf32> -> vector<8x2x32xf32>
    "tpu.trace_stop"() : () -> ()
    %c1_16 = arith.constant 1 : index
    %c0_17 = arith.constant 0 : index
    %c0_18 = arith.constant 0 : index
    %14 = vector.load %arg4[%c1_16, %c0_17, %c0_18] : memref<6x1x32xf32, #tpu.memory_space<vmem>>, vector<1x1x32xf32>
    %15 = vector.shape_cast %14 : vector<1x1x32xf32> to vector<1x32xf32>
    %16 = vector.shape_cast %15 : vector<1x32xf32> to vector<1x1x32xf32>
    %17 = vector.broadcast %16 : vector<1x1x32xf32> to vector<8x2x32xf32>
    %18 = arith.addf %13, %17 : vector<8x2x32xf32>
    %c0_19 = arith.constant 0 : index
    %c0_20 = arith.constant 0 : index
    %c0_21 = arith.constant 0 : index
    %19 = vector.load %arg13[%c0_19, %c0_20, %c0_21] : memref<8x2x32xf32, #tpu.memory_space<vmem>>, vector<8x2x32xf32>
    tpu.vector_store %arg13[%c0_19, %c0_20, %c0_21], %18 {strides = array<i32>} : memref<8x2x32xf32, #tpu.memory_space<vmem>>, vector<8x2x32xf32>,
    %c2 = arith.constant 2 : index
    %c0_22 = arith.constant 0 : index
    %c0_23 = arith.constant 0 : index
    %20 = vector.load %arg2[%c2, %c0_22, %c0_23] : memref<6x32x32xf32, #tpu.memory_space<vmem>>, vector<1x32x32xf32>
    %21 = vector.shape_cast %20 : vector<1x32x32xf32> to vector<32x32xf32>
    "tpu.trace_start"() <{level = 10 : i32, message = "tbe,eh->tbh"}> : () -> ()
    %cst_24 = arith.constant dense<0.000000e+00> : vector<8x2x32xf32>
    %22 = tpu.matmul %1, %21, %cst_24 {dimension_numbers = #tpu.dot_dimension_numbers<[2], [0], [0, 1], [1], [0, 0, 0, 1, 1, 1], [], []>} : vector<8x2x32xf32>, vector<32x32xf32>, vector<8x2x32xf32> -> vector<8x2x32xf32>
    "tpu.trace_stop"() : () -> ()
    %c2_25 = arith.constant 2 : index
    %c0_26 = arith.constant 0 : index
    %c0_27 = arith.constant 0 : index
    %23 = vector.load %arg4[%c2_25, %c0_26, %c0_27] : memref<6x1x32xf32, #tpu.memory_space<vmem>>, vector<1x1x32xf32>
    %24 = vector.shape_cast %23 : vector<1x1x32xf32> to vector<1x32xf32>
    %25 = vector.shape_cast %24 : vector<1x32xf32> to vector<1x1x32xf32>
    %26 = vector.broadcast %25 : vector<1x1x32xf32> to vector<8x2x32xf32>
    %27 = arith.addf %22, %26 : vector<8x2x32xf32>
    %c0_28 = arith.constant 0 : index
    %c0_29 = arith.constant 0 : index
    %c0_30 = arith.constant 0 : index
    %28 = vector.load %arg14[%c0_28, %c0_29, %c0_30] : memref<8x2x32xf32, #tpu.memory_space<vmem>>, vector<8x2x32xf32>
    tpu.vector_store %arg14[%c0_28, %c0_29, %c0_30], %27 {strides = array<i32>} : memref<8x2x32xf32, #tpu.memory_space<vmem>>, vector<8x2x32xf32>,
    %c3 = arith.constant 3 : index
    %c0_31 = arith.constant 0 : index
    %c0_32 = arith.constant 0 : index
    %29 = vector.load %arg2[%c3, %c0_31, %c0_32] : memref<6x32x32xf32, #tpu.memory_space<vmem>>, vector<1x32x32xf32>
    %30 = vector.shape_cast %29 : vector<1x32x32xf32> to vector<32x32xf32>
    "tpu.trace_start"() <{level = 10 : i32, message = "tbe,eh->tbh"}> : () -> ()
    %cst_33 = arith.constant dense<0.000000e+00> : vector<8x2x32xf32>
    %31 = tpu.matmul %1, %30, %cst_33 {dimension_numbers = #tpu.dot_dimension_numbers<[2], [0], [0, 1], [1], [0, 0, 0, 1, 1, 1], [], []>} : vector<8x2x32xf32>, vector<32x32xf32>, vector<8x2x32xf32> -> vector<8x2x32xf32>
    "tpu.trace_stop"() : () -> ()
    %c3_34 = arith.constant 3 : index
    %c0_35 = arith.constant 0 : index
    %c0_36 = arith.constant 0 : index
    %32 = vector.load %arg4[%c3_34, %c0_35, %c0_36] : memref<6x1x32xf32, #tpu.memory_space<vmem>>, vector<1x1x32xf32>
    %33 = vector.shape_cast %32 : vector<1x1x32xf32> to vector<1x32xf32>
    %34 = vector.shape_cast %33 : vector<1x32xf32> to vector<1x1x32xf32>
    %35 = vector.broadcast %34 : vector<1x1x32xf32> to vector<8x2x32xf32>
    %36 = arith.addf %31, %35 : vector<8x2x32xf32>
    %c0_37 = arith.constant 0 : index
    %c0_38 = arith.constant 0 : index
    %c0_39 = arith.constant 0 : index
    %37 = vector.load %arg15[%c0_37, %c0_38, %c0_39] : memref<8x2x32xf32, #tpu.memory_space<vmem>>, vector<8x2x32xf32>
    tpu.vector_store %arg15[%c0_37, %c0_38, %c0_39], %36 {strides = array<i32>} : memref<8x2x32xf32, #tpu.memory_space<vmem>>, vector<8x2x32xf32>,
    %c4 = arith.constant 4 : index
    %c0_40 = arith.constant 0 : index
    %c0_41 = arith.constant 0 : index
    %38 = vector.load %arg2[%c4, %c0_40, %c0_41] : memref<6x32x32xf32, #tpu.memory_space<vmem>>, vector<1x32x32xf32>
    %39 = vector.shape_cast %38 : vector<1x32x32xf32> to vector<32x32xf32>
    "tpu.trace_start"() <{level = 10 : i32, message = "tbe,eh->tbh"}> : () -> ()
    %cst_42 = arith.constant dense<0.000000e+00> : vector<8x2x32xf32>
    %40 = tpu.matmul %1, %39, %cst_42 {dimension_numbers = #tpu.dot_dimension_numbers<[2], [0], [0, 1], [1], [0, 0, 0, 1, 1, 1], [], []>} : vector<8x2x32xf32>, vector<32x32xf32>, vector<8x2x32xf32> -> vector<8x2x32xf32>
    "tpu.trace_stop"() : () -> ()
    %c4_43 = arith.constant 4 : index
    %c0_44 = arith.constant 0 : index
    %c0_45 = arith.constant 0 : index
    %41 = vector.load %arg4[%c4_43, %c0_44, %c0_45] : memref<6x1x32xf32, #tpu.memory_space<vmem>>, vector<1x1x32xf32>
    %42 = vector.shape_cast %41 : vector<1x1x32xf32> to vector<1x32xf32>
    %43 = vector.shape_cast %42 : vector<1x32xf32> to vector<1x1x32xf32>
    %44 = vector.broadcast %43 : vector<1x1x32xf32> to vector<8x2x32xf32>
    %45 = arith.addf %40, %44 : vector<8x2x32xf32>
    %c0_46 = arith.constant 0 : index
    %c0_47 = arith.constant 0 : index
    %c0_48 = arith.constant 0 : index
    %46 = vector.load %arg16[%c0_46, %c0_47, %c0_48] : memref<8x2x32xf32, #tpu.memory_space<vmem>>, vector<8x2x32xf32>
    tpu.vector_store %arg16[%c0_46, %c0_47, %c0_48], %45 {strides = array<i32>} : memref<8x2x32xf32, #tpu.memory_space<vmem>>, vector<8x2x32xf32>,
    %c5 = arith.constant 5 : index
    %c0_49 = arith.constant 0 : index
    %c0_50 = arith.constant 0 : index
    %47 = vector.load %arg2[%c5, %c0_49, %c0_50] : memref<6x32x32xf32, #tpu.memory_space<vmem>>, vector<1x32x32xf32>
    %48 = vector.shape_cast %47 : vector<1x32x32xf32> to vector<32x32xf32>
    "tpu.trace_start"() <{level = 10 : i32, message = "tbe,eh->tbh"}> : () -> ()
    %cst_51 = arith.constant dense<0.000000e+00> : vector<8x2x32xf32>
    %49 = tpu.matmul %1, %48, %cst_51 {dimension_numbers = #tpu.dot_dimension_numbers<[2], [0], [0, 1], [1], [0, 0, 0, 1, 1, 1], [], []>} : vector<8x2x32xf32>, vector<32x32xf32>, vector<8x2x32xf32> -> vector<8x2x32xf32>
    "tpu.trace_stop"() : () -> ()
    %c5_52 = arith.constant 5 : index
    %c0_53 = arith.constant 0 : index
    %c0_54 = arith.constant 0 : index
    %50 = vector.load %arg4[%c5_52, %c0_53, %c0_54] : memref<6x1x32xf32, #tpu.memory_space<vmem>>, vector<1x1x32xf32>
    %51 = vector.shape_cast %50 : vector<1x1x32xf32> to vector<1x32xf32>
    %52 = vector.shape_cast %51 : vector<1x32xf32> to vector<1x1x32xf32>
    %53 = vector.broadcast %52 : vector<1x1x32xf32> to vector<8x2x32xf32>
    %54 = arith.addf %49, %53 : vector<8x2x32xf32>
    %c0_55 = arith.constant 0 : index
    %c0_56 = arith.constant 0 : index
    %c0_57 = arith.constant 0 : index
    %55 = vector.load %arg17[%c0_55, %c0_56, %c0_57] : memref<8x2x32xf32, #tpu.memory_space<vmem>>, vector<8x2x32xf32>
    tpu.vector_store %arg17[%c0_55, %c0_56, %c0_57], %54 {strides = array<i32>} : memref<8x2x32xf32, #tpu.memory_space<vmem>>, vector<8x2x32xf32>,
    %c0_58 = arith.constant 0 : index
    %c0_59 = arith.constant 0 : index
    %c0_60 = arith.constant 0 : index
    %56 = vector.load %arg3[%c0_58, %c0_59, %c0_60] : memref<6x32x32xf32, #tpu.memory_space<vmem>>, vector<1x32x32xf32>
    %57 = vector.shape_cast %56 : vector<1x32x32xf32> to vector<32x32xf32>
    %c1_61 = arith.constant 1 : index
    %c0_62 = arith.constant 0 : index
    %c0_63 = arith.constant 0 : index
    %58 = vector.load %arg3[%c1_61, %c0_62, %c0_63] : memref<6x32x32xf32, #tpu.memory_space<vmem>>, vector<1x32x32xf32>
    %59 = vector.shape_cast %58 : vector<1x32x32xf32> to vector<32x32xf32>
    %c2_64 = arith.constant 2 : index
    %c0_65 = arith.constant 0 : index
    %c0_66 = arith.constant 0 : index
    %60 = vector.load %arg3[%c2_64, %c0_65, %c0_66] : memref<6x32x32xf32, #tpu.memory_space<vmem>>, vector<1x32x32xf32>
    %61 = vector.shape_cast %60 : vector<1x32x32xf32> to vector<32x32xf32>
    %c3_67 = arith.constant 3 : index
    %c0_68 = arith.constant 0 : index
    %c0_69 = arith.constant 0 : index
    %62 = vector.load %arg3[%c3_67, %c0_68, %c0_69] : memref<6x32x32xf32, #tpu.memory_space<vmem>>, vector<1x32x32xf32>
    %63 = vector.shape_cast %62 : vector<1x32x32xf32> to vector<32x32xf32>
    %c4_70 = arith.constant 4 : index
    %c0_71 = arith.constant 0 : index
    %c0_72 = arith.constant 0 : index
    %64 = vector.load %arg3[%c4_70, %c0_71, %c0_72] : memref<6x32x32xf32, #tpu.memory_space<vmem>>, vector<1x32x32xf32>
    %65 = vector.shape_cast %64 : vector<1x32x32xf32> to vector<32x32xf32>
    %c5_73 = arith.constant 5 : index
    %c0_74 = arith.constant 0 : index
    %c0_75 = arith.constant 0 : index
    %66 = vector.load %arg3[%c5_73, %c0_74, %c0_75] : memref<6x32x32xf32, #tpu.memory_space<vmem>>, vector<1x32x32xf32>
    %67 = vector.shape_cast %66 : vector<1x32x32xf32> to vector<32x32xf32>
    %c0_76 = arith.constant 0 : index
    %c0_77 = arith.constant 0 : index
    %c0_78 = arith.constant 0 : index
    %68 = vector.load %arg5[%c0_76, %c0_77, %c0_78] : memref<2x1x32xf32, #tpu.memory_space<vmem>>, vector<1x1x32xf32>
    %69 = vector.shape_cast %68 : vector<1x1x32xf32> to vector<1x32xf32>
    %c1_79 = arith.constant 1 : index
    %c0_80 = arith.constant 0 : index
    %c0_81 = arith.constant 0 : index
    %70 = vector.load %arg5[%c1_79, %c0_80, %c0_81] : memref<2x1x32xf32, #tpu.memory_space<vmem>>, vector<1x1x32xf32>
    %71 = vector.shape_cast %70 : vector<1x1x32xf32> to vector<1x32xf32>
    %cst_82 = arith.constant 0.000000e+00 : f32
    %72 = vector.broadcast %cst_82 : f32 to vector<2x32xf32>
    %c0_i32 = arith.constant 0 : i32
    %c7_i32 = arith.constant 7 : i32
    %73 = arith.subi %c7_i32, %c0_i32 : i32
    %74 = arith.index_cast %c0_i32 : i32 to index
    %c0_83 = arith.constant 0 : index
    %c0_84 = arith.constant 0 : index
    %75 = vector.load %arg12[%74, %c0_83, %c0_84] : memref<8x2x32xf32, #tpu.memory_space<vmem>>, vector<1x2x32xf32>
    %76 = vector.shape_cast %75 : vector<1x2x32xf32> to vector<2x32xf32>
    %77 = arith.index_cast %c0_i32 : i32 to index
    %c0_85 = arith.constant 0 : index
    %c0_86 = arith.constant 0 : index
    %78 = vector.load %arg13[%77, %c0_85, %c0_86] : memref<8x2x32xf32, #tpu.memory_space<vmem>>, vector<1x2x32xf32>
    %79 = vector.shape_cast %78 : vector<1x2x32xf32> to vector<2x32xf32>
    %80 = arith.index_cast %c0_i32 : i32 to index
    %c0_87 = arith.constant 0 : index
    %c0_88 = arith.constant 0 : index
    %81 = vector.load %arg14[%80, %c0_87, %c0_88] : memref<8x2x32xf32, #tpu.memory_space<vmem>>, vector<1x2x32xf32>
    %82 = vector.shape_cast %81 : vector<1x2x32xf32> to vector<2x32xf32>
    %cst_89 = arith.constant dense<0.000000e+00> : vector<2x32xf32>
    %83 = tpu.matmul %72, %57, %cst_89 {dimension_numbers = #tpu.dot_dimension_numbers<[1], [0], [0], [1], [0, 0, 1, 1], [], []>} : vector<2x32xf32>, vector<32x32xf32>, vector<2x32xf32> -> vector<2x32xf32>
    %84 = arith.addf %76, %83 : vector<2x32xf32>
    %85 = arith.negf %84 : vector<2x32xf32>
    %86 = math.exp %85 : vector<2x32xf32>
    %cst_90 = arith.constant 1.000000e+00 : f32
    %87 = vector.broadcast %cst_90 : f32 to vector<2x32xf32>
    %88 = arith.addf %87, %86 : vector<2x32xf32>
    %89 = arith.divf %87, %88 : vector<2x32xf32>
    %cst_91 = arith.constant dense<0.000000e+00> : vector<2x32xf32>
    %90 = tpu.matmul %72, %59, %cst_91 {dimension_numbers = #tpu.dot_dimension_numbers<[1], [0], [0], [1], [0, 0, 1, 1], [], []>} : vector<2x32xf32>, vector<32x32xf32>, vector<2x32xf32> -> vector<2x32xf32>
    %91 = arith.addf %79, %90 : vector<2x32xf32>
    %92 = arith.negf %91 : vector<2x32xf32>
    %93 = math.exp %92 : vector<2x32xf32>
    %cst_92 = arith.constant 1.000000e+00 : f32
    %94 = vector.broadcast %cst_92 : f32 to vector<2x32xf32>
    %95 = arith.addf %94, %93 : vector<2x32xf32>
    %96 = arith.divf %94, %95 : vector<2x32xf32>
    %cst_93 = arith.constant dense<0.000000e+00> : vector<2x32xf32>
    %97 = tpu.matmul %72, %61, %cst_93 {dimension_numbers = #tpu.dot_dimension_numbers<[1], [0], [0], [1], [0, 0, 1, 1], [], []>} : vector<2x32xf32>, vector<32x32xf32>, vector<2x32xf32> -> vector<2x32xf32>
    %98 = vector.broadcast %69 : vector<1x32xf32> to vector<2x32xf32>
    %99 = arith.addf %97, %98 : vector<2x32xf32>
    %100 = arith.mulf %89, %99 : vector<2x32xf32>
    %101 = arith.addf %82, %100 : vector<2x32xf32>
    %102 = math.tanh %101 : vector<2x32xf32>
    %cst_94 = arith.constant 1.000000e+00 : f32
    %103 = vector.broadcast %cst_94 : f32 to vector<2x32xf32>
    %104 = arith.subf %103, %96 : vector<2x32xf32>
    %105 = arith.mulf %104, %102 : vector<2x32xf32>
    %106 = arith.mulf %96, %72 : vector<2x32xf32>
    %107 = arith.addf %105, %106 : vector<2x32xf32>
    %108 = vector.broadcast %c0_i32 : i32 to vector<2x1xi32>
    %109 = arith.cmpi slt, %108, %0 : vector<2x1xi32>
    %110 = vector.shape_cast %109 : vector<2x1xi1> to vector<2x1xi1>
    %111 = vector.broadcast %110 : vector<2x1xi1> to vector<2x32xi1>
    %112 = arith.select %111, %107, %72 : vector<2x32xi1>, vector<2x32xf32>
    %cst_95 = arith.constant 0.000000e+00 : f32
    %113 = vector.shape_cast %109 : vector<2x1xi1> to vector<2x1xi1>
    %114 = vector.broadcast %113 : vector<2x1xi1> to vector<2x32xi1>
    %115 = vector.broadcast %cst_95 : f32 to vector<2x32xf32>
    %116 = arith.select %114, %107, %115 : vector<2x32xi1>, vector<2x32xf32>
    %117 = arith.index_cast %c0_i32 : i32 to index
    %c0_96 = arith.constant 0 : index
    %c0_97 = arith.constant 0 : index
    %118 = vector.load %arg18[%117, %c0_96, %c0_97] : memref<8x2x32xf32, #tpu.memory_space<vmem>>, vector<1x2x32xf32>
    %119 = vector.shape_cast %118 : vector<1x2x32xf32> to vector<2x32xf32>
    %120 = vector.shape_cast %116 : vector<2x32xf32> to vector<1x2x32xf32>
    tpu.vector_store %arg18[%117, %c0_96, %c0_97], %120 {strides = array<i32>} : memref<8x2x32xf32, #tpu.memory_space<vmem>>, vector<1x2x32xf32>,
    %121 = arith.index_cast %73 : i32 to index
    %c0_98 = arith.constant 0 : index
    %c0_99 = arith.constant 0 : index
    %122 = vector.load %arg15[%121, %c0_98, %c0_99] : memref<8x2x32xf32, #tpu.memory_space<vmem>>, vector<1x2x32xf32>
    %123 = vector.shape_cast %122 : vector<1x2x32xf32> to vector<2x32xf32>
    %124 = arith.index_cast %73 : i32 to index
    %c0_100 = arith.constant 0 : index
    %c0_101 = arith.constant 0 : index
    %125 = vector.load %arg16[%124, %c0_100, %c0_101] : memref<8x2x32xf32, #tpu.memory_space<vmem>>, vector<1x2x32xf32>
    %126 = vector.shape_cast %125 : vector<1x2x32xf32> to vector<2x32xf32>
    %127 = arith.index_cast %73 : i32 to index
    %c0_102 = arith.constant 0 : index
    %c0_103 = arith.constant 0 : index
    %128 = vector.load %arg17[%127, %c0_102, %c0_103] : memref<8x2x32xf32, #tpu.memory_space<vmem>>, vector<1x2x32xf32>
    %129 = vector.shape_cast %128 : vector<1x2x32xf32> to vector<2x32xf32>
    %cst_104 = arith.constant dense<0.000000e+00> : vector<2x32xf32>
    %130 = tpu.matmul %72, %63, %cst_104 {dimension_numbers = #tpu.dot_dimension_numbers<[1], [0], [0], [1], [0, 0, 1, 1], [], []>} : vector<2x32xf32>, vector<32x32xf32>, vector<2x32xf32> -> vector<2x32xf32>
    %131 = arith.addf %123, %130 : vector<2x32xf32>
    %132 = arith.negf %131 : vector<2x32xf32>
    %133 = math.exp %132 : vector<2x32xf32>
    %cst_105 = arith.constant 1.000000e+00 : f32
    %134 = vector.broadcast %cst_105 : f32 to vector<2x32xf32>
    %135 = arith.addf %134, %133 : vector<2x32xf32>
    %136 = arith.divf %134, %135 : vector<2x32xf32>
    %cst_106 = arith.constant dense<0.000000e+00> : vector<2x32xf32>
    %137 = tpu.matmul %72, %65, %cst_106 {dimension_numbers = #tpu.dot_dimension_numbers<[1], [0], [0], [1], [0, 0, 1, 1], [], []>} : vector<2x32xf32>, vector<32x32xf32>, vector<2x32xf32> -> vector<2x32xf32>
    %138 = arith.addf %126, %137 : vector<2x32xf32>
    %139 = arith.negf %138 : vector<2x32xf32>
    %140 = math.exp %139 : vector<2x32xf32>
    %cst_107 = arith.constant 1.000000e+00 : f32
    %141 = vector.broadcast %cst_107 : f32 to vector<2x32xf32>
    %142 = arith.addf %141, %140 : vector<2x32xf32>
    %143 = arith.divf %141, %142 : vector<2x32xf32>
    %cst_108 = arith.constant dense<0.000000e+00> : vector<2x32xf32>
    %144 = tpu.matmul %72, %67, %cst_108 {dimension_numbers = #tpu.dot_dimension_numbers<[1], [0], [0], [1], [0, 0, 1, 1], [], []>} : vector<2x32xf32>, vector<32x32xf32>, vector<2x32xf32> -> vector<2x32xf32>
    %145 = vector.broadcast %71 : vector<1x32xf32> to vector<2x32xf32>
    %146 = arith.addf %144, %145 : vector<2x32xf32>
    %147 = arith.mulf %136, %146 : vector<2x32xf32>
    %148 = arith.addf %129, %147 : vector<2x32xf32>
    %149 = math.tanh %148 : vector<2x32xf32>
    %cst_109 = arith.constant 1.000000e+00 : f32
    %150 = vector.broadcast %cst_109 : f32 to vector<2x32xf32>
    %151 = arith.subf %150, %143 : vector<2x32xf32>
    %152 = arith.mulf %151, %149 : vector<2x32xf32>
    %153 = arith.mulf %143, %72 : vector<2x32xf32>
    %154 = arith.addf %152, %153 : vector<2x32xf32>
    %155 = vector.broadcast %73 : i32 to vector<2x1xi32>
    %156 = arith.cmpi slt, %155, %0 : vector<2x1xi32>
    %157 = vector.shape_cast %156 : vector<2x1xi1> to vector<2x1xi1>
    %158 = vector.broadcast %157 : vector<2x1xi1> to vector<2x32xi1>
    %159 = arith.select %158, %154, %72 : vector<2x32xi1>, vector<2x32xf32>
    %cst_110 = arith.constant 0.000000e+00 : f32
    %160 = vector.shape_cast %156 : vector<2x1xi1> to vector<2x1xi1>
    %161 = vector.broadcast %160 : vector<2x1xi1> to vector<2x32xi1>
    %162 = vector.broadcast %cst_110 : f32 to vector<2x32xf32>
    %163 = arith.select %161, %154, %162 : vector<2x32xi1>, vector<2x32xf32>
    %164 = arith.index_cast %73 : i32 to index
    %c0_111 = arith.constant 0 : index
    %c0_112 = arith.constant 0 : index
    %165 = vector.load %arg19[%164, %c0_111, %c0_112] : memref<8x2x32xf32, #tpu.memory_space<vmem>>, vector<1x2x32xf32>
    %166 = vector.shape_cast %165 : vector<1x2x32xf32> to vector<2x32xf32>
    %167 = vector.shape_cast %163 : vector<2x32xf32> to vector<1x2x32xf32>
    tpu.vector_store %arg19[%164, %c0_111, %c0_112], %167 {strides = array<i32>} : memref<8x2x32xf32, #tpu.memory_space<vmem>>, vector<1x2x32xf32>,
    %c1_i32 = arith.constant 1 : i32
    %c7_i32_113 = arith.constant 7 : i32
    %168 = arith.subi %c7_i32_113, %c1_i32 : i32
    %169 = arith.index_cast %c1_i32 : i32 to index
    %c0_114 = arith.constant 0 : index
    %c0_115 = arith.constant 0 : index
    %170 = vector.load %arg12[%169, %c0_114, %c0_115] : memref<8x2x32xf32, #tpu.memory_space<vmem>>, vector<1x2x32xf32>
    %171 = vector.shape_cast %170 : vector<1x2x32xf32> to vector<2x32xf32>
    %172 = arith.index_cast %c1_i32 : i32 to index
    %c0_116 = arith.constant 0 : index
    %c0_117 = arith.constant 0 : index
    %173 = vector.load %arg13[%172, %c0_116, %c0_117] : memref<8x2x32xf32, #tpu.memory_space<vmem>>, vector<1x2x32xf32>
    %174 = vector.shape_cast %173 : vector<1x2x32xf32> to vector<2x32xf32>
    %175 = arith.index_cast %c1_i32 : i32 to index
    %c0_118 = arith.constant 0 : index
    %c0_119 = arith.constant 0 : index
    %176 = vector.load %arg14[%175, %c0_118, %c0_119] : memref<8x2x32xf32, #tpu.memory_space<vmem>>, vector<1x2x32xf32>
    %177 = vector.shape_cast %176 : vector<1x2x32xf32> to vector<2x32xf32>
    %cst_120 = arith.constant dense<0.000000e+00> : vector<2x32xf32>
    %178 = tpu.matmul %112, %57, %cst_120 {dimension_numbers = #tpu.dot_dimension_numbers<[1], [0], [0], [1], [0, 0, 1, 1], [], []>} : vector<2x32xf32>, vector<32x32xf32>, vector<2x32xf32> -> vector<2x32xf32>
    %179 = arith.addf %171, %178 : vector<2x32xf32>
    %180 = arith.negf %179 : vector<2x32xf32>
    %181 = math.exp %180 : vector<2x32xf32>
    %cst_121 = arith.constant 1.000000e+00 : f32
    %182 = vector.broadcast %cst_121 : f32 to vector<2x32xf32>
    %183 = arith.addf %182, %181 : vector<2x32xf32>
    %184 = arith.divf %182, %183 : vector<2x32xf32>
    %cst_122 = arith.constant dense<0.000000e+00> : vector<2x32xf32>
    %185 = tpu.matmul %112, %59, %cst_122 {dimension_numbers = #tpu.dot_dimension_numbers<[1], [0], [0], [1], [0, 0, 1, 1], [], []>} : vector<2x32xf32>, vector<32x32xf32>, vector<2x32xf32> -> vector<2x32xf32>
    %186 = arith.addf %174, %185 : vector<2x32xf32>
    %187 = arith.negf %186 : vector<2x32xf32>
    %188 = math.exp %187 : vector<2x32xf32>
    %cst_123 = arith.constant 1.000000e+00 : f32
    %189 = vector.broadcast %cst_123 : f32 to vector<2x32xf32>
    %190 = arith.addf %189, %188 : vector<2x32xf32>
    %191 = arith.divf %189, %190 : vector<2x32xf32>
    %cst_124 = arith.constant dense<0.000000e+00> : vector<2x32xf32>
    %192 = tpu.matmul %112, %61, %cst_124 {dimension_numbers = #tpu.dot_dimension_numbers<[1], [0], [0], [1], [0, 0, 1, 1], [], []>} : vector<2x32xf32>, vector<32x32xf32>, vector<2x32xf32> -> vector<2x32xf32>
    %193 = vector.broadcast %69 : vector<1x32xf32> to vector<2x32xf32>
    %194 = arith.addf %192, %193 : vector<2x32xf32>
    %195 = arith.mulf %184, %194 : vector<2x32xf32>
    %196 = arith.addf %177, %195 : vector<2x32xf32>
    %197 = math.tanh %196 : vector<2x32xf32>
    %cst_125 = arith.constant 1.000000e+00 : f32
    %198 = vector.broadcast %cst_125 : f32 to vector<2x32xf32>
    %199 = arith.subf %198, %191 : vector<2x32xf32>
    %200 = arith.mulf %199, %197 : vector<2x32xf32>
    %201 = arith.mulf %191, %112 : vector<2x32xf32>
    %202 = arith.addf %200, %201 : vector<2x32xf32>
    %203 = vector.broadcast %c1_i32 : i32 to vector<2x1xi32>
    %204 = arith.cmpi slt, %203, %0 : vector<2x1xi32>
    %205 = vector.shape_cast %204 : vector<2x1xi1> to vector<2x1xi1>
    %206 = vector.broadcast %205 : vector<2x1xi1> to vector<2x32xi1>
    %207 = arith.select %206, %202, %112 : vector<2x32xi1>, vector<2x32xf32>
    %cst_126 = arith.constant 0.000000e+00 : f32
    %208 = vector.shape_cast %204 : vector<2x1xi1> to vector<2x1xi1>
    %209 = vector.broadcast %208 : vector<2x1xi1> to vector<2x32xi1>
    %210 = vector.broadcast %cst_126 : f32 to vector<2x32xf32>
    %211 = arith.select %209, %202, %210 : vector<2x32xi1>, vector<2x32xf32>
    %212 = arith.index_cast %c1_i32 : i32 to index
    %c0_127 = arith.constant 0 : index
    %c0_128 = arith.constant 0 : index
    %213 = vector.load %arg18[%212, %c0_127, %c0_128] : memref<8x2x32xf32, #tpu.memory_space<vmem>>, vector<1x2x32xf32>
    %214 = vector.shape_cast %213 : vector<1x2x32xf32> to vector<2x32xf32>
    %215 = vector.shape_cast %211 : vector<2x32xf32> to vector<1x2x32xf32>
    tpu.vector_store %arg18[%212, %c0_127, %c0_128], %215 {strides = array<i32>} : memref<8x2x32xf32, #tpu.memory_space<vmem>>, vector<1x2x32xf32>,
    %216 = arith.index_cast %168 : i32 to index
    %c0_129 = arith.constant 0 : index
    %c0_130 = arith.constant 0 : index
    %217 = vector.load %arg15[%216, %c0_129, %c0_130] : memref<8x2x32xf32, #tpu.memory_space<vmem>>, vector<1x2x32xf32>
    %218 = vector.shape_cast %217 : vector<1x2x32xf32> to vector<2x32xf32>
    %219 = arith.index_cast %168 : i32 to index
    %c0_131 = arith.constant 0 : index
    %c0_132 = arith.constant 0 : index
    %220 = vector.load %arg16[%219, %c0_131, %c0_132] : memref<8x2x32xf32, #tpu.memory_space<vmem>>, vector<1x2x32xf32>
    %221 = vector.shape_cast %220 : vector<1x2x32xf32> to vector<2x32xf32>
    %222 = arith.index_cast %168 : i32 to index
    %c0_133 = arith.constant 0 : index
    %c0_134 = arith.constant 0 : index
    %223 = vector.load %arg17[%222, %c0_133, %c0_134] : memref<8x2x32xf32, #tpu.memory_space<vmem>>, vector<1x2x32xf32>
    %224 = vector.shape_cast %223 : vector<1x2x32xf32> to vector<2x32xf32>
    %cst_135 = arith.constant dense<0.000000e+00> : vector<2x32xf32>
    %225 = tpu.matmul %159, %63, %cst_135 {dimension_numbers = #tpu.dot_dimension_numbers<[1], [0], [0], [1], [0, 0, 1, 1], [], []>} : vector<2x32xf32>, vector<32x32xf32>, vector<2x32xf32> -> vector<2x32xf32>
    %226 = arith.addf %218, %225 : vector<2x32xf32>
    %227 = arith.negf %226 : vector<2x32xf32>
    %228 = math.exp %227 : vector<2x32xf32>
    %cst_136 = arith.constant 1.000000e+00 : f32
    %229 = vector.broadcast %cst_136 : f32 to vector<2x32xf32>
    %230 = arith.addf %229, %228 : vector<2x32xf32>
    %231 = arith.divf %229, %230 : vector<2x32xf32>
    %cst_137 = arith.constant dense<0.000000e+00> : vector<2x32xf32>
    %232 = tpu.matmul %159, %65, %cst_137 {dimension_numbers = #tpu.dot_dimension_numbers<[1], [0], [0], [1], [0, 0, 1, 1], [], []>} : vector<2x32xf32>, vector<32x32xf32>, vector<2x32xf32> -> vector<2x32xf32>
    %233 = arith.addf %221, %232 : vector<2x32xf32>
    %234 = arith.negf %233 : vector<2x32xf32>
    %235 = math.exp %234 : vector<2x32xf32>
    %cst_138 = arith.constant 1.000000e+00 : f32
    %236 = vector.broadcast %cst_138 : f32 to vector<2x32xf32>
    %237 = arith.addf %236, %235 : vector<2x32xf32>
    %238 = arith.divf %236, %237 : vector<2x32xf32>
    %cst_139 = arith.constant dense<0.000000e+00> : vector<2x32xf32>
    %239 = tpu.matmul %159, %67, %cst_139 {dimension_numbers = #tpu.dot_dimension_numbers<[1], [0], [0], [1], [0, 0, 1, 1], [], []>} : vector<2x32xf32>, vector<32x32xf32>, vector<2x32xf32> -> vector<2x32xf32>
    %240 = vector.broadcast %71 : vector<1x32xf32> to vector<2x32xf32>
    %241 = arith.addf %239, %240 : vector<2x32xf32>
    %242 = arith.mulf %231, %241 : vector<2x32xf32>
    %243 = arith.addf %224, %242 : vector<2x32xf32>
    %244 = math.tanh %243 : vector<2x32xf32>
    %cst_140 = arith.constant 1.000000e+00 : f32
    %245 = vector.broadcast %cst_140 : f32 to vector<2x32xf32>
    %246 = arith.subf %245, %238 : vector<2x32xf32>
    %247 = arith.mulf %246, %244 : vector<2x32xf32>
    %248 = arith.mulf %238, %159 : vector<2x32xf32>
    %249 = arith.addf %247, %248 : vector<2x32xf32>
    %250 = vector.broadcast %168 : i32 to vector<2x1xi32>
    %251 = arith.cmpi slt, %250, %0 : vector<2x1xi32>
    %252 = vector.shape_cast %251 : vector<2x1xi1> to vector<2x1xi1>
    %253 = vector.broadcast %252 : vector<2x1xi1> to vector<2x32xi1>
    %254 = arith.select %253, %249, %159 : vector<2x32xi1>, vector<2x32xf32>
    %cst_141 = arith.constant 0.000000e+00 : f32
    %255 = vector.shape_cast %251 : vector<2x1xi1> to vector<2x1xi1>
    %256 = vector.broadcast %255 : vector<2x1xi1> to vector<2x32xi1>
    %257 = vector.broadcast %cst_141 : f32 to vector<2x32xf32>
    %258 = arith.select %256, %249, %257 : vector<2x32xi1>, vector<2x32xf32>
    %259 = arith.index_cast %168 : i32 to index
    %c0_142 = arith.constant 0 : index
    %c0_143 = arith.constant 0 : index
    %260 = vector.load %arg19[%259, %c0_142, %c0_143] : memref<8x2x32xf32, #tpu.memory_space<vmem>>, vector<1x2x32xf32>
    %261 = vector.shape_cast %260 : vector<1x2x32xf32> to vector<2x32xf32>
    %262 = vector.shape_cast %258 : vector<2x32xf32> to vector<1x2x32xf32>
    tpu.vector_store %arg19[%259, %c0_142, %c0_143], %262 {strides = array<i32>} : memref<8x2x32xf32, #tpu.memory_space<vmem>>, vector<1x2x32xf32>,
    %c2_i32 = arith.constant 2 : i32
    %c7_i32_144 = arith.constant 7 : i32
    %263 = arith.subi %c7_i32_144, %c2_i32 : i32
    %264 = arith.index_cast %c2_i32 : i32 to index
    %c0_145 = arith.constant 0 : index
    %c0_146 = arith.constant 0 : index
    %265 = vector.load %arg12[%264, %c0_145, %c0_146] : memref<8x2x32xf32, #tpu.memory_space<vmem>>, vector<1x2x32xf32>
    %266 = vector.shape_cast %265 : vector<1x2x32xf32> to vector<2x32xf32>
    %267 = arith.index_cast %c2_i32 : i32 to index
    %c0_147 = arith.constant 0 : index
    %c0_148 = arith.constant 0 : index
    %268 = vector.load %arg13[%267, %c0_147, %c0_148] : memref<8x2x32xf32, #tpu.memory_space<vmem>>, vector<1x2x32xf32>
    %269 = vector.shape_cast %268 : vector<1x2x32xf32> to vector<2x32xf32>
    %270 = arith.index_cast %c2_i32 : i32 to index
    %c0_149 = arith.constant 0 : index
    %c0_150 = arith.constant 0 : index
    %271 = vector.load %arg14[%270, %c0_149, %c0_150] : memref<8x2x32xf32, #tpu.memory_space<vmem>>, vector<1x2x32xf32>
    %272 = vector.shape_cast %271 : vector<1x2x32xf32> to vector<2x32xf32>
    %cst_151 = arith.constant dense<0.000000e+00> : vector<2x32xf32>
    %273 = tpu.matmul %207, %57, %cst_151 {dimension_numbers = #tpu.dot_dimension_numbers<[1], [0], [0], [1], [0, 0, 1, 1], [], []>} : vector<2x32xf32>, vector<32x32xf32>, vector<2x32xf32> -> vector<2x32xf32>
    %274 = arith.addf %266, %273 : vector<2x32xf32>
    %275 = arith.negf %274 : vector<2x32xf32>
    %276 = math.exp %275 : vector<2x32xf32>
    %cst_152 = arith.constant 1.000000e+00 : f32
    %277 = vector.broadcast %cst_152 : f32 to vector<2x32xf32>
    %278 = arith.addf %277, %276 : vector<2x32xf32>
    %279 = arith.divf %277, %278 : vector<2x32xf32>
    %cst_153 = arith.constant dense<0.000000e+00> : vector<2x32xf32>
    %280 = tpu.matmul %207, %59, %cst_153 {dimension_numbers = #tpu.dot_dimension_numbers<[1], [0], [0], [1], [0, 0, 1, 1], [], []>} : vector<2x32xf32>, vector<32x32xf32>, vector<2x32xf32> -> vector<2x32xf32>
    %281 = arith.addf %269, %280 : vector<2x32xf32>
    %282 = arith.negf %281 : vector<2x32xf32>
    %283 = math.exp %282 : vector<2x32xf32>
    %cst_154 = arith.constant 1.000000e+00 : f32
    %284 = vector.broadcast %cst_154 : f32 to vector<2x32xf32>
    %285 = arith.addf %284, %283 : vector<2x32xf32>
    %286 = arith.divf %284, %285 : vector<2x32xf32>
    %cst_155 = arith.constant dense<0.000000e+00> : vector<2x32xf32>
    %287 = tpu.matmul %207, %61, %cst_155 {dimension_numbers = #tpu.dot_dimension_numbers<[1], [0], [0], [1], [0, 0, 1, 1], [], []>} : vector<2x32xf32>, vector<32x32xf32>, vector<2x32xf32> -> vector<2x32xf32>
    %288 = vector.broadcast %69 : vector<1x32xf32> to vector<2x32xf32>
    %289 = arith.addf %287, %288 : vector<2x32xf32>
    %290 = arith.mulf %279, %289 : vector<2x32xf32>
    %291 = arith.addf %272, %290 : vector<2x32xf32>
    %292 = math.tanh %291 : vector<2x32xf32>
    %cst_156 = arith.constant 1.000000e+00 : f32
    %293 = vector.broadcast %cst_156 : f32 to vector<2x32xf32>
    %294 = arith.subf %293, %286 : vector<2x32xf32>
    %295 = arith.mulf %294, %292 : vector<2x32xf32>
    %296 = arith.mulf %286, %207 : vector<2x32xf32>
    %297 = arith.addf %295, %296 : vector<2x32xf32>
    %298 = vector.broadcast %c2_i32 : i32 to vector<2x1xi32>
    %299 = arith.cmpi slt, %298, %0 : vector<2x1xi32>
    %300 = vector.shape_cast %299 : vector<2x1xi1> to vector<2x1xi1>
    %301 = vector.broadcast %300 : vector<2x1xi1> to vector<2x32xi1>
    %302 = arith.select %301, %297, %207 : vector<2x32xi1>, vector<2x32xf32>
    %cst_157 = arith.constant 0.000000e+00 : f32
    %303 = vector.shape_cast %299 : vector<2x1xi1> to vector<2x1xi1>
    %304 = vector.broadcast %303 : vector<2x1xi1> to vector<2x32xi1>
    %305 = vector.broadcast %cst_157 : f32 to vector<2x32xf32>
    %306 = arith.select %304, %297, %305 : vector<2x32xi1>, vector<2x32xf32>
    %307 = arith.index_cast %c2_i32 : i32 to index
    %c0_158 = arith.constant 0 : index
    %c0_159 = arith.constant 0 : index
    %308 = vector.load %arg18[%307, %c0_158, %c0_159] : memref<8x2x32xf32, #tpu.memory_space<vmem>>, vector<1x2x32xf32>
    %309 = vector.shape_cast %308 : vector<1x2x32xf32> to vector<2x32xf32>
    %310 = vector.shape_cast %306 : vector<2x32xf32> to vector<1x2x32xf32>
    tpu.vector_store %arg18[%307, %c0_158, %c0_159], %310 {strides = array<i32>} : memref<8x2x32xf32, #tpu.memory_space<vmem>>, vector<1x2x32xf32>,
    %311 = arith.index_cast %263 : i32 to index
    %c0_160 = arith.constant 0 : index
    %c0_161 = arith.constant 0 : index
    %312 = vector.load %arg15[%311, %c0_160, %c0_161] : memref<8x2x32xf32, #tpu.memory_space<vmem>>, vector<1x2x32xf32>
    %313 = vector.shape_cast %312 : vector<1x2x32xf32> to vector<2x32xf32>
    %314 = arith.index_cast %263 : i32 to index
    %c0_162 = arith.constant 0 : index
    %c0_163 = arith.constant 0 : index
    %315 = vector.load %arg16[%314, %c0_162, %c0_163] : memref<8x2x32xf32, #tpu.memory_space<vmem>>, vector<1x2x32xf32>
    %316 = vector.shape_cast %315 : vector<1x2x32xf32> to vector<2x32xf32>
    %317 = arith.index_cast %263 : i32 to index
    %c0_164 = arith.constant 0 : index
    %c0_165 = arith.constant 0 : index
    %318 = vector.load %arg17[%317, %c0_164, %c0_165] : memref<8x2x32xf32, #tpu.memory_space<vmem>>, vector<1x2x32xf32>
    %319 = vector.shape_cast %318 : vector<1x2x32xf32> to vector<2x32xf32>
    %cst_166 = arith.constant dense<0.000000e+00> : vector<2x32xf32>
    %320 = tpu.matmul %254, %63, %cst_166 {dimension_numbers = #tpu.dot_dimension_numbers<[1], [0], [0], [1], [0, 0, 1, 1], [], []>} : vector<2x32xf32>, vector<32x32xf32>, vector<2x32xf32> -> vector<2x32xf32>
    %321 = arith.addf %313, %320 : vector<2x32xf32>
    %322 = arith.negf %321 : vector<2x32xf32>
    %323 = math.exp %322 : vector<2x32xf32>
    %cst_167 = arith.constant 1.000000e+00 : f32
    %324 = vector.broadcast %cst_167 : f32 to vector<2x32xf32>
    %325 = arith.addf %324, %323 : vector<2x32xf32>
    %326 = arith.divf %324, %325 : vector<2x32xf32>
    %cst_168 = arith.constant dense<0.000000e+00> : vector<2x32xf32>
    %327 = tpu.matmul %254, %65, %cst_168 {dimension_numbers = #tpu.dot_dimension_numbers<[1], [0], [0], [1], [0, 0, 1, 1], [], []>} : vector<2x32xf32>, vector<32x32xf32>, vector<2x32xf32> -> vector<2x32xf32>
    %328 = arith.addf %316, %327 : vector<2x32xf32>
    %329 = arith.negf %328 : vector<2x32xf32>
    %330 = math.exp %329 : vector<2x32xf32>
    %cst_169 = arith.constant 1.000000e+00 : f32
    %331 = vector.broadcast %cst_169 : f32 to vector<2x32xf32>
    %332 = arith.addf %331, %330 : vector<2x32xf32>
    %333 = arith.divf %331, %332 : vector<2x32xf32>
    %cst_170 = arith.constant dense<0.000000e+00> : vector<2x32xf32>
    %334 = tpu.matmul %254, %67, %cst_170 {dimension_numbers = #tpu.dot_dimension_numbers<[1], [0], [0], [1], [0, 0, 1, 1], [], []>} : vector<2x32xf32>, vector<32x32xf32>, vector<2x32xf32> -> vector<2x32xf32>
    %335 = vector.broadcast %71 : vector<1x32xf32> to vector<2x32xf32>
    %336 = arith.addf %334, %335 : vector<2x32xf32>
    %337 = arith.mulf %326, %336 : vector<2x32xf32>
    %338 = arith.addf %319, %337 : vector<2x32xf32>
    %339 = math.tanh %338 : vector<2x32xf32>
    %cst_171 = arith.constant 1.000000e+00 : f32
    %340 = vector.broadcast %cst_171 : f32 to vector<2x32xf32>
    %341 = arith.subf %340, %333 : vector<2x32xf32>
    %342 = arith.mulf %341, %339 : vector<2x32xf32>
    %343 = arith.mulf %333, %254 : vector<2x32xf32>
    %344 = arith.addf %342, %343 : vector<2x32xf32>
    %345 = vector.broadcast %263 : i32 to vector<2x1xi32>
    %346 = arith.cmpi slt, %345, %0 : vector<2x1xi32>
    %347 = vector.shape_cast %346 : vector<2x1xi1> to vector<2x1xi1>
    %348 = vector.broadcast %347 : vector<2x1xi1> to vector<2x32xi1>
    %349 = arith.select %348, %344, %254 : vector<2x32xi1>, vector<2x32xf32>
    %cst_172 = arith.constant 0.000000e+00 : f32
    %350 = vector.shape_cast %346 : vector<2x1xi1> to vector<2x1xi1>
    %351 = vector.broadcast %350 : vector<2x1xi1> to vector<2x32xi1>
    %352 = vector.broadcast %cst_172 : f32 to vector<2x32xf32>
    %353 = arith.select %351, %344, %352 : vector<2x32xi1>, vector<2x32xf32>
    %354 = arith.index_cast %263 : i32 to index
    %c0_173 = arith.constant 0 : index
    %c0_174 = arith.constant 0 : index
    %355 = vector.load %arg19[%354, %c0_173, %c0_174] : memref<8x2x32xf32, #tpu.memory_space<vmem>>, vector<1x2x32xf32>
    %356 = vector.shape_cast %355 : vector<1x2x32xf32> to vector<2x32xf32>
    %357 = vector.shape_cast %353 : vector<2x32xf32> to vector<1x2x32xf32>
    tpu.vector_store %arg19[%354, %c0_173, %c0_174], %357 {strides = array<i32>} : memref<8x2x32xf32, #tpu.memory_space<vmem>>, vector<1x2x32xf32>,
    %c3_i32 = arith.constant 3 : i32
    %c7_i32_175 = arith.constant 7 : i32
    %358 = arith.subi %c7_i32_175, %c3_i32 : i32
    %359 = arith.index_cast %c3_i32 : i32 to index
    %c0_176 = arith.constant 0 : index
    %c0_177 = arith.constant 0 : index
    %360 = vector.load %arg12[%359, %c0_176, %c0_177] : memref<8x2x32xf32, #tpu.memory_space<vmem>>, vector<1x2x32xf32>
    %361 = vector.shape_cast %360 : vector<1x2x32xf32> to vector<2x32xf32>
    %362 = arith.index_cast %c3_i32 : i32 to index
    %c0_178 = arith.constant 0 : index
    %c0_179 = arith.constant 0 : index
    %363 = vector.load %arg13[%362, %c0_178, %c0_179] : memref<8x2x32xf32, #tpu.memory_space<vmem>>, vector<1x2x32xf32>
    %364 = vector.shape_cast %363 : vector<1x2x32xf32> to vector<2x32xf32>
    %365 = arith.index_cast %c3_i32 : i32 to index
    %c0_180 = arith.constant 0 : index
    %c0_181 = arith.constant 0 : index
    %366 = vector.load %arg14[%365, %c0_180, %c0_181] : memref<8x2x32xf32, #tpu.memory_space<vmem>>, vector<1x2x32xf32>
    %367 = vector.shape_cast %366 : vector<1x2x32xf32> to vector<2x32xf32>
    %cst_182 = arith.constant dense<0.000000e+00> : vector<2x32xf32>
    %368 = tpu.matmul %302, %57, %cst_182 {dimension_numbers = #tpu.dot_dimension_numbers<[1], [0], [0], [1], [0, 0, 1, 1], [], []>} : vector<2x32xf32>, vector<32x32xf32>, vector<2x32xf32> -> vector<2x32xf32>
    %369 = arith.addf %361, %368 : vector<2x32xf32>
    %370 = arith.negf %369 : vector<2x32xf32>
    %371 = math.exp %370 : vector<2x32xf32>
    %cst_183 = arith.constant 1.000000e+00 : f32
    %372 = vector.broadcast %cst_183 : f32 to vector<2x32xf32>
    %373 = arith.addf %372, %371 : vector<2x32xf32>
    %374 = arith.divf %372, %373 : vector<2x32xf32>
    %cst_184 = arith.constant dense<0.000000e+00> : vector<2x32xf32>
    %375 = tpu.matmul %302, %59, %cst_184 {dimension_numbers = #tpu.dot_dimension_numbers<[1], [0], [0], [1], [0, 0, 1, 1], [], []>} : vector<2x32xf32>, vector<32x32xf32>, vector<2x32xf32> -> vector<2x32xf32>
    %376 = arith.addf %364, %375 : vector<2x32xf32>
    %377 = arith.negf %376 : vector<2x32xf32>
    %378 = math.exp %377 : vector<2x32xf32>
    %cst_185 = arith.constant 1.000000e+00 : f32
    %379 = vector.broadcast %cst_185 : f32 to vector<2x32xf32>
    %380 = arith.addf %379, %378 : vector<2x32xf32>
    %381 = arith.divf %379, %380 : vector<2x32xf32>
    %cst_186 = arith.constant dense<0.000000e+00> : vector<2x32xf32>
    %382 = tpu.matmul %302, %61, %cst_186 {dimension_numbers = #tpu.dot_dimension_numbers<[1], [0], [0], [1], [0, 0, 1, 1], [], []>} : vector<2x32xf32>, vector<32x32xf32>, vector<2x32xf32> -> vector<2x32xf32>
    %383 = vector.broadcast %69 : vector<1x32xf32> to vector<2x32xf32>
    %384 = arith.addf %382, %383 : vector<2x32xf32>
    %385 = arith.mulf %374, %384 : vector<2x32xf32>
    %386 = arith.addf %367, %385 : vector<2x32xf32>
    %387 = math.tanh %386 : vector<2x32xf32>
    %cst_187 = arith.constant 1.000000e+00 : f32
    %388 = vector.broadcast %cst_187 : f32 to vector<2x32xf32>
    %389 = arith.subf %388, %381 : vector<2x32xf32>
    %390 = arith.mulf %389, %387 : vector<2x32xf32>
    %391 = arith.mulf %381, %302 : vector<2x32xf32>
    %392 = arith.addf %390, %391 : vector<2x32xf32>
    %393 = vector.broadcast %c3_i32 : i32 to vector<2x1xi32>
    %394 = arith.cmpi slt, %393, %0 : vector<2x1xi32>
    %395 = vector.shape_cast %394 : vector<2x1xi1> to vector<2x1xi1>
    %396 = vector.broadcast %395 : vector<2x1xi1> to vector<2x32xi1>
    %397 = arith.select %396, %392, %302 : vector<2x32xi1>, vector<2x32xf32>
    %cst_188 = arith.constant 0.000000e+00 : f32
    %398 = vector.shape_cast %394 : vector<2x1xi1> to vector<2x1xi1>
    %399 = vector.broadcast %398 : vector<2x1xi1> to vector<2x32xi1>
    %400 = vector.broadcast %cst_188 : f32 to vector<2x32xf32>
    %401 = arith.select %399, %392, %400 : vector<2x32xi1>, vector<2x32xf32>
    %402 = arith.index_cast %c3_i32 : i32 to index
    %c0_189 = arith.constant 0 : index
    %c0_190 = arith.constant 0 : index
    %403 = vector.load %arg18[%402, %c0_189, %c0_190] : memref<8x2x32xf32, #tpu.memory_space<vmem>>, vector<1x2x32xf32>
    %404 = vector.shape_cast %403 : vector<1x2x32xf32> to vector<2x32xf32>
    %405 = vector.shape_cast %401 : vector<2x32xf32> to vector<1x2x32xf32>
    tpu.vector_store %arg18[%402, %c0_189, %c0_190], %405 {strides = array<i32>} : memref<8x2x32xf32, #tpu.memory_space<vmem>>, vector<1x2x32xf32>,
    %406 = arith.index_cast %358 : i32 to index
    %c0_191 = arith.constant 0 : index
    %c0_192 = arith.constant 0 : index
    %407 = vector.load %arg15[%406, %c0_191, %c0_192] : memref<8x2x32xf32, #tpu.memory_space<vmem>>, vector<1x2x32xf32>
    %408 = vector.shape_cast %407 : vector<1x2x32xf32> to vector<2x32xf32>
    %409 = arith.index_cast %358 : i32 to index
    %c0_193 = arith.constant 0 : index
    %c0_194 = arith.constant 0 : index
    %410 = vector.load %arg16[%409, %c0_193, %c0_194] : memref<8x2x32xf32, #tpu.memory_space<vmem>>, vector<1x2x32xf32>
    %411 = vector.shape_cast %410 : vector<1x2x32xf32> to vector<2x32xf32>
    %412 = arith.index_cast %358 : i32 to index
    %c0_195 = arith.constant 0 : index
    %c0_196 = arith.constant 0 : index
    %413 = vector.load %arg17[%412, %c0_195, %c0_196] : memref<8x2x32xf32, #tpu.memory_space<vmem>>, vector<1x2x32xf32>
    %414 = vector.shape_cast %413 : vector<1x2x32xf32> to vector<2x32xf32>
    %cst_197 = arith.constant dense<0.000000e+00> : vector<2x32xf32>
    %415 = tpu.matmul %349, %63, %cst_197 {dimension_numbers = #tpu.dot_dimension_numbers<[1], [0], [0], [1], [0, 0, 1, 1], [], []>} : vector<2x32xf32>, vector<32x32xf32>, vector<2x32xf32> -> vector<2x32xf32>
    %416 = arith.addf %408, %415 : vector<2x32xf32>
    %417 = arith.negf %416 : vector<2x32xf32>
    %418 = math.exp %417 : vector<2x32xf32>
    %cst_198 = arith.constant 1.000000e+00 : f32
    %419 = vector.broadcast %cst_198 : f32 to vector<2x32xf32>
    %420 = arith.addf %419, %418 : vector<2x32xf32>
    %421 = arith.divf %419, %420 : vector<2x32xf32>
    %cst_199 = arith.constant dense<0.000000e+00> : vector<2x32xf32>
    %422 = tpu.matmul %349, %65, %cst_199 {dimension_numbers = #tpu.dot_dimension_numbers<[1], [0], [0], [1], [0, 0, 1, 1], [], []>} : vector<2x32xf32>, vector<32x32xf32>, vector<2x32xf32> -> vector<2x32xf32>
    %423 = arith.addf %411, %422 : vector<2x32xf32>
    %424 = arith.negf %423 : vector<2x32xf32>
    %425 = math.exp %424 : vector<2x32xf32>
    %cst_200 = arith.constant 1.000000e+00 : f32
    %426 = vector.broadcast %cst_200 : f32 to vector<2x32xf32>
    %427 = arith.addf %426, %425 : vector<2x32xf32>
    %428 = arith.divf %426, %427 : vector<2x32xf32>
    %cst_201 = arith.constant dense<0.000000e+00> : vector<2x32xf32>
    %429 = tpu.matmul %349, %67, %cst_201 {dimension_numbers = #tpu.dot_dimension_numbers<[1], [0], [0], [1], [0, 0, 1, 1], [], []>} : vector<2x32xf32>, vector<32x32xf32>, vector<2x32xf32> -> vector<2x32xf32>
    %430 = vector.broadcast %71 : vector<1x32xf32> to vector<2x32xf32>
    %431 = arith.addf %429, %430 : vector<2x32xf32>
    %432 = arith.mulf %421, %431 : vector<2x32xf32>
    %433 = arith.addf %414, %432 : vector<2x32xf32>
    %434 = math.tanh %433 : vector<2x32xf32>
    %cst_202 = arith.constant 1.000000e+00 : f32
    %435 = vector.broadcast %cst_202 : f32 to vector<2x32xf32>
    %436 = arith.subf %435, %428 : vector<2x32xf32>
    %437 = arith.mulf %436, %434 : vector<2x32xf32>
    %438 = arith.mulf %428, %349 : vector<2x32xf32>
    %439 = arith.addf %437, %438 : vector<2x32xf32>
    %440 = vector.broadcast %358 : i32 to vector<2x1xi32>
    %441 = arith.cmpi slt, %440, %0 : vector<2x1xi32>
    %442 = vector.shape_cast %441 : vector<2x1xi1> to vector<2x1xi1>
    %443 = vector.broadcast %442 : vector<2x1xi1> to vector<2x32xi1>
    %444 = arith.select %443, %439, %349 : vector<2x32xi1>, vector<2x32xf32>
    %cst_203 = arith.constant 0.000000e+00 : f32
    %445 = vector.shape_cast %441 : vector<2x1xi1> to vector<2x1xi1>
    %446 = vector.broadcast %445 : vector<2x1xi1> to vector<2x32xi1>
    %447 = vector.broadcast %cst_203 : f32 to vector<2x32xf32>
    %448 = arith.select %446, %439, %447 : vector<2x32xi1>, vector<2x32xf32>
    %449 = arith.index_cast %358 : i32 to index
    %c0_204 = arith.constant 0 : index
    %c0_205 = arith.constant 0 : index
    %450 = vector.load %arg19[%449, %c0_204, %c0_205] : memref<8x2x32xf32, #tpu.memory_space<vmem>>, vector<1x2x32xf32>
    %451 = vector.shape_cast %450 : vector<1x2x32xf32> to vector<2x32xf32>
    %452 = vector.shape_cast %448 : vector<2x32xf32> to vector<1x2x32xf32>
    tpu.vector_store %arg19[%449, %c0_204, %c0_205], %452 {strides = array<i32>} : memref<8x2x32xf32, #tpu.memory_space<vmem>>, vector<1x2x32xf32>,
    %c4_i32 = arith.constant 4 : i32
    %c7_i32_206 = arith.constant 7 : i32
    %453 = arith.subi %c7_i32_206, %c4_i32 : i32
    %454 = arith.index_cast %c4_i32 : i32 to index
    %c0_207 = arith.constant 0 : index
    %c0_208 = arith.constant 0 : index
    %455 = vector.load %arg12[%454, %c0_207, %c0_208] : memref<8x2x32xf32, #tpu.memory_space<vmem>>, vector<1x2x32xf32>
    %456 = vector.shape_cast %455 : vector<1x2x32xf32> to vector<2x32xf32>
    %457 = arith.index_cast %c4_i32 : i32 to index
    %c0_209 = arith.constant 0 : index
    %c0_210 = arith.constant 0 : index
    %458 = vector.load %arg13[%457, %c0_209, %c0_210] : memref<8x2x32xf32, #tpu.memory_space<vmem>>, vector<1x2x32xf32>
    %459 = vector.shape_cast %458 : vector<1x2x32xf32> to vector<2x32xf32>
    %460 = arith.index_cast %c4_i32 : i32 to index
    %c0_211 = arith.constant 0 : index
    %c0_212 = arith.constant 0 : index
    %461 = vector.load %arg14[%460, %c0_211, %c0_212] : memref<8x2x32xf32, #tpu.memory_space<vmem>>, vector<1x2x32xf32>
    %462 = vector.shape_cast %461 : vector<1x2x32xf32> to vector<2x32xf32>
    %cst_213 = arith.constant dense<0.000000e+00> : vector<2x32xf32>
    %463 = tpu.matmul %397, %57, %cst_213 {dimension_numbers = #tpu.dot_dimension_numbers<[1], [0], [0], [1], [0, 0, 1, 1], [], []>} : vector<2x32xf32>, vector<32x32xf32>, vector<2x32xf32> -> vector<2x32xf32>
    %464 = arith.addf %456, %463 : vector<2x32xf32>
    %465 = arith.negf %464 : vector<2x32xf32>
    %466 = math.exp %465 : vector<2x32xf32>
    %cst_214 = arith.constant 1.000000e+00 : f32
    %467 = vector.broadcast %cst_214 : f32 to vector<2x32xf32>
    %468 = arith.addf %467, %466 : vector<2x32xf32>
    %469 = arith.divf %467, %468 : vector<2x32xf32>
    %cst_215 = arith.constant dense<0.000000e+00> : vector<2x32xf32>
    %470 = tpu.matmul %397, %59, %cst_215 {dimension_numbers = #tpu.dot_dimension_numbers<[1], [0], [0], [1], [0, 0, 1, 1], [], []>} : vector<2x32xf32>, vector<32x32xf32>, vector<2x32xf32> -> vector<2x32xf32>
    %471 = arith.addf %459, %470 : vector<2x32xf32>
    %472 = arith.negf %471 : vector<2x32xf32>
    %473 = math.exp %472 : vector<2x32xf32>
    %cst_216 = arith.constant 1.000000e+00 : f32
    %474 = vector.broadcast %cst_216 : f32 to vector<2x32xf32>
    %475 = arith.addf %474, %473 : vector<2x32xf32>
    %476 = arith.divf %474, %475 : vector<2x32xf32>
    %cst_217 = arith.constant dense<0.000000e+00> : vector<2x32xf32>
    %477 = tpu.matmul %397, %61, %cst_217 {dimension_numbers = #tpu.dot_dimension_numbers<[1], [0], [0], [1], [0, 0, 1, 1], [], []>} : vector<2x32xf32>, vector<32x32xf32>, vector<2x32xf32> -> vector<2x32xf32>
    %478 = vector.broadcast %69 : vector<1x32xf32> to vector<2x32xf32>
    %479 = arith.addf %477, %478 : vector<2x32xf32>
    %480 = arith.mulf %469, %479 : vector<2x32xf32>
    %481 = arith.addf %462, %480 : vector<2x32xf32>
    %482 = math.tanh %481 : vector<2x32xf32>
    %cst_218 = arith.constant 1.000000e+00 : f32
    %483 = vector.broadcast %cst_218 : f32 to vector<2x32xf32>
    %484 = arith.subf %483, %476 : vector<2x32xf32>
    %485 = arith.mulf %484, %482 : vector<2x32xf32>
    %486 = arith.mulf %476, %397 : vector<2x32xf32>
    %487 = arith.addf %485, %486 : vector<2x32xf32>
    %488 = vector.broadcast %c4_i32 : i32 to vector<2x1xi32>
    %489 = arith.cmpi slt, %488, %0 : vector<2x1xi32>
    %490 = vector.shape_cast %489 : vector<2x1xi1> to vector<2x1xi1>
    %491 = vector.broadcast %490 : vector<2x1xi1> to vector<2x32xi1>
    %492 = arith.select %491, %487, %397 : vector<2x32xi1>, vector<2x32xf32>
    %cst_219 = arith.constant 0.000000e+00 : f32
    %493 = vector.shape_cast %489 : vector<2x1xi1> to vector<2x1xi1>
    %494 = vector.broadcast %493 : vector<2x1xi1> to vector<2x32xi1>
    %495 = vector.broadcast %cst_219 : f32 to vector<2x32xf32>
    %496 = arith.select %494, %487, %495 : vector<2x32xi1>, vector<2x32xf32>
    %497 = arith.index_cast %c4_i32 : i32 to index
    %c0_220 = arith.constant 0 : index
    %c0_221 = arith.constant 0 : index
    %498 = vector.load %arg18[%497, %c0_220, %c0_221] : memref<8x2x32xf32, #tpu.memory_space<vmem>>, vector<1x2x32xf32>
    %499 = vector.shape_cast %498 : vector<1x2x32xf32> to vector<2x32xf32>
    %500 = vector.shape_cast %496 : vector<2x32xf32> to vector<1x2x32xf32>
    tpu.vector_store %arg18[%497, %c0_220, %c0_221], %500 {strides = array<i32>} : memref<8x2x32xf32, #tpu.memory_space<vmem>>, vector<1x2x32xf32>,
    %501 = arith.index_cast %453 : i32 to index
    %c0_222 = arith.constant 0 : index
    %c0_223 = arith.constant 0 : index
    %502 = vector.load %arg15[%501, %c0_222, %c0_223] : memref<8x2x32xf32, #tpu.memory_space<vmem>>, vector<1x2x32xf32>
    %503 = vector.shape_cast %502 : vector<1x2x32xf32> to vector<2x32xf32>
    %504 = arith.index_cast %453 : i32 to index
    %c0_224 = arith.constant 0 : index
    %c0_225 = arith.constant 0 : index
    %505 = vector.load %arg16[%504, %c0_224, %c0_225] : memref<8x2x32xf32, #tpu.memory_space<vmem>>, vector<1x2x32xf32>
    %506 = vector.shape_cast %505 : vector<1x2x32xf32> to vector<2x32xf32>
    %507 = arith.index_cast %453 : i32 to index
    %c0_226 = arith.constant 0 : index
    %c0_227 = arith.constant 0 : index
    %508 = vector.load %arg17[%507, %c0_226, %c0_227] : memref<8x2x32xf32, #tpu.memory_space<vmem>>, vector<1x2x32xf32>
    %509 = vector.shape_cast %508 : vector<1x2x32xf32> to vector<2x32xf32>
    %cst_228 = arith.constant dense<0.000000e+00> : vector<2x32xf32>
    %510 = tpu.matmul %444, %63, %cst_228 {dimension_numbers = #tpu.dot_dimension_numbers<[1], [0], [0], [1], [0, 0, 1, 1], [], []>} : vector<2x32xf32>, vector<32x32xf32>, vector<2x32xf32> -> vector<2x32xf32>
    %511 = arith.addf %503, %510 : vector<2x32xf32>
    %512 = arith.negf %511 : vector<2x32xf32>
    %513 = math.exp %512 : vector<2x32xf32>
    %cst_229 = arith.constant 1.000000e+00 : f32
    %514 = vector.broadcast %cst_229 : f32 to vector<2x32xf32>
    %515 = arith.addf %514, %513 : vector<2x32xf32>
    %516 = arith.divf %514, %515 : vector<2x32xf32>
    %cst_230 = arith.constant dense<0.000000e+00> : vector<2x32xf32>
    %517 = tpu.matmul %444, %65, %cst_230 {dimension_numbers = #tpu.dot_dimension_numbers<[1], [0], [0], [1], [0, 0, 1, 1], [], []>} : vector<2x32xf32>, vector<32x32xf32>, vector<2x32xf32> -> vector<2x32xf32>
    %518 = arith.addf %506, %517 : vector<2x32xf32>
    %519 = arith.negf %518 : vector<2x32xf32>
    %520 = math.exp %519 : vector<2x32xf32>
    %cst_231 = arith.constant 1.000000e+00 : f32
    %521 = vector.broadcast %cst_231 : f32 to vector<2x32xf32>
    %522 = arith.addf %521, %520 : vector<2x32xf32>
    %523 = arith.divf %521, %522 : vector<2x32xf32>
    %cst_232 = arith.constant dense<0.000000e+00> : vector<2x32xf32>
    %524 = tpu.matmul %444, %67, %cst_232 {dimension_numbers = #tpu.dot_dimension_numbers<[1], [0], [0], [1], [0, 0, 1, 1], [], []>} : vector<2x32xf32>, vector<32x32xf32>, vector<2x32xf32> -> vector<2x32xf32>
    %525 = vector.broadcast %71 : vector<1x32xf32> to vector<2x32xf32>
    %526 = arith.addf %524, %525 : vector<2x32xf32>
    %527 = arith.mulf %516, %526 : vector<2x32xf32>
    %528 = arith.addf %509, %527 : vector<2x32xf32>
    %529 = math.tanh %528 : vector<2x32xf32>
    %cst_233 = arith.constant 1.000000e+00 : f32
    %530 = vector.broadcast %cst_233 : f32 to vector<2x32xf32>
    %531 = arith.subf %530, %523 : vector<2x32xf32>
    %532 = arith.mulf %531, %529 : vector<2x32xf32>
    %533 = arith.mulf %523, %444 : vector<2x32xf32>
    %534 = arith.addf %532, %533 : vector<2x32xf32>
    %535 = vector.broadcast %453 : i32 to vector<2x1xi32>
    %536 = arith.cmpi slt, %535, %0 : vector<2x1xi32>
    %537 = vector.shape_cast %536 : vector<2x1xi1> to vector<2x1xi1>
    %538 = vector.broadcast %537 : vector<2x1xi1> to vector<2x32xi1>
    %539 = arith.select %538, %534, %444 : vector<2x32xi1>, vector<2x32xf32>
    %cst_234 = arith.constant 0.000000e+00 : f32
    %540 = vector.shape_cast %536 : vector<2x1xi1> to vector<2x1xi1>
    %541 = vector.broadcast %540 : vector<2x1xi1> to vector<2x32xi1>
    %542 = vector.broadcast %cst_234 : f32 to vector<2x32xf32>
    %543 = arith.select %541, %534, %542 : vector<2x32xi1>, vector<2x32xf32>
    %544 = arith.index_cast %453 : i32 to index
    %c0_235 = arith.constant 0 : index
    %c0_236 = arith.constant 0 : index
    %545 = vector.load %arg19[%544, %c0_235, %c0_236] : memref<8x2x32xf32, #tpu.memory_space<vmem>>, vector<1x2x32xf32>
    %546 = vector.shape_cast %545 : vector<1x2x32xf32> to vector<2x32xf32>
    %547 = vector.shape_cast %543 : vector<2x32xf32> to vector<1x2x32xf32>
    tpu.vector_store %arg19[%544, %c0_235, %c0_236], %547 {strides = array<i32>} : memref<8x2x32xf32, #tpu.memory_space<vmem>>, vector<1x2x32xf32>,
    %c5_i32 = arith.constant 5 : i32
    %c7_i32_237 = arith.constant 7 : i32
    %548 = arith.subi %c7_i32_237, %c5_i32 : i32
    %549 = arith.index_cast %c5_i32 : i32 to index
    %c0_238 = arith.constant 0 : index
    %c0_239 = arith.constant 0 : index
    %550 = vector.load %arg12[%549, %c0_238, %c0_239] : memref<8x2x32xf32, #tpu.memory_space<vmem>>, vector<1x2x32xf32>
    %551 = vector.shape_cast %550 : vector<1x2x32xf32> to vector<2x32xf32>
    %552 = arith.index_cast %c5_i32 : i32 to index
    %c0_240 = arith.constant 0 : index
    %c0_241 = arith.constant 0 : index
    %553 = vector.load %arg13[%552, %c0_240, %c0_241] : memref<8x2x32xf32, #tpu.memory_space<vmem>>, vector<1x2x32xf32>
    %554 = vector.shape_cast %553 : vector<1x2x32xf32> to vector<2x32xf32>
    %555 = arith.index_cast %c5_i32 : i32 to index
    %c0_242 = arith.constant 0 : index
    %c0_243 = arith.constant 0 : index
    %556 = vector.load %arg14[%555, %c0_242, %c0_243] : memref<8x2x32xf32, #tpu.memory_space<vmem>>, vector<1x2x32xf32>
    %557 = vector.shape_cast %556 : vector<1x2x32xf32> to vector<2x32xf32>
    %cst_244 = arith.constant dense<0.000000e+00> : vector<2x32xf32>
    %558 = tpu.matmul %492, %57, %cst_244 {dimension_numbers = #tpu.dot_dimension_numbers<[1], [0], [0], [1], [0, 0, 1, 1], [], []>} : vector<2x32xf32>, vector<32x32xf32>, vector<2x32xf32> -> vector<2x32xf32>
    %559 = arith.addf %551, %558 : vector<2x32xf32>
    %560 = arith.negf %559 : vector<2x32xf32>
    %561 = math.exp %560 : vector<2x32xf32>
    %cst_245 = arith.constant 1.000000e+00 : f32
    %562 = vector.broadcast %cst_245 : f32 to vector<2x32xf32>
    %563 = arith.addf %562, %561 : vector<2x32xf32>
    %564 = arith.divf %562, %563 : vector<2x32xf32>
    %cst_246 = arith.constant dense<0.000000e+00> : vector<2x32xf32>
    %565 = tpu.matmul %492, %59, %cst_246 {dimension_numbers = #tpu.dot_dimension_numbers<[1], [0], [0], [1], [0, 0, 1, 1], [], []>} : vector<2x32xf32>, vector<32x32xf32>, vector<2x32xf32> -> vector<2x32xf32>
    %566 = arith.addf %554, %565 : vector<2x32xf32>
    %567 = arith.negf %566 : vector<2x32xf32>
    %568 = math.exp %567 : vector<2x32xf32>
    %cst_247 = arith.constant 1.000000e+00 : f32
    %569 = vector.broadcast %cst_247 : f32 to vector<2x32xf32>
    %570 = arith.addf %569, %568 : vector<2x32xf32>
    %571 = arith.divf %569, %570 : vector<2x32xf32>
    %cst_248 = arith.constant dense<0.000000e+00> : vector<2x32xf32>
    %572 = tpu.matmul %492, %61, %cst_248 {dimension_numbers = #tpu.dot_dimension_numbers<[1], [0], [0], [1], [0, 0, 1, 1], [], []>} : vector<2x32xf32>, vector<32x32xf32>, vector<2x32xf32> -> vector<2x32xf32>
    %573 = vector.broadcast %69 : vector<1x32xf32> to vector<2x32xf32>
    %574 = arith.addf %572, %573 : vector<2x32xf32>
    %575 = arith.mulf %564, %574 : vector<2x32xf32>
    %576 = arith.addf %557, %575 : vector<2x32xf32>
    %577 = math.tanh %576 : vector<2x32xf32>
    %cst_249 = arith.constant 1.000000e+00 : f32
    %578 = vector.broadcast %cst_249 : f32 to vector<2x32xf32>
    %579 = arith.subf %578, %571 : vector<2x32xf32>
    %580 = arith.mulf %579, %577 : vector<2x32xf32>
    %581 = arith.mulf %571, %492 : vector<2x32xf32>
    %582 = arith.addf %580, %581 : vector<2x32xf32>
    %583 = vector.broadcast %c5_i32 : i32 to vector<2x1xi32>
    %584 = arith.cmpi slt, %583, %0 : vector<2x1xi32>
    %585 = vector.shape_cast %584 : vector<2x1xi1> to vector<2x1xi1>
    %586 = vector.broadcast %585 : vector<2x1xi1> to vector<2x32xi1>
    %587 = arith.select %586, %582, %492 : vector<2x32xi1>, vector<2x32xf32>
    %cst_250 = arith.constant 0.000000e+00 : f32
    %588 = vector.shape_cast %584 : vector<2x1xi1> to vector<2x1xi1>
    %589 = vector.broadcast %588 : vector<2x1xi1> to vector<2x32xi1>
    %590 = vector.broadcast %cst_250 : f32 to vector<2x32xf32>
    %591 = arith.select %589, %582, %590 : vector<2x32xi1>, vector<2x32xf32>
    %592 = arith.index_cast %c5_i32 : i32 to index
    %c0_251 = arith.constant 0 : index
    %c0_252 = arith.constant 0 : index
    %593 = vector.load %arg18[%592, %c0_251, %c0_252] : memref<8x2x32xf32, #tpu.memory_space<vmem>>, vector<1x2x32xf32>
    %594 = vector.shape_cast %593 : vector<1x2x32xf32> to vector<2x32xf32>
    %595 = vector.shape_cast %591 : vector<2x32xf32> to vector<1x2x32xf32>
    tpu.vector_store %arg18[%592, %c0_251, %c0_252], %595 {strides = array<i32>} : memref<8x2x32xf32, #tpu.memory_space<vmem>>, vector<1x2x32xf32>,
    %596 = arith.index_cast %548 : i32 to index
    %c0_253 = arith.constant 0 : index
    %c0_254 = arith.constant 0 : index
    %597 = vector.load %arg15[%596, %c0_253, %c0_254] : memref<8x2x32xf32, #tpu.memory_space<vmem>>, vector<1x2x32xf32>
    %598 = vector.shape_cast %597 : vector<1x2x32xf32> to vector<2x32xf32>
    %599 = arith.index_cast %548 : i32 to index
    %c0_255 = arith.constant 0 : index
    %c0_256 = arith.constant 0 : index
    %600 = vector.load %arg16[%599, %c0_255, %c0_256] : memref<8x2x32xf32, #tpu.memory_space<vmem>>, vector<1x2x32xf32>
    %601 = vector.shape_cast %600 : vector<1x2x32xf32> to vector<2x32xf32>
    %602 = arith.index_cast %548 : i32 to index
    %c0_257 = arith.constant 0 : index
    %c0_258 = arith.constant 0 : index
    %603 = vector.load %arg17[%602, %c0_257, %c0_258] : memref<8x2x32xf32, #tpu.memory_space<vmem>>, vector<1x2x32xf32>
    %604 = vector.shape_cast %603 : vector<1x2x32xf32> to vector<2x32xf32>
    %cst_259 = arith.constant dense<0.000000e+00> : vector<2x32xf32>
    %605 = tpu.matmul %539, %63, %cst_259 {dimension_numbers = #tpu.dot_dimension_numbers<[1], [0], [0], [1], [0, 0, 1, 1], [], []>} : vector<2x32xf32>, vector<32x32xf32>, vector<2x32xf32> -> vector<2x32xf32>
    %606 = arith.addf %598, %605 : vector<2x32xf32>
    %607 = arith.negf %606 : vector<2x32xf32>
    %608 = math.exp %607 : vector<2x32xf32>
    %cst_260 = arith.constant 1.000000e+00 : f32
    %609 = vector.broadcast %cst_260 : f32 to vector<2x32xf32>
    %610 = arith.addf %609, %608 : vector<2x32xf32>
    %611 = arith.divf %609, %610 : vector<2x32xf32>
    %cst_261 = arith.constant dense<0.000000e+00> : vector<2x32xf32>
    %612 = tpu.matmul %539, %65, %cst_261 {dimension_numbers = #tpu.dot_dimension_numbers<[1], [0], [0], [1], [0, 0, 1, 1], [], []>} : vector<2x32xf32>, vector<32x32xf32>, vector<2x32xf32> -> vector<2x32xf32>
    %613 = arith.addf %601, %612 : vector<2x32xf32>
    %614 = arith.negf %613 : vector<2x32xf32>
    %615 = math.exp %614 : vector<2x32xf32>
    %cst_262 = arith.constant 1.000000e+00 : f32
    %616 = vector.broadcast %cst_262 : f32 to vector<2x32xf32>
    %617 = arith.addf %616, %615 : vector<2x32xf32>
    %618 = arith.divf %616, %617 : vector<2x32xf32>
    %cst_263 = arith.constant dense<0.000000e+00> : vector<2x32xf32>
    %619 = tpu.matmul %539, %67, %cst_263 {dimension_numbers = #tpu.dot_dimension_numbers<[1], [0], [0], [1], [0, 0, 1, 1], [], []>} : vector<2x32xf32>, vector<32x32xf32>, vector<2x32xf32> -> vector<2x32xf32>
    %620 = vector.broadcast %71 : vector<1x32xf32> to vector<2x32xf32>
    %621 = arith.addf %619, %620 : vector<2x32xf32>
    %622 = arith.mulf %611, %621 : vector<2x32xf32>
    %623 = arith.addf %604, %622 : vector<2x32xf32>
    %624 = math.tanh %623 : vector<2x32xf32>
    %cst_264 = arith.constant 1.000000e+00 : f32
    %625 = vector.broadcast %cst_264 : f32 to vector<2x32xf32>
    %626 = arith.subf %625, %618 : vector<2x32xf32>
    %627 = arith.mulf %626, %624 : vector<2x32xf32>
    %628 = arith.mulf %618, %539 : vector<2x32xf32>
    %629 = arith.addf %627, %628 : vector<2x32xf32>
    %630 = vector.broadcast %548 : i32 to vector<2x1xi32>
    %631 = arith.cmpi slt, %630, %0 : vector<2x1xi32>
    %632 = vector.shape_cast %631 : vector<2x1xi1> to vector<2x1xi1>
    %633 = vector.broadcast %632 : vector<2x1xi1> to vector<2x32xi1>
    %634 = arith.select %633, %629, %539 : vector<2x32xi1>, vector<2x32xf32>
    %cst_265 = arith.constant 0.000000e+00 : f32
    %635 = vector.shape_cast %631 : vector<2x1xi1> to vector<2x1xi1>
    %636 = vector.broadcast %635 : vector<2x1xi1> to vector<2x32xi1>
    %637 = vector.broadcast %cst_265 : f32 to vector<2x32xf32>
    %638 = arith.select %636, %629, %637 : vector<2x32xi1>, vector<2x32xf32>
    %639 = arith.index_cast %548 : i32 to index
    %c0_266 = arith.constant 0 : index
    %c0_267 = arith.constant 0 : index
    %640 = vector.load %arg19[%639, %c0_266, %c0_267] : memref<8x2x32xf32, #tpu.memory_space<vmem>>, vector<1x2x32xf32>
    %641 = vector.shape_cast %640 : vector<1x2x32xf32> to vector<2x32xf32>
    %642 = vector.shape_cast %638 : vector<2x32xf32> to vector<1x2x32xf32>
    tpu.vector_store %arg19[%639, %c0_266, %c0_267], %642 {strides = array<i32>} : memref<8x2x32xf32, #tpu.memory_space<vmem>>, vector<1x2x32xf32>,
    %c6_i32 = arith.constant 6 : i32
    %c7_i32_268 = arith.constant 7 : i32
    %643 = arith.subi %c7_i32_268, %c6_i32 : i32
    %644 = arith.index_cast %c6_i32 : i32 to index
    %c0_269 = arith.constant 0 : index
    %c0_270 = arith.constant 0 : index
    %645 = vector.load %arg12[%644, %c0_269, %c0_270] : memref<8x2x32xf32, #tpu.memory_space<vmem>>, vector<1x2x32xf32>
    %646 = vector.shape_cast %645 : vector<1x2x32xf32> to vector<2x32xf32>
    %647 = arith.index_cast %c6_i32 : i32 to index
    %c0_271 = arith.constant 0 : index
    %c0_272 = arith.constant 0 : index
    %648 = vector.load %arg13[%647, %c0_271, %c0_272] : memref<8x2x32xf32, #tpu.memory_space<vmem>>, vector<1x2x32xf32>
    %649 = vector.shape_cast %648 : vector<1x2x32xf32> to vector<2x32xf32>
    %650 = arith.index_cast %c6_i32 : i32 to index
    %c0_273 = arith.constant 0 : index
    %c0_274 = arith.constant 0 : index
    %651 = vector.load %arg14[%650, %c0_273, %c0_274] : memref<8x2x32xf32, #tpu.memory_space<vmem>>, vector<1x2x32xf32>
    %652 = vector.shape_cast %651 : vector<1x2x32xf32> to vector<2x32xf32>
    %cst_275 = arith.constant dense<0.000000e+00> : vector<2x32xf32>
    %653 = tpu.matmul %587, %57, %cst_275 {dimension_numbers = #tpu.dot_dimension_numbers<[1], [0], [0], [1], [0, 0, 1, 1], [], []>} : vector<2x32xf32>, vector<32x32xf32>, vector<2x32xf32> -> vector<2x32xf32>
    %654 = arith.addf %646, %653 : vector<2x32xf32>
    %655 = arith.negf %654 : vector<2x32xf32>
    %656 = math.exp %655 : vector<2x32xf32>
    %cst_276 = arith.constant 1.000000e+00 : f32
    %657 = vector.broadcast %cst_276 : f32 to vector<2x32xf32>
    %658 = arith.addf %657, %656 : vector<2x32xf32>
    %659 = arith.divf %657, %658 : vector<2x32xf32>
    %cst_277 = arith.constant dense<0.000000e+00> : vector<2x32xf32>
    %660 = tpu.matmul %587, %59, %cst_277 {dimension_numbers = #tpu.dot_dimension_numbers<[1], [0], [0], [1], [0, 0, 1, 1], [], []>} : vector<2x32xf32>, vector<32x32xf32>, vector<2x32xf32> -> vector<2x32xf32>
    %661 = arith.addf %649, %660 : vector<2x32xf32>
    %662 = arith.negf %661 : vector<2x32xf32>
    %663 = math.exp %662 : vector<2x32xf32>
    %cst_278 = arith.constant 1.000000e+00 : f32
    %664 = vector.broadcast %cst_278 : f32 to vector<2x32xf32>
    %665 = arith.addf %664, %663 : vector<2x32xf32>
    %666 = arith.divf %664, %665 : vector<2x32xf32>
    %cst_279 = arith.constant dense<0.000000e+00> : vector<2x32xf32>
    %667 = tpu.matmul %587, %61, %cst_279 {dimension_numbers = #tpu.dot_dimension_numbers<[1], [0], [0], [1], [0, 0, 1, 1], [], []>} : vector<2x32xf32>, vector<32x32xf32>, vector<2x32xf32> -> vector<2x32xf32>
    %668 = vector.broadcast %69 : vector<1x32xf32> to vector<2x32xf32>
    %669 = arith.addf %667, %668 : vector<2x32xf32>
    %670 = arith.mulf %659, %669 : vector<2x32xf32>
    %671 = arith.addf %652, %670 : vector<2x32xf32>
    %672 = math.tanh %671 : vector<2x32xf32>
    %cst_280 = arith.constant 1.000000e+00 : f32
    %673 = vector.broadcast %cst_280 : f32 to vector<2x32xf32>
    %674 = arith.subf %673, %666 : vector<2x32xf32>
    %675 = arith.mulf %674, %672 : vector<2x32xf32>
    %676 = arith.mulf %666, %587 : vector<2x32xf32>
    %677 = arith.addf %675, %676 : vector<2x32xf32>
    %678 = vector.broadcast %c6_i32 : i32 to vector<2x1xi32>
    %679 = arith.cmpi slt, %678, %0 : vector<2x1xi32>
    %680 = vector.shape_cast %679 : vector<2x1xi1> to vector<2x1xi1>
    %681 = vector.broadcast %680 : vector<2x1xi1> to vector<2x32xi1>
    %682 = arith.select %681, %677, %587 : vector<2x32xi1>, vector<2x32xf32>
    %cst_281 = arith.constant 0.000000e+00 : f32
    %683 = vector.shape_cast %679 : vector<2x1xi1> to vector<2x1xi1>
    %684 = vector.broadcast %683 : vector<2x1xi1> to vector<2x32xi1>
    %685 = vector.broadcast %cst_281 : f32 to vector<2x32xf32>
    %686 = arith.select %684, %677, %685 : vector<2x32xi1>, vector<2x32xf32>
    %687 = arith.index_cast %c6_i32 : i32 to index
    %c0_282 = arith.constant 0 : index
    %c0_283 = arith.constant 0 : index
    %688 = vector.load %arg18[%687, %c0_282, %c0_283] : memref<8x2x32xf32, #tpu.memory_space<vmem>>, vector<1x2x32xf32>
    %689 = vector.shape_cast %688 : vector<1x2x32xf32> to vector<2x32xf32>
    %690 = vector.shape_cast %686 : vector<2x32xf32> to vector<1x2x32xf32>
    tpu.vector_store %arg18[%687, %c0_282, %c0_283], %690 {strides = array<i32>} : memref<8x2x32xf32, #tpu.memory_space<vmem>>, vector<1x2x32xf32>,
    %691 = arith.index_cast %643 : i32 to index
    %c0_284 = arith.constant 0 : index
    %c0_285 = arith.constant 0 : index
    %692 = vector.load %arg15[%691, %c0_284, %c0_285] : memref<8x2x32xf32, #tpu.memory_space<vmem>>, vector<1x2x32xf32>
    %693 = vector.shape_cast %692 : vector<1x2x32xf32> to vector<2x32xf32>
    %694 = arith.index_cast %643 : i32 to index
    %c0_286 = arith.constant 0 : index
    %c0_287 = arith.constant 0 : index
    %695 = vector.load %arg16[%694, %c0_286, %c0_287] : memref<8x2x32xf32, #tpu.memory_space<vmem>>, vector<1x2x32xf32>
    %696 = vector.shape_cast %695 : vector<1x2x32xf32> to vector<2x32xf32>
    %697 = arith.index_cast %643 : i32 to index
    %c0_288 = arith.constant 0 : index
    %c0_289 = arith.constant 0 : index
    %698 = vector.load %arg17[%697, %c0_288, %c0_289] : memref<8x2x32xf32, #tpu.memory_space<vmem>>, vector<1x2x32xf32>
    %699 = vector.shape_cast %698 : vector<1x2x32xf32> to vector<2x32xf32>
    %cst_290 = arith.constant dense<0.000000e+00> : vector<2x32xf32>
    %700 = tpu.matmul %634, %63, %cst_290 {dimension_numbers = #tpu.dot_dimension_numbers<[1], [0], [0], [1], [0, 0, 1, 1], [], []>} : vector<2x32xf32>, vector<32x32xf32>, vector<2x32xf32> -> vector<2x32xf32>
    %701 = arith.addf %693, %700 : vector<2x32xf32>
    %702 = arith.negf %701 : vector<2x32xf32>
    %703 = math.exp %702 : vector<2x32xf32>
    %cst_291 = arith.constant 1.000000e+00 : f32
    %704 = vector.broadcast %cst_291 : f32 to vector<2x32xf32>
    %705 = arith.addf %704, %703 : vector<2x32xf32>
    %706 = arith.divf %704, %705 : vector<2x32xf32>
    %cst_292 = arith.constant dense<0.000000e+00> : vector<2x32xf32>
    %707 = tpu.matmul %634, %65, %cst_292 {dimension_numbers = #tpu.dot_dimension_numbers<[1], [0], [0], [1], [0, 0, 1, 1], [], []>} : vector<2x32xf32>, vector<32x32xf32>, vector<2x32xf32> -> vector<2x32xf32>
    %708 = arith.addf %696, %707 : vector<2x32xf32>
    %709 = arith.negf %708 : vector<2x32xf32>
    %710 = math.exp %709 : vector<2x32xf32>
    %cst_293 = arith.constant 1.000000e+00 : f32
    %711 = vector.broadcast %cst_293 : f32 to vector<2x32xf32>
    %712 = arith.addf %711, %710 : vector<2x32xf32>
    %713 = arith.divf %711, %712 : vector<2x32xf32>
    %cst_294 = arith.constant dense<0.000000e+00> : vector<2x32xf32>
    %714 = tpu.matmul %634, %67, %cst_294 {dimension_numbers = #tpu.dot_dimension_numbers<[1], [0], [0], [1], [0, 0, 1, 1], [], []>} : vector<2x32xf32>, vector<32x32xf32>, vector<2x32xf32> -> vector<2x32xf32>
    %715 = vector.broadcast %71 : vector<1x32xf32> to vector<2x32xf32>
    %716 = arith.addf %714, %715 : vector<2x32xf32>
    %717 = arith.mulf %706, %716 : vector<2x32xf32>
    %718 = arith.addf %699, %717 : vector<2x32xf32>
    %719 = math.tanh %718 : vector<2x32xf32>
    %cst_295 = arith.constant 1.000000e+00 : f32
    %720 = vector.broadcast %cst_295 : f32 to vector<2x32xf32>
    %721 = arith.subf %720, %713 : vector<2x32xf32>
    %722 = arith.mulf %721, %719 : vector<2x32xf32>
    %723 = arith.mulf %713, %634 : vector<2x32xf32>
    %724 = arith.addf %722, %723 : vector<2x32xf32>
    %725 = vector.broadcast %643 : i32 to vector<2x1xi32>
    %726 = arith.cmpi slt, %725, %0 : vector<2x1xi32>
    %727 = vector.shape_cast %726 : vector<2x1xi1> to vector<2x1xi1>
    %728 = vector.broadcast %727 : vector<2x1xi1> to vector<2x32xi1>
    %729 = arith.select %728, %724, %634 : vector<2x32xi1>, vector<2x32xf32>
    %cst_296 = arith.constant 0.000000e+00 : f32
    %730 = vector.shape_cast %726 : vector<2x1xi1> to vector<2x1xi1>
    %731 = vector.broadcast %730 : vector<2x1xi1> to vector<2x32xi1>
    %732 = vector.broadcast %cst_296 : f32 to vector<2x32xf32>
    %733 = arith.select %731, %724, %732 : vector<2x32xi1>, vector<2x32xf32>
    %734 = arith.index_cast %643 : i32 to index
    %c0_297 = arith.constant 0 : index
    %c0_298 = arith.constant 0 : index
    %735 = vector.load %arg19[%734, %c0_297, %c0_298] : memref<8x2x32xf32, #tpu.memory_space<vmem>>, vector<1x2x32xf32>
    %736 = vector.shape_cast %735 : vector<1x2x32xf32> to vector<2x32xf32>
    %737 = vector.shape_cast %733 : vector<2x32xf32> to vector<1x2x32xf32>
    tpu.vector_store %arg19[%734, %c0_297, %c0_298], %737 {strides = array<i32>} : memref<8x2x32xf32, #tpu.memory_space<vmem>>, vector<1x2x32xf32>,
    %c7_i32_299 = arith.constant 7 : i32
    %c7_i32_300 = arith.constant 7 : i32
    %738 = arith.subi %c7_i32_300, %c7_i32_299 : i32
    %739 = arith.index_cast %c7_i32_299 : i32 to index
    %c0_301 = arith.constant 0 : index
    %c0_302 = arith.constant 0 : index
    %740 = vector.load %arg12[%739, %c0_301, %c0_302] : memref<8x2x32xf32, #tpu.memory_space<vmem>>, vector<1x2x32xf32>
    %741 = vector.shape_cast %740 : vector<1x2x32xf32> to vector<2x32xf32>
    %742 = arith.index_cast %c7_i32_299 : i32 to index
    %c0_303 = arith.constant 0 : index
    %c0_304 = arith.constant 0 : index
    %743 = vector.load %arg13[%742, %c0_303, %c0_304] : memref<8x2x32xf32, #tpu.memory_space<vmem>>, vector<1x2x32xf32>
    %744 = vector.shape_cast %743 : vector<1x2x32xf32> to vector<2x32xf32>
    %745 = arith.index_cast %c7_i32_299 : i32 to index
    %c0_305 = arith.constant 0 : index
    %c0_306 = arith.constant 0 : index
    %746 = vector.load %arg14[%745, %c0_305, %c0_306] : memref<8x2x32xf32, #tpu.memory_space<vmem>>, vector<1x2x32xf32>
    %747 = vector.shape_cast %746 : vector<1x2x32xf32> to vector<2x32xf32>
    %cst_307 = arith.constant dense<0.000000e+00> : vector<2x32xf32>
    %748 = tpu.matmul %682, %57, %cst_307 {dimension_numbers = #tpu.dot_dimension_numbers<[1], [0], [0], [1], [0, 0, 1, 1], [], []>} : vector<2x32xf32>, vector<32x32xf32>, vector<2x32xf32> -> vector<2x32xf32>
    %749 = arith.addf %741, %748 : vector<2x32xf32>
    %750 = arith.negf %749 : vector<2x32xf32>
    %751 = math.exp %750 : vector<2x32xf32>
    %cst_308 = arith.constant 1.000000e+00 : f32
    %752 = vector.broadcast %cst_308 : f32 to vector<2x32xf32>
    %753 = arith.addf %752, %751 : vector<2x32xf32>
    %754 = arith.divf %752, %753 : vector<2x32xf32>
    %cst_309 = arith.constant dense<0.000000e+00> : vector<2x32xf32>
    %755 = tpu.matmul %682, %59, %cst_309 {dimension_numbers = #tpu.dot_dimension_numbers<[1], [0], [0], [1], [0, 0, 1, 1], [], []>} : vector<2x32xf32>, vector<32x32xf32>, vector<2x32xf32> -> vector<2x32xf32>
    %756 = arith.addf %744, %755 : vector<2x32xf32>
    %757 = arith.negf %756 : vector<2x32xf32>
    %758 = math.exp %757 : vector<2x32xf32>
    %cst_310 = arith.constant 1.000000e+00 : f32
    %759 = vector.broadcast %cst_310 : f32 to vector<2x32xf32>
    %760 = arith.addf %759, %758 : vector<2x32xf32>
    %761 = arith.divf %759, %760 : vector<2x32xf32>
    %cst_311 = arith.constant dense<0.000000e+00> : vector<2x32xf32>
    %762 = tpu.matmul %682, %61, %cst_311 {dimension_numbers = #tpu.dot_dimension_numbers<[1], [0], [0], [1], [0, 0, 1, 1], [], []>} : vector<2x32xf32>, vector<32x32xf32>, vector<2x32xf32> -> vector<2x32xf32>
    %763 = vector.broadcast %69 : vector<1x32xf32> to vector<2x32xf32>
    %764 = arith.addf %762, %763 : vector<2x32xf32>
    %765 = arith.mulf %754, %764 : vector<2x32xf32>
    %766 = arith.addf %747, %765 : vector<2x32xf32>
    %767 = math.tanh %766 : vector<2x32xf32>
    %cst_312 = arith.constant 1.000000e+00 : f32
    %768 = vector.broadcast %cst_312 : f32 to vector<2x32xf32>
    %769 = arith.subf %768, %761 : vector<2x32xf32>
    %770 = arith.mulf %769, %767 : vector<2x32xf32>
    %771 = arith.mulf %761, %682 : vector<2x32xf32>
    %772 = arith.addf %770, %771 : vector<2x32xf32>
    %773 = vector.broadcast %c7_i32_299 : i32 to vector<2x1xi32>
    %774 = arith.cmpi slt, %773, %0 : vector<2x1xi32>
    %775 = vector.shape_cast %774 : vector<2x1xi1> to vector<2x1xi1>
    %776 = vector.broadcast %775 : vector<2x1xi1> to vector<2x32xi1>
    %777 = arith.select %776, %772, %682 : vector<2x32xi1>, vector<2x32xf32>
    %cst_313 = arith.constant 0.000000e+00 : f32
    %778 = vector.shape_cast %774 : vector<2x1xi1> to vector<2x1xi1>
    %779 = vector.broadcast %778 : vector<2x1xi1> to vector<2x32xi1>
    %780 = vector.broadcast %cst_313 : f32 to vector<2x32xf32>
    %781 = arith.select %779, %772, %780 : vector<2x32xi1>, vector<2x32xf32>
    %782 = arith.index_cast %c7_i32_299 : i32 to index
    %c0_314 = arith.constant 0 : index
    %c0_315 = arith.constant 0 : index
    %783 = vector.load %arg18[%782, %c0_314, %c0_315] : memref<8x2x32xf32, #tpu.memory_space<vmem>>, vector<1x2x32xf32>
    %784 = vector.shape_cast %783 : vector<1x2x32xf32> to vector<2x32xf32>
    %785 = vector.shape_cast %781 : vector<2x32xf32> to vector<1x2x32xf32>
    tpu.vector_store %arg18[%782, %c0_314, %c0_315], %785 {strides = array<i32>} : memref<8x2x32xf32, #tpu.memory_space<vmem>>, vector<1x2x32xf32>,
    %786 = arith.index_cast %738 : i32 to index
    %c0_316 = arith.constant 0 : index
    %c0_317 = arith.constant 0 : index
    %787 = vector.load %arg15[%786, %c0_316, %c0_317] : memref<8x2x32xf32, #tpu.memory_space<vmem>>, vector<1x2x32xf32>
    %788 = vector.shape_cast %787 : vector<1x2x32xf32> to vector<2x32xf32>
    %789 = arith.index_cast %738 : i32 to index
    %c0_318 = arith.constant 0 : index
    %c0_319 = arith.constant 0 : index
    %790 = vector.load %arg16[%789, %c0_318, %c0_319] : memref<8x2x32xf32, #tpu.memory_space<vmem>>, vector<1x2x32xf32>
    %791 = vector.shape_cast %790 : vector<1x2x32xf32> to vector<2x32xf32>
    %792 = arith.index_cast %738 : i32 to index
    %c0_320 = arith.constant 0 : index
    %c0_321 = arith.constant 0 : index
    %793 = vector.load %arg17[%792, %c0_320, %c0_321] : memref<8x2x32xf32, #tpu.memory_space<vmem>>, vector<1x2x32xf32>
    %794 = vector.shape_cast %793 : vector<1x2x32xf32> to vector<2x32xf32>
    %cst_322 = arith.constant dense<0.000000e+00> : vector<2x32xf32>
    %795 = tpu.matmul %729, %63, %cst_322 {dimension_numbers = #tpu.dot_dimension_numbers<[1], [0], [0], [1], [0, 0, 1, 1], [], []>} : vector<2x32xf32>, vector<32x32xf32>, vector<2x32xf32> -> vector<2x32xf32>
    %796 = arith.addf %788, %795 : vector<2x32xf32>
    %797 = arith.negf %796 : vector<2x32xf32>
    %798 = math.exp %797 : vector<2x32xf32>
    %cst_323 = arith.constant 1.000000e+00 : f32
    %799 = vector.broadcast %cst_323 : f32 to vector<2x32xf32>
    %800 = arith.addf %799, %798 : vector<2x32xf32>
    %801 = arith.divf %799, %800 : vector<2x32xf32>
    %cst_324 = arith.constant dense<0.000000e+00> : vector<2x32xf32>
    %802 = tpu.matmul %729, %65, %cst_324 {dimension_numbers = #tpu.dot_dimension_numbers<[1], [0], [0], [1], [0, 0, 1, 1], [], []>} : vector<2x32xf32>, vector<32x32xf32>, vector<2x32xf32> -> vector<2x32xf32>
    %803 = arith.addf %791, %802 : vector<2x32xf32>
    %804 = arith.negf %803 : vector<2x32xf32>
    %805 = math.exp %804 : vector<2x32xf32>
    %cst_325 = arith.constant 1.000000e+00 : f32
    %806 = vector.broadcast %cst_325 : f32 to vector<2x32xf32>
    %807 = arith.addf %806, %805 : vector<2x32xf32>
    %808 = arith.divf %806, %807 : vector<2x32xf32>
    %cst_326 = arith.constant dense<0.000000e+00> : vector<2x32xf32>
    %809 = tpu.matmul %729, %67, %cst_326 {dimension_numbers = #tpu.dot_dimension_numbers<[1], [0], [0], [1], [0, 0, 1, 1], [], []>} : vector<2x32xf32>, vector<32x32xf32>, vector<2x32xf32> -> vector<2x32xf32>
    %810 = vector.broadcast %71 : vector<1x32xf32> to vector<2x32xf32>
    %811 = arith.addf %809, %810 : vector<2x32xf32>
    %812 = arith.mulf %801, %811 : vector<2x32xf32>
    %813 = arith.addf %794, %812 : vector<2x32xf32>
    %814 = math.tanh %813 : vector<2x32xf32>
    %cst_327 = arith.constant 1.000000e+00 : f32
    %815 = vector.broadcast %cst_327 : f32 to vector<2x32xf32>
    %816 = arith.subf %815, %808 : vector<2x32xf32>
    %817 = arith.mulf %816, %814 : vector<2x32xf32>
    %818 = arith.mulf %808, %729 : vector<2x32xf32>
    %819 = arith.addf %817, %818 : vector<2x32xf32>
    %820 = vector.broadcast %738 : i32 to vector<2x1xi32>
    %821 = arith.cmpi slt, %820, %0 : vector<2x1xi32>
    %822 = vector.shape_cast %821 : vector<2x1xi1> to vector<2x1xi1>
    %823 = vector.broadcast %822 : vector<2x1xi1> to vector<2x32xi1>
    %824 = arith.select %823, %819, %729 : vector<2x32xi1>, vector<2x32xf32>
    %cst_328 = arith.constant 0.000000e+00 : f32
    %825 = vector.shape_cast %821 : vector<2x1xi1> to vector<2x1xi1>
    %826 = vector.broadcast %825 : vector<2x1xi1> to vector<2x32xi1>
    %827 = vector.broadcast %cst_328 : f32 to vector<2x32xf32>
    %828 = arith.select %826, %819, %827 : vector<2x32xi1>, vector<2x32xf32>
    %829 = arith.index_cast %738 : i32 to index
    %c0_329 = arith.constant 0 : index
    %c0_330 = arith.constant 0 : index
    %830 = vector.load %arg19[%829, %c0_329, %c0_330] : memref<8x2x32xf32, #tpu.memory_space<vmem>>, vector<1x2x32xf32>
    %831 = vector.shape_cast %830 : vector<1x2x32xf32> to vector<2x32xf32>
    %832 = vector.shape_cast %828 : vector<2x32xf32> to vector<1x2x32xf32>
    tpu.vector_store %arg19[%829, %c0_329, %c0_330], %832 {strides = array<i32>} : memref<8x2x32xf32, #tpu.memory_space<vmem>>, vector<1x2x32xf32>,
    %c8_i32 = arith.constant 8 : i32
    %c0_331 = arith.constant 0 : index
    %c0_332 = arith.constant 0 : index
    %c0_333 = arith.constant 0 : index
    %833 = vector.load %arg18[%c0_331, %c0_332, %c0_333] : memref<8x2x32xf32, #tpu.memory_space<vmem>>, vector<8x2x32xf32>
    %c0_334 = arith.constant 0 : index
    %c0_335 = arith.constant 0 : index
    %c0_336 = arith.constant 0 : index
    %834 = vector.load %arg19[%c0_334, %c0_335, %c0_336] : memref<8x2x32xf32, #tpu.memory_space<vmem>>, vector<8x2x32xf32>
    %c0_337 = arith.constant 0 : index
    %c0_338 = arith.constant 0 : index
    %c0_339 = arith.constant 0 : index
    %835 = vector.load %arg6[%c0_337, %c0_338, %c0_339] : memref<2x32x32xf32, #tpu.memory_space<vmem>>, vector<1x32x32xf32>
    %836 = vector.shape_cast %835 : vector<1x32x32xf32> to vector<32x32xf32>
    "tpu.trace_start"() <{level = 10 : i32, message = "tbh,ha->tba"}> : () -> ()
    %cst_340 = arith.constant dense<0.000000e+00> : vector<8x2x32xf32>
    %837 = tpu.matmul %833, %836, %cst_340 {dimension_numbers = #tpu.dot_dimension_numbers<[2], [0], [0, 1], [1], [0, 0, 0, 1, 1, 1], [], []>} : vector<8x2x32xf32>, vector<32x32xf32>, vector<8x2x32xf32> -> vector<8x2x32xf32>
    "tpu.trace_stop"() : () -> ()
    %c1_341 = arith.constant 1 : index
    %c0_342 = arith.constant 0 : index
    %c0_343 = arith.constant 0 : index
    %838 = vector.load %arg6[%c1_341, %c0_342, %c0_343] : memref<2x32x32xf32, #tpu.memory_space<vmem>>, vector<1x32x32xf32>
    %839 = vector.shape_cast %838 : vector<1x32x32xf32> to vector<32x32xf32>
    "tpu.trace_start"() <{level = 10 : i32, message = "tbh,ha->tba"}> : () -> ()
    %cst_344 = arith.constant dense<0.000000e+00> : vector<8x2x32xf32>
    %840 = tpu.matmul %834, %839, %cst_344 {dimension_numbers = #tpu.dot_dimension_numbers<[2], [0], [0, 1], [1], [0, 0, 0, 1, 1, 1], [], []>} : vector<8x2x32xf32>, vector<32x32xf32>, vector<8x2x32xf32> -> vector<8x2x32xf32>
    "tpu.trace_stop"() : () -> ()
    %841 = arith.addf %837, %840 : vector<8x2x32xf32>
    %c0_345 = arith.constant 0 : index
    %c0_346 = arith.constant 0 : index
    %842 = vector.load %arg7[%c0_345, %c0_346] : memref<1x32xf32, #tpu.memory_space<vmem>>, vector<1x32xf32>
    %843 = vector.shape_cast %842 : vector<1x32xf32> to vector<1x1x32xf32>
    %844 = vector.broadcast %843 : vector<1x1x32xf32> to vector<8x2x32xf32>
    %845 = arith.addf %841, %844 : vector<8x2x32xf32>
    %846 = math.tanh %845 : vector<8x2x32xf32>
    %c0_347 = arith.constant 0 : index
    %c0_348 = arith.constant 0 : index
    %847 = vector.load %arg8[%c0_347, %c0_348] : memref<1x32xf32, #tpu.memory_space<vmem>>, vector<1x32xf32>
    %848 = vector.shape_cast %847 : vector<1x32xf32> to vector<1x1x32xf32>
    %849 = vector.broadcast %848 : vector<1x1x32xf32> to vector<8x2x32xf32>
    %850 = arith.mulf %846, %849 : vector<8x2x32xf32>
    %cst_349 = arith.constant dense<0.000000e+00> : vector<8x2xf32>
    %851 = vector.multi_reduction <add>, %850, %cst_349 [2] : vector<8x2x32xf32> to vector<8x2xf32>
    %852 = vector.shape_cast %851 : vector<8x2xf32> to vector<8x2x1xf32>
    %cst_350 = arith.constant dense<0xFF800000> : vector<2x1xf32>
    %853 = vector.multi_reduction <maximumf>, %852, %cst_350 [0] : vector<8x2x1xf32> to vector<2x1xf32>
    %854 = vector.shape_cast %853 : vector<2x1xf32> to vector<1x2x1xf32>
    %855 = vector.broadcast %854 : vector<1x2x1xf32> to vector<8x2x1xf32>
    %856 = arith.subf %852, %855 : vector<8x2x1xf32>
    %857 = math.exp %856 : vector<8x2x1xf32>
    %cst_351 = arith.constant dense<0.000000e+00> : vector<2x1xf32>
    %858 = vector.multi_reduction <add>, %857, %cst_351 [0] : vector<8x2x1xf32> to vector<2x1xf32>
    %859 = vector.shape_cast %858 : vector<2x1xf32> to vector<1x2x1xf32>
    %860 = tpu.reciprocal %859 {approx = true} : vector<1x2x1xf32> -> vector<1x2x1xf32>
    %861 = vector.broadcast %860 : vector<1x2x1xf32> to vector<8x2x1xf32>
    %862 = arith.mulf %857, %861 : vector<8x2x1xf32>
    %863 = vector.broadcast %862 : vector<8x2x1xf32> to vector<8x2x32xf32>
    %864 = arith.mulf %833, %863 : vector<8x2x32xf32>
    %cst_352 = arith.constant dense<0.000000e+00> : vector<2x32xf32>
    %865 = vector.multi_reduction <add>, %864, %cst_352 [0] : vector<8x2x32xf32> to vector<2x32xf32>
    %866 = vector.broadcast %862 : vector<8x2x1xf32> to vector<8x2x32xf32>
    %867 = arith.mulf %834, %866 : vector<8x2x32xf32>
    %cst_353 = arith.constant dense<0.000000e+00> : vector<2x32xf32>
    %868 = vector.multi_reduction <add>, %867, %cst_353 [0] : vector<8x2x32xf32> to vector<2x32xf32>
    %c0_354 = arith.constant 0 : index
    %c0_355 = arith.constant 0 : index
    %c0_356 = arith.constant 0 : index
    %869 = vector.load %arg9[%c0_354, %c0_355, %c0_356] : memref<2x32x1xf32, #tpu.memory_space<vmem>>, vector<1x32x1xf32>
    %870 = vector.shape_cast %869 : vector<1x32x1xf32> to vector<32x1xf32>
    %cst_357 = arith.constant dense<0.000000e+00> : vector<2x1xf32>
    %871 = tpu.matmul %865, %870, %cst_357 {dimension_numbers = #tpu.dot_dimension_numbers<[1], [0], [0], [1], [0, 0, 1, 1], [], []>} : vector<2x32xf32>, vector<32x1xf32>, vector<2x1xf32> -> vector<2x1xf32>
    %c1_358 = arith.constant 1 : index
    %c0_359 = arith.constant 0 : index
    %c0_360 = arith.constant 0 : index
    %872 = vector.load %arg9[%c1_358, %c0_359, %c0_360] : memref<2x32x1xf32, #tpu.memory_space<vmem>>, vector<1x32x1xf32>
    %873 = vector.shape_cast %872 : vector<1x32x1xf32> to vector<32x1xf32>
    %cst_361 = arith.constant dense<0.000000e+00> : vector<2x1xf32>
    %874 = tpu.matmul %868, %873, %cst_361 {dimension_numbers = #tpu.dot_dimension_numbers<[1], [0], [0], [1], [0, 0, 1, 1], [], []>} : vector<2x32xf32>, vector<32x1xf32>, vector<2x1xf32> -> vector<2x1xf32>
    %875 = arith.addf %871, %874 : vector<2x1xf32>
    %c0_362 = arith.constant 0 : index
    %c0_363 = arith.constant 0 : index
    %876 = vector.load %arg10[%c0_362, %c0_363] : memref<1x1xf32, #tpu.memory_space<vmem>>, vector<1x1xf32>
    %877 = vector.broadcast %876 : vector<1x1xf32> to vector<2x1xf32>
    %878 = arith.addf %875, %877 : vector<2x1xf32>
    %879 = arith.negf %878 : vector<2x1xf32>
    %880 = math.exp %879 : vector<2x1xf32>
    %cst_364 = arith.constant 1.000000e+00 : f32
    %881 = vector.broadcast %cst_364 : f32 to vector<2x1xf32>
    %882 = arith.addf %881, %880 : vector<2x1xf32>
    %883 = arith.divf %881, %882 : vector<2x1xf32>
    %c0_365 = arith.constant 0 : index
    %c0_366 = arith.constant 0 : index
    %884 = vector.load %arg11[%c0_365, %c0_366] : memref<2x1xf32, #tpu.memory_space<vmem>>, vector<2x1xf32>
    tpu.vector_store %arg11[%c0_365, %c0_366], %883 {strides = array<i32>} : memref<2x1xf32, #tpu.memory_space<vmem>>, vector<2x1xf32>,
    return
  }
}

</mosaic_0001>

<bundles_post_ra>
// kernel: gru_att_forward.1
= control target key start
LH: loop header
LB: loop body
LE: loop exit
PB: predicated region body
PF: predicated region fallthrough
CT: control target
= control target key end

     0   :  { %v72_v0 = vlaneseq  ;;  %v7295_v4 = vmov 1983009808   ;;  %v7296_v11 = vmov 0   ;;  %vm111_vm0 = vcmask 261120   ;;  %s8449_s2 = inlined_call_operand.vmem [shape: f32[6,32,32], index: 2, kind: input, shape index: {}]   ;;  %s8450_s0 = inlined_call_operand.vmem [shape: f32[8,2,32], index: 0, kind: input, shape index: {}]   ;;  %s8451_s1 = inlined_call_operand.vmem [shape: s32[2,1], index: 1, kind: input, shape index: {}]   ;;  %s8452_s3 = inlined_call_operand.vmem [shape: f32[6,32,32], index: 3, kind: input, shape index: {}]   ;;  %s8453_s4 = inlined_call_operand.vmem [shape: f32[6,1,32], index: 4, kind: input, shape index: {}]   ;;  %s8454_s5 = inlined_call_operand.vmem [shape: f32[2,1,32], index: 5, kind: input, shape index: {}]   ;;  %s8455_s6 = inlined_call_operand.vmem [shape: f32[2,32,32], index: 6, kind: input, shape index: {}]   ;;  %s8456_s7 = inlined_call_operand.vmem [shape: f32[1,32], index: 7, kind: input, shape index: {}]   ;;  %s8457_s8 = inlined_call_operand.vmem [shape: f32[1,32], index: 8, kind: input, shape index: {}]   ;;  %s8458_s9 = inlined_call_operand.vmem [shape: f32[2,32,1], index: 9, kind: input, shape index: {}]   ;;  %s8459_s10 = inlined_call_operand.<no memory space> [shape: f32[1,1], index: 10, kind: input, shape index: {}]   ;;  %s8460_s11 = inlined_call_operand.vmem [shape: f32[2,1], index: 11, kind: output, shape index: {}]  }
   0x1   :  { %v49_v1 = vld [vmem:[%s8449_s2] sm:$0xff]  ;;  %v50_v2 = vld [vmem:[%s8449_s2 + $0x8] sm:$0xff]  ;;  %v70_v5 = vunpack.c.l.s4 %v7295_v4  ;;  %v51_v8 = vld [vmem:[%s8449_s2 + $0x10] sm:$0xff]  ;;  %7093 = vset.pattern.permute.xlu0 %v7296_v11  ;;  %7094 = vset.pattern.permute.xlu1 %v7296_v11  ;;  %vm7298_vm3 = vmmov 0   ;;  %vm235_vm10 = vcmask 254976  }
   0x2   :  { %v5631_v3 = vld [vmem:[%s8449_s2 + $0x20] sm:$0xff]  ;;  %v6722_v6 = vpack.c.bf16 %v50_v2, %v49_v1  ;;  %v5632_v7 = vld [vmem:[%s8449_s2 + $0x28] sm:$0xff]  ;;  %v52_v9 = vld [vmem:[%s8449_s2 + $0x18] sm:$0xff]  ;;  %v73_v10 = vshrl.u32 %v72_v0, 7 }
   0x3   :  { %v6730_v12 = vpack.c.bf16 %v5632_v7, %v5631_v3  ;;  %v6726_v13 = vpack.c.bf16 %v52_v9, %v51_v8  ;;  %v5633_v14 = vld [vmem:[%s8449_s2 + $0x30] sm:$0xff]  ;;  %v5634_v15 = vld [vmem:[%s8449_s2 + $0x38] sm:$0xff]  ;;  %v41_v16 = vld [vmem:[%s8450_s0] sm:$0x3]  ;;  %v71_v17 = vunpack.c.0.s8 %v70_v5 }
   0x4   :  { %6723 = vmatprep.subr.bf16.mxu0 %v6722_v6  ;;  %v6734_v18 = vpack.c.bf16 %v5634_v15, %v5633_v14  ;;  %v42_v19 = vld [vmem:[%s8450_s0 + $0x2] sm:$0x3]  ;;  %v43_v20 = vld [vmem:[%s8450_s0 + $0x4] sm:$0x3]  ;;  %v44_v21 = vld [vmem:[%s8450_s0 + $0x6] sm:$0x3] }
   0x5   :  { %6731 = vmatprep.subr.bf16.mxu1 %v6730_v12  ;;  %6725 = vmatpush3.bf16.msra.mxu0 %v6722_v6  ;;  %v67_v22 = vcombine.low %v41_v16, %v42_v19  ;;  %v68_v23 = vcombine.low %v43_v20, %v44_v21  ;;  %v7398_v24 = vsub.s32 %v71_v17, %v73_v10  ;;  %v45_v25 = vld [vmem:[%s8450_s0 + $0x8] sm:$0x3]  ;;  %v46_v26 = vld [vmem:[%s8450_s0 + $0xa] sm:$0x3]  ;;  %v47_v27 = vld [vmem:[%s8450_s0 + $0xc] sm:$0x3] }
   0x6   :  { %6733 = vmatpush3.bf16.msra.mxu1 %v6730_v12  ;;  %6727 = vmatprep.subr.bf16.mxu0 %v6726_v13  ;;  %v48_v28 = vld [vmem:[%s8450_s0 + $0xe] sm:$0x3]  ;;  %v84_v29 = vcombine.low %v45_v25, %v46_v26  ;;  %v5639_v30 = vld [vmem:[%s8449_s2 + $0x40] sm:$0xff]  ;;  %v5641_v38 = vld [vmem:[%s8449_s2 + $0x50] sm:$0xff]  ;;  %v7297_v6 = vmov 0.0|0.0  }
   0x7   :  { %v5640_v31 = vld [vmem:[%s8449_s2 + $0x48] sm:$0xff]  ;;  %6735 = vmatprep.subr.bf16.mxu1 %v6734_v18  ;;  %v75_v32 = vrot.slane %v67_v22, %v7398_v24  ;;  %v82_v33 = vrot.slane %v68_v23, %v7398_v24  ;;  %v85_v34 = vcombine.low %v47_v27, %v48_v28  ;;  %v5647_v36 = vld [vmem:[%s8449_s2 + $0x60] sm:$0xff]  ;;  %v5642_v41 = vld [vmem:[%s8449_s2 + $0x58] sm:$0xff] }
   0x8   :  { %v6738_v35 = vpack.c.bf16 %v5640_v31, %v5639_v30  ;;  %v5648_v37 = vld [vmem:[%s8449_s2 + $0x68] sm:$0xff]  ;;  %v92_v39 = vrot.slane %v84_v29, %v7398_v24  ;;  %v5649_v42 = vld [vmem:[%s8449_s2 + $0x70] sm:$0xff]  ;;  %v5650_v43 = vld [vmem:[%s8449_s2 + $0x78] sm:$0xff]  ;;  %v6742_v47 = vpack.c.bf16 %v5642_v41, %v5641_v38 }
   0x9   :  { %v6746_v40 = vpack.c.bf16 %v5648_v37, %v5647_v36  ;;  %6729 = vmatpush3.bf16.msra.mxu0 %v6726_v13  ;;  %v83_v44 = vcombine.low %v75_v32, %v82_v33  ;;  %v99_v45 = vrot.slane %v85_v34, %v7398_v24  ;;  %v6750_v48 = vpack.c.bf16 %v5650_v43, %v5649_v42  ;;  %v5655_v49 = vld [vmem:[%s8449_s2 + $0x80] sm:$0xff]  ;;  %v5656_v50 = vld [vmem:[%s8449_s2 + $0x88] sm:$0xff]  ;;  %v5657_v55 = vld [vmem:[%s8449_s2 + $0x90] sm:$0xff] }
   0xa   :  { %6737 = vmatpush3.bf16.msra.mxu1 %v6734_v18  ;;  %6739 = vmatprep.subr.bf16.mxu0 %v6738_v35  ;;  %v5663_v51 = vld [vmem:[%s8449_s2 + $0xa0] sm:$0xff]  ;;  %v5664_v52 = vld [vmem:[%s8449_s2 + $0xa8] sm:$0xff]  ;;  %v6754_v53 = vpack.c.bf16 %v5656_v50, %v5655_v49  ;;  %v5658_v56 = vld [vmem:[%s8449_s2 + $0x98] sm:$0xff]  ;;  %v7299_v18 = vmov 0.0  }
   0xb   :  { %6103 = vmatprep.mubr.msk.f32.mxu1 %vm111_vm0, %v83_v44  ;;  %6092 = vmatprep.mubr.msk.f32.mxu0 %vm111_vm0, %v83_v44  ;;  %v100_v46 = vcombine.low %v92_v39, %v99_v45  ;;  %v6762_v54 = vpack.c.bf16 %v5664_v52, %v5663_v51  ;;  %v5665_v57 = vld [vmem:[%s8449_s2 + $0xb0] sm:$0xff]  ;;  %v5666_v58 = vld [vmem:[%s8449_s2 + $0xb8] sm:$0xff]  ;;  %v6758_v59 = vpack.c.bf16 %v5658_v56, %v5657_v55  ;;  %v7473_v61 = vld [vmem:[%s8451_s1] sm:$0x3] }
   0xc   :  { %6747 = vmatprep.subr.bf16.mxu1 %v6746_v40  ;;  %v6766_v60 = vpack.c.bf16 %v5666_v58, %v5665_v57  ;;  %vm1264_vm1 = vcmp.gt.s32.totalorder %v7473_v61, 0  ;;  %v989_v62 = vld [vmem:[%s8452_s3] sm:$0xff]  ;;  %v990_v0 = vld [vmem:[%s8452_s3 + $0x8] sm:$0xff]  ;;  %v991_v5 = vld [vmem:[%s8452_s3 + $0x10] sm:$0xff]  ;;  %vm1515_vm2 = vcmp.gt.s32.totalorder %v7473_v61, 7  ;;  %vm2264_vm4 = vcmp.gt.s32.totalorder %v7473_v61, 2 }
   0xd   :  { %6104 = vmatmul.mubr.msk.f32.vlgmr.msra.gmra.mrb[0].mxu1 %vm111_vm0, %v100_v46  ;;  %6093 = vmatmul.mubr.msk.f32.vlgmr.msra.gmra.mrb[0].mxu0 %vm111_vm0, %v100_v46  ;;  %v1265_v63 = vsel %vm1264_vm1, 1, %v7296_v11  ;;  %v5671_v1 = vld [vmem:[%s8452_s3 + $0x20] sm:$0xff]  ;;  %v5672_v2 = vld [vmem:[%s8452_s3 + $0x28] sm:$0xff]  ;;  %v7493_v3 = vpack.c.bf16 %v990_v0, %v989_v62  ;;  %v992_v7 = vld [vmem:[%s8452_s3 + $0x18] sm:$0xff]  ;;  %v1516_v14 = vsel %vm1515_vm2, 1, %v7296_v11  ;;  %v2265_v28 = vsel %vm2264_vm4, 1, %v7296_v11 }
   0xe   :  { %6741 = vmatpush3.bf16.msra.mxu0 %v6738_v35  ;;  %6749 = vmatpush3.bf16.msra.mxu1 %v6746_v40  ;;  %v7495_v4 = vpack.c.bf16 %v5672_v2, %v5671_v1  ;;  %v5673_v8 = vld [vmem:[%s8452_s3 + $0x30] sm:$0xff]  ;;  %v5674_v9 = vld [vmem:[%s8452_s3 + $0x38] sm:$0xff]  ;;  %v7516_v10 = vpack.c.bf16 %v992_v7, %v991_v5  ;;  %v5675_v13 = vld [vmem:[%s8452_s3 + $0x40] sm:$0xff]  ;;  %vm2764_vm5 = vcmp.gt.s32.totalorder %v7473_v61, 3  ;;  %vm1764_vm6 = vcmp.gt.s32.totalorder %v7473_v61, 1 }
   0xf   :  { %6743 = vmatprep.subr.bf16.mxu0 %v6742_v47  ;;  %6751 = vmatprep.subr.bf16.mxu1 %v6750_v48  ;;  %v7518_v12 = vpack.c.bf16 %v5674_v9, %v5673_v8  ;;  %v5676_v15 = vld [vmem:[%s8452_s3 + $0x48] sm:$0xff]  ;;  %v5679_v16 = vld [vmem:[%s8452_s3 + $0x60] sm:$0xff]  ;;  %v5677_v21 = vld [vmem:[%s8452_s3 + $0x50] sm:$0xff]  ;;  %v2765_v40 = vsel %vm2764_vm5, 1, %v7296_v11  ;;  %vm2014_vm7 = vcmp.gt.s32.totalorder %v7473_v61, 6  ;;  %v1765_v42 = vsel %vm1764_vm6, 1, %v7296_v11 }
  0x10   :  { %6125 = vmatprep.mubr.msk.f32.mxu1 %vm111_vm0, %v83_v44  ;;  %6114 = vmatprep.mubr.msk.f32.mxu0 %vm111_vm0, %v83_v44  ;;  %v5680_v17 = vld [vmem:[%s8452_s3 + $0x68] sm:$0xff]  ;;  %v7541_v19 = vpack.c.bf16 %v5676_v15, %v5675_v13  ;;  %v5678_v22 = vld [vmem:[%s8452_s3 + $0x58] sm:$0xff]  ;;  %v5681_v23 = vld [vmem:[%s8452_s3 + $0x70] sm:$0xff]  ;;  %v2015_v43 = vsel %vm2014_vm7, 1, %v7296_v11  ;;  %vm2514_vm8 = vcmp.gt.s32.totalorder %v7473_v61, 5  ;;  %vm3014_vm9 = vcmp.gt.s32.totalorder %v7473_v61, 4 }
  0x11   :  { %1267 = vperm.xlu0 %7093, %v1265_v63   ;;  %v7543_v20 = vpack.c.bf16 %v5680_v17, %v5679_v16  ;;  %v5682_v25 = vld [vmem:[%s8452_s3 + $0x78] sm:$0xff]  ;;  %v7564_v26 = vpack.c.bf16 %v5678_v22, %v5677_v21  ;;  %v5683_v29 = vld [vmem:[%s8452_s3 + $0x80] sm:$0xff]  ;;  %v5684_v30 = vld [vmem:[%s8452_s3 + $0x88] sm:$0xff]  ;;  %1767 = vperm.xlu1 %7094, %v1765_v42   ;;  %v3015_v45 = vsel %vm3014_vm9, 1, %v7296_v11  ;;  %vm5343_vm5 = vcmask 1041408  }
  0x12   :  { %6745 = vmatpush3.bf16.msra.mxu0 %v6742_v47  ;;  %6753 = vmatpush3.bf16.msra.mxu1 %v6750_v48  ;;  %v7566_v27 = vpack.c.bf16 %v5682_v25, %v5681_v23  ;;  %v5687_v31 = vld [vmem:[%s8452_s3 + $0xa0] sm:$0xff]  ;;  %v5688_v32 = vld [vmem:[%s8452_s3 + $0xa8] sm:$0xff]  ;;  %v7589_v33 = vpack.c.bf16 %v5684_v30, %v5683_v29  ;;  %v5685_v34 = vld [vmem:[%s8452_s3 + $0x90] sm:$0xff] }
  0x13   :  { %6755 = vmatprep.subr.bf16.mxu0 %v6754_v53  ;;  %6763 = vmatprep.subr.bf16.mxu1 %v6762_v54  ;;  %v5686_v35 = vld [vmem:[%s8452_s3 + $0x98] sm:$0xff]  ;;  %v7599_v36 = vpack.c.bf16 %v5688_v32, %v5687_v31  ;;  %v5689_v37 = vld [vmem:[%s8452_s3 + $0xb0] sm:$0xff]  ;;  %v5628_v47 = vld [vmem:[%s8453_s4] ss:$0 sm:$0xff] }
  0x14   :  { %v5690_v38 = vld [vmem:[%s8452_s3 + $0xb8] sm:$0xff]  ;;  %v7611_v39 = vpack.c.bf16 %v5686_v35, %v5685_v34  ;;  %v101_v49 = vcombine.low %v5628_v47, %v5628_v47  ;;  %v5652_v50 = vld [vmem:[%s8453_s4 + $0x3] ss:$0 sm:$0xff]  ;;  %v5644_v51 = vld [vmem:[%s8453_s4 + $0x2] ss:$0 sm:$0xff] }
  0x15   :  { %6126 = vmatmul.mubr.msk.f32.vlgmr.msra.gmra.mrb[2].mxu1 %vm111_vm0, %v100_v46  ;;  %6115 = vmatmul.mubr.msk.f32.vlgmr.msra.gmra.mrb[2].mxu0 %vm111_vm0, %v100_v46  ;;  %v7618_v41 = vpack.c.bf16 %v5690_v38, %v5689_v37  ;;  %v5668_v55 = vld [vmem:[%s8453_s4 + $0x5] ss:$0 sm:$0xff]  ;;  %v5660_v56 = vld [vmem:[%s8453_s4 + $0x4] ss:$0 sm:$0xff] }
  0x16   :  { %6757 = vmatpush3.bf16.msra.mxu0 %v6754_v53  ;;  %6765 = vmatpush3.bf16.msra.mxu1 %v6762_v54  ;;  %v108_v52 = vrot.slane %v101_v49, %v7398_v24  ;;  %v554_v53 = vcombine.low %v5652_v50, %v5652_v50  ;;  %v405_v54 = vcombine.low %v5644_v51, %v5644_v51 }
  0x17   :  { %6759 = vmatprep.subr.bf16.mxu0 %v6758_v59  ;;  %6767 = vmatprep.subr.bf16.mxu1 %v6766_v60  ;;  %v852_v61 = vcombine.low %v5668_v55, %v5668_v55  ;;  %v703_v62 = vcombine.low %v5660_v56, %v5660_v56 }
  0x18   :  { %6147 = vmatprep.mubr.msk.f32.mxu1 %vm111_vm0, %v83_v44  ;;  %6136 = vmatprep.mubr.msk.f32.mxu0 %vm111_vm0, %v83_v44  ;;  %v2515_v44 = vsel %vm2514_vm8, 1, %v7296_v11  ;;  %v109_v58 = vcombine.low %v108_v52, %v108_v52 }
  0x19   :  { %1518 = vperm.xlu0 %7093, %v1516_v14   ;;  %2017 = vperm.xlu1 %7094, %v2015_v43   ;;  %v859_v15 = vrot.slane %v852_v61, %v7398_v24  ;;  %v710_v16 = vrot.slane %v703_v62, %v7398_v24 }
  0x1a   :  { %6761 = vmatpush3.bf16.msra.mxu0 %v6758_v59  ;;  %6769 = vmatpush3.bf16.msra.mxu1 %v6766_v60  ;;  %v561_v59 = vrot.slane %v554_v53, %v7398_v24  ;;  %v412_v60 = vrot.slane %v405_v54, %v7398_v24 }
  0x1b   :  { %6770 = vmatprep.subr.bf16.mxu0 %v7297_v6  ;;  %6776 = vmatprep.subr.bf16.mxu1 %v7297_v6  ;;  %v860_v54 = vcombine.low %v859_v15, %v859_v15  ;;  %v711_v55 = vcombine.low %v710_v16, %v710_v16 }
  0x1c   :  { %v562_v8 = vcombine.low %v561_v59, %v561_v59  ;;  %v413_v9 = vcombine.low %v412_v60, %v412_v60 }
  0x1d   :  { %6148 = vmatmul.mubr.msk.f32.vlgmr.msra.gmra.mrb[4].mxu1 %vm111_vm0, %v100_v46  ;;  %6137 = vmatmul.mubr.msk.f32.vlgmr.msra.gmra.mrb[4].mxu0 %vm111_vm0, %v100_v46  ;;  %v5636_v46 = vld [vmem:[%s8453_s4 + $0x1] ss:$0 sm:$0xff] }
  0x1e   :  { %6772 = vmatpush3.bf16.msra.mxu0 %v7493_v3  ;;  %6778 = vmatpush3.bf16.msra.mxu1 %v7495_v4  ;;  %v256_v48 = vcombine.low %v5636_v46, %v5636_v46 }
  0x1f   :  { %6773 = vmatprep.subr.bf16.mxu0 %v7297_v6  ;;  %6779 = vmatprep.subr.bf16.mxu1 %v7297_v6 }
  0x20   :  { %6158 = vmatprep.mubr.msk.f32.mxu0 %vm7298_vm3, %v7299_v18  ;;  %6169 = vmatprep.mubr.msk.f32.mxu1 %vm7298_vm3, %v7299_v18  ;;  %v263_v11 = vrot.slane %v256_v48, %v7398_v24 }
  0x21   :  { %2267 = vperm.xlu0 %7093, %v2265_v28   ;;  %2517 = vperm.xlu1 %7094, %v2515_v44  }
  0x22   :  { %6775 = vmatpush3.bf16.msra.mxu0 %v7516_v10  ;;  %6781 = vmatpush3.bf16.msra.mxu1 %v7518_v12  ;;  %v264_v57 = vcombine.low %v263_v11, %v263_v11 }
  0x23   :  { %6782 = vmatprep.subr.bf16.mxu0 %v7297_v6  ;;  %6788 = vmatprep.subr.bf16.mxu1 %v7297_v6 }
  0x25   :  { %6159 = vmatmul.mubr.f32.vlgmr.msra.gmra.mrb[6].mxu0 %v7299_v18  ;;  %6170 = vmatmul.mubr.f32.vlgmr.msra.gmra.mrb[6].mxu1 %v7299_v18 }
  0x26   :  { %6784 = vmatpush3.bf16.msra.mxu0 %v7541_v19  ;;  %6790 = vmatpush3.bf16.msra.mxu1 %v7543_v20 }
  0x27   :  { %6785 = vmatprep.subr.bf16.mxu0 %v7297_v6  ;;  %6791 = vmatprep.subr.bf16.mxu1 %v7297_v6 }
  0x28   :  { %6191 = vmatprep.mubr.msk.f32.mxu1 %vm7298_vm3, %v7299_v18  ;;  %6180 = vmatprep.mubr.msk.f32.mxu0 %vm7298_vm3, %v7299_v18 }
  0x29   :  { %2767 = vperm.xlu0 %7093, %v2765_v40   ;;  %3017 = vperm.xlu1 %7094, %v3015_v45  }
  0x2a   :  { %6787 = vmatpush3.bf16.msra.mxu0 %v7564_v26  ;;  %6793 = vmatpush3.bf16.msra.mxu1 %v7566_v27 }
  0x2b   :  { %6794 = vmatprep.subr.bf16.mxu0 %v7297_v6  ;;  %6800 = vmatprep.subr.bf16.mxu1 %v7297_v6 }
  0x2d   :  { %6192 = vmatmul.mubr.f32.vlgmr.msra.gmra.mrb[8].mxu1 %v7299_v18  ;;  %6181 = vmatmul.mubr.f32.vlgmr.msra.gmra.mrb[8].mxu0 %v7299_v18 }
  0x2e   :  { %6796 = vmatpush3.bf16.msra.mxu0 %v7589_v33  ;;  %6202 = vmatprep.mubr.msk.f32.mxu0 %vm7298_vm3, %v7299_v18 }
  0x2f   :  { %6797 = vmatprep.subr.bf16.mxu0 %v7297_v6  ;;  %6802 = vmatpush3.bf16.msra.mxu1 %v7599_v36 }
  0x30   :  { %6803 = vmatprep.subr.bf16.mxu1 %v7297_v6  ;;  %6213 = vmatprep.mubr.msk.f32.mxu1 %vm7298_vm3, %v7299_v18 }
  0x32   :  { %6799 = vmatpush3.bf16.msra.mxu0 %v7611_v39 }
  0x33   :  { %6805 = vmatpush3.bf16.msra.mxu1 %v7618_v41  ;;  %6806 = vmatprep.subr.bf16.mxu0 %v7297_v6 }
  0x34   :  { %6812 = vmatprep.subr.bf16.mxu1 %v7297_v6 }
  0x35   :  { %6203 = vmatmul.mubr.f32.vlgmr.msra.gmra.mrb[10].mxu0 %v7299_v18 }
  0x36   :  { %6214 = vmatmul.mubr.f32.vlgmr.msra.gmra.mrb[10].mxu1 %v7299_v18  ;;  %6808 = vmatpush3.bf16.msra.mxu0 %v7493_v3 }
  0x37   :  { %6814 = vmatpush3.bf16.msra.mxu1 %v7495_v4  ;;  %6809 = vmatprep.subr.bf16.mxu0 %v7297_v6 }
  0x38   :  { %6815 = vmatprep.subr.bf16.mxu1 %v7297_v6  ;;  %6224 = vmatprep.mubr.msk.f32.mxu0 %vm7298_vm3, %v7299_v18 }
  0x39   :  { %6235 = vmatprep.mubr.msk.f32.mxu1 %vm7298_vm3, %v7299_v18 }
  0x3a   :  { %6811 = vmatpush3.bf16.msra.mxu0 %v7516_v10 }
  0x3b   :  { %6817 = vmatpush3.bf16.msra.mxu1 %v7518_v12  ;;  %6818 = vmatprep.subr.bf16.mxu0 %v7297_v6 }
  0x3c   :  { %6824 = vmatprep.subr.bf16.mxu1 %v7297_v6 }
  0xe0   :  { %v6105_v63 = vpop.f32.mrb[0].mxu1  ;;  %v6094_v0 = vpop.f32.mrb[0].mxu0 }
  0xe1   :  { %v338_v1 = vadd.f32 %v6105_v63, %v264_v57  ;;  %v188_v2 = vadd.f32 %v6094_v0, %v109_v58  ;;  %v332_v5 = vpop.f32.mrb[1].mxu1  ;;  %v182_v7 = vpop.f32.mrb[1].mxu0 }
  0xe2   :  { %v333_v13 = vadd.f32 %v332_v5, %v264_v57  ;;  %v183_v14 = vadd.f32 %v182_v7, %v109_v58 }
  0xe3   :  { %v360_v17 = vcombine.high %v338_v1, %v338_v1  ;;  %v367_v21 = vrot.slane %v338_v1, %v7398_v24  ;;  %v210_v22 = vcombine.high %v188_v2, %v188_v2  ;;  %v217_v23 = vrot.slane %v188_v2, %v7398_v24 }
  0xe4   :  { %v343_v25 = vcombine.high %v333_v13, %v333_v13  ;;  %v350_v28 = vrot.slane %v333_v13, %v7398_v24  ;;  %v193_v29 = vcombine.high %v183_v14, %v183_v14  ;;  %v200_v30 = vrot.slane %v183_v14, %v7398_v24 }
  0xe5   :  { %v374_v31 = vrot.slane %v360_v17, %v7398_v24  ;;  %v375_v32 = vcombine.high %v367_v21, %v367_v21  ;;  %389 = vst.msk [vmem:[#allocation3 + $0x8] sm:$0x3] %vm235_vm10, %v367_v21  ;;  %v224_v34 = vrot.slane %v210_v22, %v7398_v24  ;;  %v225_v35 = vcombine.high %v217_v23, %v217_v23 }
  0xe6   :  { %240 = vst.msk [vmem:[#allocation2 + $0x8] sm:$0x3] %vm235_vm10, %v217_v23  ;;  %v357_v37 = vrot.slane %v343_v25, %v7398_v24  ;;  %v358_v38 = vcombine.high %v350_v28, %v350_v28  ;;  %385 = vst.msk [vmem:[#allocation3] sm:$0x3] %vm235_vm10, %v350_v28  ;;  %v207_v40 = vrot.slane %v193_v29, %v7398_v24 }
  0xe7   :  { %v208_v42 = vcombine.high %v200_v30, %v200_v30  ;;  %236 = vst.msk [vmem:[#allocation2] sm:$0x3] %vm235_vm10, %v200_v30  ;;  %v376_v43 = vcombine.high %v374_v31, %v374_v31  ;;  %390 = vst.msk [vmem:[#allocation3 + $0xa] sm:$0x3] %vm235_vm10, %v375_v32  ;;  %v226_v44 = vcombine.high %v224_v34, %v224_v34 }
  0xe8   :  { %391 = vst.msk [vmem:[#allocation3 + $0xc] sm:$0x3] %vm235_vm10, %v374_v31  ;;  %241 = vst.msk [vmem:[#allocation2 + $0xa] sm:$0x3] %vm235_vm10, %v225_v35  ;;  %v359_v45 = vcombine.high %v357_v37, %v357_v37  ;;  %v209_v46 = vcombine.high %v207_v40, %v207_v40  ;;  %v6127_v47 = vpop.f32.mrb[2].mxu1  ;;  %v6116_v48 = vpop.f32.mrb[2].mxu0 }
  0xe9   :  { %242 = vst.msk [vmem:[#allocation2 + $0xc] sm:$0x3] %vm235_vm10, %v224_v34  ;;  %386 = vst.msk [vmem:[#allocation3 + $0x2] sm:$0x3] %vm235_vm10, %v358_v38  ;;  %v636_v49 = vadd.f32 %v6127_v47, %v562_v8  ;;  %v487_v50 = vadd.f32 %v6116_v48, %v413_v9  ;;  %v630_v51 = vpop.f32.mrb[3].mxu1  ;;  %v481_v11 = vpop.f32.mrb[3].mxu0 }
  0xea   :  { %387 = vst.msk [vmem:[#allocation3 + $0x4] sm:$0x3] %vm235_vm10, %v357_v37  ;;  %237 = vst.msk [vmem:[#allocation2 + $0x2] sm:$0x3] %vm235_vm10, %v208_v42  ;;  %v631_v52 = vadd.f32 %v630_v51, %v562_v8  ;;  %v482_v53 = vadd.f32 %v481_v11, %v413_v9 }
  0xeb   :  { %238 = vst.msk [vmem:[#allocation2 + $0x4] sm:$0x3] %vm235_vm10, %v207_v40  ;;  %392 = vst.msk [vmem:[#allocation3 + $0xe] sm:$0x3] %vm235_vm10, %v376_v43  ;;  %v658_v56 = vcombine.high %v636_v49, %v636_v49  ;;  %v665_v57 = vrot.slane %v636_v49, %v7398_v24  ;;  %v509_v58 = vcombine.high %v487_v50, %v487_v50 }
  0xec   :  { %243 = vst.msk [vmem:[#allocation2 + $0xe] sm:$0x3] %vm235_vm10, %v226_v44  ;;  %388 = vst.msk [vmem:[#allocation3 + $0x6] sm:$0x3] %vm235_vm10, %v359_v45  ;;  %v516_v59 = vrot.slane %v487_v50, %v7398_v24  ;;  %v641_v60 = vcombine.high %v631_v52, %v631_v52  ;;  %v648_v61 = vrot.slane %v631_v52, %v7398_v24 }
  0xed   :  { %239 = vst.msk [vmem:[#allocation2 + $0x6] sm:$0x3] %vm235_vm10, %v209_v46  ;;  %v492_v62 = vcombine.high %v482_v53, %v482_v53  ;;  %v499_v63 = vrot.slane %v482_v53, %v7398_v24  ;;  %v672_v0 = vrot.slane %v658_v56, %v7398_v24  ;;  %v673_v1 = vcombine.high %v665_v57, %v665_v57 }
  0xee   :  { %687 = vst.msk [vmem:[#allocation5 + $0x8] sm:$0x3] %vm235_vm10, %v665_v57  ;;  %v523_v2 = vrot.slane %v509_v58, %v7398_v24  ;;  %v524_v5 = vcombine.high %v516_v59, %v516_v59  ;;  %538 = vst.msk [vmem:[#allocation4 + $0x8] sm:$0x3] %vm235_vm10, %v516_v59  ;;  %v655_v7 = vrot.slane %v641_v60, %v7398_v24 }
  0xef   :  { %v656_v8 = vcombine.high %v648_v61, %v648_v61  ;;  %683 = vst.msk [vmem:[#allocation5] sm:$0x3] %vm235_vm10, %v648_v61  ;;  %v506_v9 = vrot.slane %v492_v62, %v7398_v24  ;;  %v507_v13 = vcombine.high %v499_v63, %v499_v63  ;;  %534 = vst.msk [vmem:[#allocation4] sm:$0x3] %vm235_vm10, %v499_v63  ;;  %v1022_v62 = vld [vmem:[#allocation3] sm:$0x3] }
  0xf0   :  { %v674_v14 = vcombine.high %v672_v0, %v672_v0  ;;  %688 = vst.msk [vmem:[#allocation5 + $0xa] sm:$0x3] %vm235_vm10, %v673_v1  ;;  %689 = vst.msk [vmem:[#allocation5 + $0xc] sm:$0x3] %vm235_vm10, %v672_v0  ;;  %v525_v15 = vcombine.high %v523_v2, %v523_v2  ;;  %v657_v16 = vcombine.high %v655_v7, %v655_v7  ;;  %v6149_v21 = vpop.f32.mrb[4].mxu1  ;;  %v6138_v22 = vpop.f32.mrb[4].mxu0 }
  0xf1   :  { %539 = vst.msk [vmem:[#allocation4 + $0xa] sm:$0x3] %vm235_vm10, %v524_v5  ;;  %540 = vst.msk [vmem:[#allocation4 + $0xc] sm:$0x3] %vm235_vm10, %v523_v2  ;;  %v508_v17 = vcombine.high %v506_v9, %v506_v9  ;;  %v934_v23 = vadd.f32 %v6149_v21, %v860_v54  ;;  %v785_v25 = vadd.f32 %v6138_v22, %v711_v55  ;;  %v928_v28 = vpop.f32.mrb[5].mxu1  ;;  %v779_v29 = vpop.f32.mrb[5].mxu0 }
  0xf2   :  { %684 = vst.msk [vmem:[#allocation5 + $0x2] sm:$0x3] %vm235_vm10, %v656_v8  ;;  %685 = vst.msk [vmem:[#allocation5 + $0x4] sm:$0x3] %vm235_vm10, %v655_v7  ;;  %v929_v30 = vadd.f32 %v928_v28, %v860_v54  ;;  %v780_v31 = vadd.f32 %v779_v29, %v711_v55  ;;  %v1021_v55 = vld [vmem:[#allocation2] sm:$0x3] }
  0xf3   :  { %535 = vst.msk [vmem:[#allocation4 + $0x2] sm:$0x3] %vm235_vm10, %v507_v13  ;;  %536 = vst.msk [vmem:[#allocation4 + $0x4] sm:$0x3] %vm235_vm10, %v506_v9  ;;  %v956_v32 = vcombine.high %v934_v23, %v934_v23  ;;  %v963_v34 = vrot.slane %v934_v23, %v7398_v24  ;;  %v807_v35 = vcombine.high %v785_v25, %v785_v25 }
  0xf4   :  { %690 = vst.msk [vmem:[#allocation5 + $0xe] sm:$0x3] %vm235_vm10, %v674_v14  ;;  %541 = vst.msk [vmem:[#allocation4 + $0xe] sm:$0x3] %vm235_vm10, %v525_v15  ;;  %v814_v37 = vrot.slane %v785_v25, %v7398_v24  ;;  %v939_v38 = vcombine.high %v929_v30, %v929_v30  ;;  %v946_v40 = vrot.slane %v929_v30, %v7398_v24 }
  0xf5   :  { %686 = vst.msk [vmem:[#allocation5 + $0x6] sm:$0x3] %vm235_vm10, %v657_v16  ;;  %537 = vst.msk [vmem:[#allocation4 + $0x6] sm:$0x3] %vm235_vm10, %v508_v17  ;;  %v790_v42 = vcombine.high %v780_v31, %v780_v31  ;;  %v797_v43 = vrot.slane %v780_v31, %v7398_v24  ;;  %v970_v44 = vrot.slane %v956_v32, %v7398_v24  ;;  %v7748_v32 = vld [vmem:[%s8454_s5] ss:$0 sm:$0xff] }
  0xf6   :  { %v971_v45 = vcombine.high %v963_v34, %v963_v34  ;;  %985 = vst.msk [vmem:[#allocation7 + $0x8] sm:$0x3] %vm235_vm10, %v963_v34  ;;  %v821_v46 = vrot.slane %v807_v35, %v7398_v24  ;;  %v822_v47 = vcombine.high %v814_v37, %v814_v37  ;;  %836 = vst.msk [vmem:[#allocation6 + $0x8] sm:$0x3] %vm235_vm10, %v814_v37 }
  0xf7   :  { %v953_v48 = vrot.slane %v939_v38, %v7398_v24  ;;  %v954_v49 = vcombine.high %v946_v40, %v946_v40  ;;  %981 = vst.msk [vmem:[#allocation7] sm:$0x3] %vm235_vm10, %v946_v40  ;;  %v804_v50 = vrot.slane %v790_v42, %v7398_v24  ;;  %v805_v51 = vcombine.high %v797_v43, %v797_v43  ;;  %v1023_v40 = vld [vmem:[#allocation4] sm:$0x3] }
  0xf8   :  { %832 = vst.msk [vmem:[#allocation6] sm:$0x3] %vm235_vm10, %v797_v43  ;;  %v972_v11 = vcombine.high %v970_v44, %v970_v44  ;;  %986 = vst.msk [vmem:[#allocation7 + $0xa] sm:$0x3] %vm235_vm10, %v971_v45  ;;  %v823_v52 = vcombine.high %v821_v46, %v821_v46  ;;  %v1093_v56 = vpop.f32.mrb[6].mxu0  ;;  %v1170_v57 = vpop.f32.mrb[6].mxu1 }
  0xf9   :  { %987 = vst.msk [vmem:[#allocation7 + $0xc] sm:$0x3] %vm235_vm10, %v970_v44  ;;  %837 = vst.msk [vmem:[#allocation6 + $0xa] sm:$0x3] %vm235_vm10, %v822_v47  ;;  %v955_v53 = vcombine.high %v953_v48, %v953_v48  ;;  %v806_v54 = vcombine.high %v804_v50, %v804_v50  ;;  %v1097_v58 = vadd.f32 %v1093_v56, %v1021_v55  ;;  %v6160_v59 = vpop.f32.mrb[7].mxu0  ;;  %v6171_v60 = vpop.f32.mrb[7].mxu1 }
  0xfa   :  { %838 = vst.msk [vmem:[#allocation6 + $0xc] sm:$0x3] %vm235_vm10, %v821_v46  ;;  %982 = vst.msk [vmem:[#allocation7 + $0x2] sm:$0x3] %vm235_vm10, %v954_v49  ;;  %v1174_v63 = vadd.f32 %v1170_v57, %v1022_v62  ;;  %v7754_v42 = vld [vmem:[%s8454_s5 + $0x1] ss:$0 sm:$0xff] }
  0xfb   :  { %983 = vst.msk [vmem:[#allocation7 + $0x4] sm:$0x3] %vm235_vm10, %v953_v48  ;;  %833 = vst.msk [vmem:[#allocation6 + $0x2] sm:$0x3] %vm235_vm10, %v805_v51  ;;  %v5692_v61 = vmul.f32 -1.442695, %v1097_v58 }
  0xfc   :  { %834 = vst.msk [vmem:[#allocation6 + $0x4] sm:$0x3] %vm235_vm10, %v804_v50  ;;  %988 = vst.msk [vmem:[#allocation7 + $0xe] sm:$0x3] %vm235_vm10, %v972_v11  ;;  %v5693_v0 = vmul.f32 -1.442695, %v1174_v63 }
  0xfd   :  { %839 = vst.msk [vmem:[#allocation6 + $0xe] sm:$0x3] %vm235_vm10, %v823_v52  ;;  %984 = vst.msk [vmem:[#allocation7 + $0x6] sm:$0x3] %vm235_vm10, %v955_v53  ;;  %7095 = vpow2.f32 %v5692_v61  ;;  %v1273_v1 = vld [vmem:[#allocation5 + $0xe] sm:$0x3]  ;;  %v7757_v53 = vpop.permute.xlu0 %1267 }
  0xfe   :  { %835 = vst.msk [vmem:[#allocation6 + $0x6] sm:$0x3] %vm235_vm10, %v806_v54  ;;  %7097 = vpow2.f32 %v5693_v0  ;;  %vm1269_vm11 = vcmp.eq.s32.totalorder %v7757_v53, 1 }
 0x100   :  { %v1344_v2 = vpop.f32.mrb[8].mxu1  ;;  %v1253_v5 = vpop.f32.mrb[8].mxu0 }
 0x101   :  { %v1348_v7 = vadd.f32 %v1344_v2, %v1273_v1  ;;  %v6193_v8 = vpop.f32.mrb[9].mxu1  ;;  %v6182_v9 = vpop.f32.mrb[9].mxu0  ;;  %v1254_v35 = vadd.f32 %v7748_v32, %v1253_v5  ;;  %v1525_v2 = vld [vmem:[#allocation2 + $0x2] sm:$0x3] }
 0x102   :  { %v7778_v63 = vpop.permute.xlu0 %1518 }
 0x103   :  { %v5695_v13 = vmul.f32 -1.442695, %v1348_v7  ;;  %v1277_v49 = vld [vmem:[#allocation7 + $0xe] sm:$0x3]  ;;  %vm1520_vm12 = vcmp.eq.s32.totalorder %v7778_v63, 1 }
 0x104   :  { %v1275_v16 = vld [vmem:[#allocation6 + $0xe] sm:$0x3] }
 0x105   :  { %7099 = vpow2.f32 %v5695_v13 }
 0x107   :  { %v7096_v14 = vpop.eup %7095 }
 0x108   :  { %v1101_v15 = vadd.f32 1.0, %v7096_v14  ;;  %v1421_v17 = vpop.f32.mrb[10].mxu0  ;;  %v7098_v29 = vpop.eup %7097 }
 0x109   :  { %v1425_v21 = vadd.f32 %v1421_v17, %v1275_v16  ;;  %v6204_v22 = vpop.f32.mrb[11].mxu0  ;;  %v1504_v23 = vpop.f32.mrb[10].mxu1  ;;  %v1178_v34 = vadd.f32 1.0, %v7098_v29 }
 0x10a   :  { %7101 = vrcp.f32 %v1101_v15  ;;  %v6215_v25 = vpop.f32.mrb[11].mxu1  ;;  %v1505_v46 = vadd.f32 %v7754_v42, %v1504_v23  ;;  %v1527_v15 = vld [vmem:[#allocation3 + $0x2] sm:$0x3]  ;;  %v1775_v22 = vld [vmem:[#allocation5 + $0xc] sm:$0x3] }
 0x10b   :  { %v5696_v28 = vmul.f32 -1.442695, %v1425_v21 }
 0x10d   :  { %7103 = vpow2.f32 %v5696_v28 }
 0x10f   :  { %v7100_v30 = vpop.eup %7099 }
 0x110   :  { %v1352_v31 = vadd.f32 1.0, %v7100_v30 }
 0x112   :  { %7105 = vrcp.f32 %v1352_v31 }
 0x113   :  { %7107 = vrcp.f32 %v1178_v34 }
 0x114   :  { %v7102_v37 = vpop.eup %7101 }
 0x115   :  { %v1257_v38 = vmul.f32 %v7102_v37, %v1254_v35  ;;  %v1777_v35 = vld [vmem:[#allocation6 + $0xc] sm:$0x3] }
 0x117   :  { %v7104_v43 = vpop.eup %7103  ;;  %v1258_v44 = vadd.f32 %v1257_v38, %v1023_v40 }
 0x118   :  { %v1429_v45 = vadd.f32 1.0, %v7104_v43 }
 0x119   :  { %7109 = vtanh.f32 %v1258_v44 }
 0x11a   :  { %7111 = vrcp.f32 %v1429_v45 }
 0x11c   :  { %v7106_v47 = vpop.eup %7105 }
 0x11d   :  { %v1508_v48 = vmul.f32 %v7106_v47, %v1505_v46  ;;  %v7108_v50 = vpop.eup %7107 }
 0x11e   :  { %v1260_v11 = vsub.f32 1.0, %v7108_v50  ;;  %v1262_v55 = vmul.f32 0.0, %v7108_v50 }
 0x11f   :  { %v1509_v51 = vadd.f32 %v1508_v48, %v1277_v49 }
 0x121   :  { %7113 = vtanh.f32 %v1509_v51 }
 0x123   :  { %v7110_v52 = vpop.eup %7109 }
 0x124   :  { %v1261_v54 = vmul.f32 %v7110_v52, %v1260_v11  ;;  %v7112_v57 = vpop.eup %7111  ;;  %v1529_v52 = vld [vmem:[#allocation4 + $0x2] sm:$0x3] }
 0x125   :  { %v1511_v59 = vsub.f32 1.0, %v7112_v57  ;;  %v1513_v62 = vmul.f32 0.0, %v7112_v57 }
 0x126   :  { %v1263_v56 = vadd.f32 %v1262_v55, %v1261_v54 }
 0x128   :  { %v7762_v58 = vsel %vm1269_vm11, %v1263_v56, 0.0 }
 0x129   :  { %1271 = vst.msk [vmem:[#allocation8] sm:$0x3] %vm235_vm10, %v7762_v58  ;;  %6225 = vmatmul.mubr.msk.f32.vlgmr.msra.gmra.mrb[12].mxu0 %vm111_vm0, %v7762_v58  ;;  %6236 = vmatmul.mubr.msk.f32.vlgmr.msra.gmra.mrb[12].mxu1 %vm111_vm0, %v7762_v58 }
 0x12a   :  { %6820 = vmatpush3.bf16.msra.mxu0 %v7541_v19  ;;  %6826 = vmatpush3.bf16.msra.mxu1 %v7543_v20 }
 0x12b   :  { %v7114_v60 = vpop.eup %7113  ;;  %6821 = vmatprep.subr.bf16.mxu0 %v7297_v6  ;;  %6827 = vmatprep.subr.bf16.mxu1 %v7297_v6 }
 0x12c   :  { %v1512_v61 = vmul.f32 %v7114_v60, %v1511_v59  ;;  %6246 = vmatprep.mubr.msk.f32.mxu0 %vm7298_vm3, %v7299_v18  ;;  %6257 = vmatprep.mubr.msk.f32.mxu1 %vm7298_vm3, %v7299_v18 }
 0x12e   :  { %v1514_v0 = vadd.f32 %v1513_v62, %v1512_v61  ;;  %6823 = vmatpush3.bf16.msra.mxu0 %v7564_v26  ;;  %6829 = vmatpush3.bf16.msra.mxu1 %v7566_v27  ;;  %v1779_v61 = vld [vmem:[#allocation7 + $0xc] sm:$0x3] }
 0x12f   :  { %6830 = vmatprep.subr.bf16.mxu0 %v7297_v6  ;;  %6836 = vmatprep.subr.bf16.mxu1 %v7297_v6 }
 0x130   :  { %v7787_v1 = vsel %vm1520_vm12, %v1514_v0, 0.0 }
 0x131   :  { %1523 = vst.msk [vmem:[#allocation9 + $0xe] sm:$0x3] %vm235_vm10, %v7787_v1  ;;  %6247 = vmatmul.mubr.msk.f32.vlgmr.msra.gmra.mrb[14].mxu0 %vm111_vm0, %v7762_v58  ;;  %6258 = vmatmul.mubr.msk.f32.vlgmr.msra.gmra.mrb[14].mxu1 %vm111_vm0, %v7787_v1 }
 0x132   :  { %6832 = vmatpush3.bf16.msra.mxu0 %v7589_v33  ;;  %6838 = vmatpush3.bf16.msra.mxu1 %v7599_v36 }
 0x133   :  { %6833 = vmatprep.subr.bf16.mxu0 %v7297_v6  ;;  %6839 = vmatprep.subr.bf16.mxu1 %v7297_v6 }
 0x134   :  { %6268 = vmatprep.mubr.msk.f32.mxu0 %vm7298_vm3, %v7299_v18  ;;  %6279 = vmatprep.mubr.msk.f32.mxu1 %vm7298_vm3, %v7299_v18 }
 0x136   :  { %6835 = vmatpush3.bf16.msra.mxu0 %v7611_v39  ;;  %6841 = vmatpush3.bf16.msra.mxu1 %v7618_v41 }
 0x137   :  { %6842 = vmatprep.subr.bf16.mxu0 %v7297_v6  ;;  %6848 = vmatprep.subr.bf16.mxu1 %v7297_v6 }
 0x139   :  { %6269 = vmatmul.mubr.msk.f32.vlgmr.msra.gmra.mrb[16].mxu0 %vm111_vm0, %v7787_v1  ;;  %6280 = vmatmul.mubr.msk.f32.vlgmr.msra.gmra.mrb[16].mxu1 %vm111_vm0, %v7787_v1 }
 0x13a   :  { %6844 = vmatpush3.bf16.msra.mxu0 %v7493_v3  ;;  %6850 = vmatpush3.bf16.msra.mxu1 %v7495_v4 }
 0x13b   :  { %6845 = vmatprep.subr.bf16.mxu0 %v7297_v6  ;;  %6851 = vmatprep.subr.bf16.mxu1 %v7297_v6 }
 0x13c   :  { %6290 = vmatprep.mubr.msk.f32.mxu0 %vm7298_vm3, %v7299_v18  ;;  %6301 = vmatprep.mubr.msk.f32.mxu1 %vm7298_vm3, %v7299_v18 }
 0x13e   :  { %6847 = vmatpush3.bf16.msra.mxu0 %v7516_v10  ;;  %6853 = vmatpush3.bf16.msra.mxu1 %v7518_v12 }
 0x13f   :  { %6854 = vmatprep.subr.bf16.mxu0 %v7297_v6  ;;  %6860 = vmatprep.subr.bf16.mxu1 %v7297_v6 }
 0x1fc   :  { %v1599_v5 = vpop.f32.mrb[12].mxu0  ;;  %v1676_v7 = vpop.f32.mrb[12].mxu1 }
 0x1fd   :  { %v1603_v8 = vadd.f32 %v1599_v5, %v1525_v2  ;;  %v6226_v9 = vpop.f32.mrb[13].mxu0  ;;  %v6237_v13 = vpop.f32.mrb[13].mxu1  ;;  %v1680_v16 = vadd.f32 %v1676_v7, %v1527_v15 }
 0x1fe   :  { %v7825_v7 = vpop.permute.xlu1 %1767 }
 0x1ff   :  { %v5699_v14 = vmul.f32 -1.442695, %v1603_v8  ;;  %v5701_v17 = vmul.f32 -1.442695, %v1680_v16  ;;  %vm1769_vm13 = vcmp.eq.s32.totalorder %v7825_v7, 1  ;;  %v4986_v7 = vld [vmem:[%s8455_s6] sm:$0xff] }
 0x201   :  { %7115 = vpow2.f32 %v5699_v14 }
 0x202   :  { %7117 = vpow2.f32 %v5701_v17 }
 0x204   :  { %v1753_v21 = vpop.f32.mrb[14].mxu0  ;;  %v1849_v23 = vpop.f32.mrb[14].mxu1 }
 0x205   :  { %v6248_v25 = vpop.f32.mrb[15].mxu0  ;;  %v1853_v28 = vadd.f32 %v1849_v23, %v1775_v22  ;;  %v6259_v29 = vpop.f32.mrb[15].mxu1  ;;  %v1754_v50 = vadd.f32 %v7748_v32, %v1753_v21 }
 0x206   :  { %v7850_v23 = vpop.permute.xlu1 %2017 }
 0x207   :  { %v5704_v30 = vmul.f32 -1.442695, %v1853_v28  ;;  %vm2019_vm14 = vcmp.eq.s32.totalorder %v7850_v23, 1 }
 0x209   :  { %7119 = vpow2.f32 %v5704_v30 }
 0x20b   :  { %v7116_v31 = vpop.eup %7115 }
 0x20c   :  { %v1607_v34 = vadd.f32 1.0, %v7116_v31  ;;  %v1926_v37 = vpop.f32.mrb[16].mxu0  ;;  %v2003_v38 = vpop.f32.mrb[16].mxu1 }
 0x20d   :  { %v1930_v40 = vadd.f32 %v1926_v37, %v1777_v35  ;;  %v6270_v43 = vpop.f32.mrb[17].mxu0  ;;  %v6281_v44 = vpop.f32.mrb[17].mxu1  ;;  %v2004_v57 = vadd.f32 %v7754_v42, %v2003_v38 }
 0x20e   :  { %7121 = vrcp.f32 %v1607_v34  ;;  %v7118_v46 = vpop.eup %7117 }
 0x20f   :  { %v5706_v45 = vmul.f32 -1.442695, %v1930_v40  ;;  %v1684_v49 = vadd.f32 1.0, %v7118_v46  ;;  %v2027_v40 = vld [vmem:[#allocation3 + $0x4] sm:$0x3] }
 0x210   :  { %v2275_v46 = vld [vmem:[#allocation5 + $0xa] sm:$0x3] }
 0x211   :  { %7123 = vpow2.f32 %v5706_v45 }
 0x213   :  { %v7120_v47 = vpop.eup %7119 }
 0x214   :  { %v1857_v48 = vadd.f32 1.0, %v7120_v47 }
 0x216   :  { %7125 = vrcp.f32 %v1857_v48 }
 0x217   :  { %7127 = vrcp.f32 %v1684_v49 }
 0x218   :  { %v7122_v51 = vpop.eup %7121 }
 0x219   :  { %v1757_v11 = vmul.f32 %v7122_v51, %v1754_v50 }
 0x21b   :  { %v7124_v54 = vpop.eup %7123  ;;  %v1758_v55 = vadd.f32 %v1757_v11, %v1529_v52 }
 0x21c   :  { %v1934_v56 = vadd.f32 1.0, %v7124_v54  ;;  %v2277_v54 = vld [vmem:[#allocation6 + $0xa] sm:$0x3] }
 0x21d   :  { %7129 = vtanh.f32 %v1758_v55 }
 0x21e   :  { %7131 = vrcp.f32 %v1934_v56 }
 0x220   :  { %v7126_v59 = vpop.eup %7125 }
 0x221   :  { %v2007_v60 = vmul.f32 %v7126_v59, %v2004_v57  ;;  %v7128_v62 = vpop.eup %7127 }
 0x222   :  { %v1760_v2 = vsub.f32 1.0, %v7128_v62  ;;  %v1762_v9 = vmul.f32 %v7128_v62, %v7762_v58 }
 0x223   :  { %v2008_v0 = vadd.f32 %v2007_v60, %v1779_v61 }
 0x225   :  { %7133 = vtanh.f32 %v2008_v0 }
 0x227   :  { %v7130_v5 = vpop.eup %7129 }
 0x228   :  { %v1761_v8 = vmul.f32 %v7130_v5, %v1760_v2  ;;  %v7132_v14 = vpop.eup %7131 }
 0x229   :  { %v2010_v17 = vsub.f32 1.0, %v7132_v14  ;;  %v2012_v22 = vmul.f32 %v7132_v14, %v7787_v1  ;;  %v2029_v14 = vld [vmem:[#allocation4 + $0x4] sm:$0x3] }
 0x22a   :  { %v1763_v13 = vadd.f32 %v1762_v9, %v1761_v8 }
 0x22c   :  { %v7832_v15 = vsel %vm1769_vm13, %v1763_v13, %v7762_v58  ;;  %v1771_v16 = vsel %vm1769_vm13, %v1763_v13, 0.0 }
 0x22d   :  { %1773 = vst.msk [vmem:[#allocation8 + $0x2] sm:$0x3] %vm235_vm10, %v1771_v16  ;;  %6291 = vmatmul.mubr.msk.f32.vlgmr.msra.gmra.mrb[18].mxu0 %vm111_vm0, %v7832_v15  ;;  %6302 = vmatmul.mubr.msk.f32.vlgmr.msra.gmra.mrb[18].mxu1 %vm111_vm0, %v7832_v15 }
 0x22e   :  { %6856 = vmatpush3.bf16.msra.mxu0 %v7541_v19  ;;  %6862 = vmatpush3.bf16.msra.mxu1 %v7543_v20 }
 0x22f   :  { %v7134_v21 = vpop.eup %7133  ;;  %6857 = vmatprep.subr.bf16.mxu0 %v7297_v6  ;;  %6863 = vmatprep.subr.bf16.mxu1 %v7297_v6 }
 0x230   :  { %v2011_v58 = vmul.f32 %v7134_v21, %v2010_v17  ;;  %6312 = vmatprep.mubr.msk.f32.mxu0 %vm7298_vm3, %v7299_v18  ;;  %6323 = vmatprep.mubr.msk.f32.mxu1 %vm7298_vm3, %v7299_v18 }
 0x232   :  { %v2013_v25 = vadd.f32 %v2012_v22, %v2011_v58  ;;  %6859 = vmatpush3.bf16.msra.mxu0 %v7564_v26  ;;  %6865 = vmatpush3.bf16.msra.mxu1 %v7566_v27 }
 0x233   :  { %6866 = vmatprep.subr.bf16.mxu0 %v7297_v6  ;;  %6872 = vmatprep.subr.bf16.mxu1 %v7297_v6 }
 0x234   :  { %v7860_v28 = vsel %vm2019_vm14, %v2013_v25, %v7787_v1  ;;  %v2021_v29 = vsel %vm2019_vm14, %v2013_v25, 0.0  ;;  %v2025_v1 = vld [vmem:[#allocation2 + $0x4] sm:$0x3] }
 0x235   :  { %2023 = vst.msk [vmem:[#allocation9 + $0xc] sm:$0x3] %vm235_vm10, %v2021_v29  ;;  %6313 = vmatmul.mubr.msk.f32.vlgmr.msra.gmra.mrb[20].mxu0 %vm111_vm0, %v7832_v15  ;;  %6324 = vmatmul.mubr.msk.f32.vlgmr.msra.gmra.mrb[20].mxu1 %vm111_vm0, %v7860_v28  ;;  %v2279_v29 = vld [vmem:[#allocation7 + $0xa] sm:$0x3] }
 0x236   :  { %6868 = vmatpush3.bf16.msra.mxu0 %v7589_v33  ;;  %6874 = vmatpush3.bf16.msra.mxu1 %v7599_v36 }
 0x237   :  { %6869 = vmatprep.subr.bf16.mxu0 %v7297_v6  ;;  %6875 = vmatprep.subr.bf16.mxu1 %v7297_v6 }
 0x238   :  { %6334 = vmatprep.mubr.msk.f32.mxu0 %vm7298_vm3, %v7299_v18  ;;  %6345 = vmatprep.mubr.msk.f32.mxu1 %vm7298_vm3, %v7299_v18 }
 0x23a   :  { %6871 = vmatpush3.bf16.msra.mxu0 %v7611_v39  ;;  %6877 = vmatpush3.bf16.msra.mxu1 %v7618_v41 }
 0x23b   :  { %6878 = vmatprep.subr.bf16.mxu0 %v7297_v6  ;;  %6884 = vmatprep.subr.bf16.mxu1 %v7297_v6 }
 0x23d   :  { %6335 = vmatmul.mubr.msk.f32.vlgmr.msra.gmra.mrb[22].mxu0 %vm111_vm0, %v7860_v28  ;;  %6346 = vmatmul.mubr.msk.f32.vlgmr.msra.gmra.mrb[22].mxu1 %vm111_vm0, %v7860_v28 }
 0x23e   :  { %6880 = vmatpush3.bf16.msra.mxu0 %v7493_v3  ;;  %6886 = vmatpush3.bf16.msra.mxu1 %v7495_v4 }
 0x23f   :  { %6881 = vmatprep.subr.bf16.mxu0 %v7297_v6  ;;  %6887 = vmatprep.subr.bf16.mxu1 %v7297_v6 }
 0x240   :  { %6356 = vmatprep.mubr.msk.f32.mxu0 %vm7298_vm3, %v7299_v18  ;;  %6367 = vmatprep.mubr.msk.f32.mxu1 %vm7298_vm3, %v7299_v18 }
 0x242   :  { %6883 = vmatpush3.bf16.msra.mxu0 %v7516_v10  ;;  %6889 = vmatpush3.bf16.msra.mxu1 %v7518_v12 }
 0x243   :  { %6890 = vmatprep.subr.bf16.mxu0 %v7297_v6  ;;  %6896 = vmatprep.subr.bf16.mxu1 %v7297_v6 }
 0x300   :  { %v2099_v30 = vpop.f32.mrb[18].mxu0  ;;  %v2176_v31 = vpop.f32.mrb[18].mxu1 }
 0x301   :  { %v2103_v34 = vadd.f32 %v2099_v30, %v2025_v1  ;;  %v6292_v35 = vpop.f32.mrb[19].mxu0  ;;  %v6303_v37 = vpop.f32.mrb[19].mxu1  ;;  %v2180_v43 = vadd.f32 %v2176_v31, %v2027_v40 }
 0x303   :  { %v5709_v38 = vmul.f32 -1.442695, %v2103_v34  ;;  %v5711_v44 = vmul.f32 -1.442695, %v2180_v43 }
 0x305   :  { %7135 = vpow2.f32 %v5709_v38  ;;  %v7900_v38 = vpop.permute.xlu0 %2267 }
 0x306   :  { %7137 = vpow2.f32 %v5711_v44  ;;  %vm2269_vm15 = vcmp.eq.s32.totalorder %v7900_v38, 1 }
 0x308   :  { %v2253_v45 = vpop.f32.mrb[20].mxu0  ;;  %v2349_v47 = vpop.f32.mrb[20].mxu1 }
 0x309   :  { %v6314_v48 = vpop.f32.mrb[21].mxu0  ;;  %v2353_v49 = vadd.f32 %v2349_v47, %v2275_v46  ;;  %v6325_v50 = vpop.f32.mrb[21].mxu1  ;;  %v2254_v8 = vadd.f32 %v7748_v32, %v2253_v45 }
 0x30b   :  { %v5714_v51 = vmul.f32 -1.442695, %v2353_v49  ;;  %v7924_v49 = vpop.permute.xlu1 %2517 }
 0x30c   :  { %vm2519_vm1 = vcmp.eq.s32.totalorder %v7924_v49, 1 }
 0x30d   :  { %7139 = vpow2.f32 %v5714_v51 }
 0x30f   :  { %v7136_v11 = vpop.eup %7135 }
 0x310   :  { %v2107_v52 = vadd.f32 1.0, %v7136_v11  ;;  %v2426_v55 = vpop.f32.mrb[22].mxu0  ;;  %v2503_v56 = vpop.f32.mrb[22].mxu1 }
 0x311   :  { %v2430_v57 = vadd.f32 %v2426_v55, %v2277_v54  ;;  %v6336_v59 = vpop.f32.mrb[23].mxu0  ;;  %v6347_v60 = vpop.f32.mrb[23].mxu1  ;;  %v2504_v58 = vadd.f32 %v7754_v42, %v2503_v56 }
 0x312   :  { %7141 = vrcp.f32 %v2107_v52  ;;  %v7138_v62 = vpop.eup %7137  ;;  %v2527_v60 = vld [vmem:[#allocation3 + $0x6] sm:$0x3] }
 0x313   :  { %v5716_v61 = vmul.f32 -1.442695, %v2430_v57  ;;  %v2184_v5 = vadd.f32 1.0, %v7138_v62 }
 0x315   :  { %7143 = vpow2.f32 %v5716_v61 }
 0x317   :  { %v7140_v0 = vpop.eup %7139 }
 0x318   :  { %v2357_v2 = vadd.f32 1.0, %v7140_v0 }
 0x31a   :  { %7145 = vrcp.f32 %v2357_v2  ;;  %v2775_v2 = vld [vmem:[#allocation5 + $0x8] sm:$0x3] }
 0x31b   :  { %7147 = vrcp.f32 %v2184_v5 }
 0x31c   :  { %v7142_v9 = vpop.eup %7141 }
 0x31d   :  { %v2257_v13 = vmul.f32 %v7142_v9, %v2254_v8 }
 0x31f   :  { %v7144_v16 = vpop.eup %7143  ;;  %v2258_v17 = vadd.f32 %v2257_v13, %v2029_v14 }
 0x320   :  { %v2434_v21 = vadd.f32 1.0, %v7144_v16 }
 0x321   :  { %7149 = vtanh.f32 %v2258_v17 }
 0x322   :  { %7151 = vrcp.f32 %v2434_v21  ;;  %v2777_v21 = vld [vmem:[#allocation6 + $0x8] sm:$0x3] }
 0x324   :  { %v7146_v22 = vpop.eup %7145 }
 0x325   :  { %v2507_v25 = vmul.f32 %v7146_v22, %v2504_v58  ;;  %v7148_v1 = vpop.eup %7147 }
 0x326   :  { %v2260_v31 = vsub.f32 1.0, %v7148_v1  ;;  %v2262_v37 = vmul.f32 %v7148_v1, %v7832_v15 }
 0x327   :  { %v2508_v30 = vadd.f32 %v2507_v25, %v2279_v29 }
 0x329   :  { %7153 = vtanh.f32 %v2508_v30 }
 0x32b   :  { %v7150_v34 = vpop.eup %7149 }
 0x32c   :  { %v2261_v35 = vmul.f32 %v7150_v34, %v2260_v31  ;;  %v7152_v43 = vpop.eup %7151 }
 0x32d   :  { %v2510_v46 = vsub.f32 1.0, %v7152_v43  ;;  %v2512_v48 = vmul.f32 %v7152_v43, %v7860_v28 }
 0x32e   :  { %v2263_v40 = vadd.f32 %v2262_v37, %v2261_v35 }
 0x330   :  { %v7906_v44 = vsel %vm2269_vm15, %v2263_v40, %v7832_v15  ;;  %v2271_v45 = vsel %vm2269_vm15, %v2263_v40, 0.0 }
 0x331   :  { %2273 = vst.msk [vmem:[#allocation8 + $0x4] sm:$0x3] %vm235_vm10, %v2271_v45  ;;  %6357 = vmatmul.mubr.msk.f32.vlgmr.msra.gmra.mrb[24].mxu0 %vm111_vm0, %v7906_v44  ;;  %6368 = vmatmul.mubr.msk.f32.vlgmr.msra.gmra.mrb[24].mxu1 %vm111_vm0, %v7906_v44 }
 0x332   :  { %6892 = vmatpush3.bf16.msra.mxu0 %v7541_v19  ;;  %6898 = vmatpush3.bf16.msra.mxu1 %v7543_v20 }
 0x333   :  { %v7154_v47 = vpop.eup %7153  ;;  %6893 = vmatprep.subr.bf16.mxu0 %v7297_v6  ;;  %6899 = vmatprep.subr.bf16.mxu1 %v7297_v6 }
 0x334   :  { %6378 = vmatprep.mubr.msk.f32.mxu0 %vm7298_vm3, %v7299_v18  ;;  %6389 = vmatprep.mubr.msk.f32.mxu1 %vm7298_vm3, %v7299_v18  ;;  %v2511_v15 = vmul.f32 %v7154_v47, %v2510_v46  ;;  %v2529_v46 = vld [vmem:[#allocation4 + $0x6] sm:$0x3] }
 0x336   :  { %6895 = vmatpush3.bf16.msra.mxu0 %v7564_v26  ;;  %6901 = vmatpush3.bf16.msra.mxu1 %v7566_v27  ;;  %v2513_v50 = vadd.f32 %v2512_v48, %v2511_v15 }
 0x337   :  { %6902 = vmatprep.subr.bf16.mxu0 %v7297_v6  ;;  %6908 = vmatprep.subr.bf16.mxu1 %v7297_v6 }
 0x338   :  { %v7934_v51 = vsel %vm2519_vm1, %v2513_v50, %v7860_v28  ;;  %v2521_v11 = vsel %vm2519_vm1, %v2513_v50, 0.0  ;;  %v2525_v28 = vld [vmem:[#allocation2 + $0x6] sm:$0x3]  ;;  %v8295_v53 = vld [vmem:[#allocation8 + $0x4] sm:$0x3] }
 0x339   :  { %6379 = vmatmul.mubr.msk.f32.vlgmr.msra.gmra.mrb[26].mxu0 %vm111_vm0, %v7906_v44  ;;  %2523 = vst.msk [vmem:[#allocation9 + $0xa] sm:$0x3] %vm235_vm10, %v2521_v11  ;;  %6390 = vmatmul.mubr.msk.f32.vlgmr.msra.gmra.mrb[26].mxu1 %vm111_vm0, %v7934_v51 }
 0x33a   :  { %6904 = vmatpush3.bf16.msra.mxu0 %v7589_v33  ;;  %6910 = vmatpush3.bf16.msra.mxu1 %v7599_v36 }
 0x33b   :  { %6905 = vmatprep.subr.bf16.mxu0 %v7297_v6  ;;  %6911 = vmatprep.subr.bf16.mxu1 %v7297_v6 }
 0x33c   :  { %6400 = vmatprep.mubr.msk.f32.mxu0 %vm7298_vm3, %v7299_v18  ;;  %6411 = vmatprep.mubr.msk.f32.mxu1 %vm7298_vm3, %v7299_v18 }
 0x33e   :  { %6907 = vmatpush3.bf16.msra.mxu0 %v7611_v39  ;;  %6913 = vmatpush3.bf16.msra.mxu1 %v7618_v41 }
 0x33f   :  { %6914 = vmatprep.subr.bf16.mxu0 %v7297_v6  ;;  %6920 = vmatprep.subr.bf16.mxu1 %v7297_v6 }
 0x340   :  { %v8285_v63 = vld [vmem:[#allocation9 + $0xa] sm:$0x3] }
 0x341   :  { %6401 = vmatmul.mubr.msk.f32.vlgmr.msra.gmra.mrb[28].mxu0 %vm111_vm0, %v7934_v51  ;;  %6412 = vmatmul.mubr.msk.f32.vlgmr.msra.gmra.mrb[28].mxu1 %vm111_vm0, %v7934_v51 }
 0x342   :  { %6916 = vmatpush3.bf16.msra.mxu0 %v7493_v3  ;;  %6922 = vmatpush3.bf16.msra.mxu1 %v7495_v4 }
 0x343   :  { %6917 = vmatprep.subr.bf16.mxu0 %v7297_v6  ;;  %6923 = vmatprep.subr.bf16.mxu1 %v7297_v6 }
 0x344   :  { %6422 = vmatprep.mubr.msk.f32.mxu0 %vm7298_vm3, %v7299_v18  ;;  %6433 = vmatprep.mubr.msk.f32.mxu1 %vm7298_vm3, %v7299_v18 }
 0x346   :  { %6919 = vmatpush3.bf16.msra.mxu0 %v7516_v10  ;;  %6925 = vmatpush3.bf16.msra.mxu1 %v7518_v12 }
 0x347   :  { %6926 = vmatprep.subr.bf16.mxu0 %v7297_v6  ;;  %6932 = vmatprep.subr.bf16.mxu1 %v7297_v6 }
 0x404   :  { %v2599_v52 = vpop.f32.mrb[24].mxu0  ;;  %v2676_v54 = vpop.f32.mrb[24].mxu1 }
 0x405   :  { %v2603_v55 = vadd.f32 %v2599_v52, %v2525_v28  ;;  %v6358_v56 = vpop.f32.mrb[25].mxu0  ;;  %v6369_v57 = vpop.f32.mrb[25].mxu1  ;;  %v2680_v61 = vadd.f32 %v2676_v54, %v2527_v60  ;;  %v2779_v52 = vld [vmem:[#allocation7 + $0x8] sm:$0x3] }
 0x407   :  { %v5719_v59 = vmul.f32 -1.442695, %v2603_v55  ;;  %v5721_v62 = vmul.f32 -1.442695, %v2680_v61 }
 0x409   :  { %7155 = vpow2.f32 %v5719_v59  ;;  %v7973_v59 = vpop.permute.xlu0 %2767 }
 0x40a   :  { %7157 = vpow2.f32 %v5721_v62  ;;  %vm2769_vm2 = vcmp.eq.s32.totalorder %v7973_v59, 1  ;;  %v3513_v59 = vld [vmem:[#allocation2 + $0xa] sm:$0x3] }
 0x40c   :  { %v2753_v0 = vpop.f32.mrb[26].mxu0  ;;  %v2849_v5 = vpop.f32.mrb[26].mxu1 }
 0x40d   :  { %v6380_v8 = vpop.f32.mrb[27].mxu0  ;;  %v2853_v9 = vadd.f32 %v2849_v5, %v2775_v2  ;;  %v6391_v13 = vpop.f32.mrb[27].mxu1  ;;  %v2754_v40 = vadd.f32 %v7748_v32, %v2753_v0 }
 0x40f   :  { %v5724_v14 = vmul.f32 -1.442695, %v2853_v9 }
 0x411   :  { %7159 = vpow2.f32 %v5724_v14 }
 0x413   :  { %v7156_v16 = vpop.eup %7155 }
 0x414   :  { %v2607_v17 = vadd.f32 1.0, %v7156_v16  ;;  %v2926_v58 = vpop.f32.mrb[28].mxu0  ;;  %v3003_v22 = vpop.f32.mrb[28].mxu1 }
 0x415   :  { %v2930_v25 = vadd.f32 %v2926_v58, %v2777_v21  ;;  %v6402_v29 = vpop.f32.mrb[29].mxu0  ;;  %v6413_v1 = vpop.f32.mrb[29].mxu1  ;;  %v3004_v50 = vadd.f32 %v7754_v42, %v3003_v22 }
 0x416   :  { %7161 = vrcp.f32 %v2607_v17  ;;  %v7158_v31 = vpop.eup %7157 }
 0x417   :  { %v5726_v30 = vmul.f32 -1.442695, %v2930_v25  ;;  %v2684_v37 = vadd.f32 1.0, %v7158_v31  ;;  %v3027_v31 = vld [vmem:[#allocation3 + $0x8] sm:$0x3] }
 0x419   :  { %7163 = vpow2.f32 %v5726_v30 }
 0x41b   :  { %v7160_v34 = vpop.eup %7159 }
 0x41c   :  { %v2857_v35 = vadd.f32 1.0, %v7160_v34 }
 0x41e   :  { %7165 = vrcp.f32 %v2857_v35 }
 0x41f   :  { %7167 = vrcp.f32 %v2684_v37 }
 0x420   :  { %v7162_v43 = vpop.eup %7161 }
 0x421   :  { %v2757_v45 = vmul.f32 %v7162_v43, %v2754_v40  ;;  %v3269_v40 = vld [vmem:[#allocation5 + $0x6] sm:$0x3] }
 0x423   :  { %v7164_v47 = vpop.eup %7163  ;;  %v2758_v15 = vadd.f32 %v2757_v45, %v2529_v46 }
 0x424   :  { %v2934_v48 = vadd.f32 1.0, %v7164_v47 }
 0x425   :  { %7169 = vtanh.f32 %v2758_v15 }
 0x426   :  { %7171 = vrcp.f32 %v2934_v48 }
 0x428   :  { %v7166_v11 = vpop.eup %7165 }
 0x429   :  { %v3007_v28 = vmul.f32 %v7166_v11, %v3004_v50  ;;  %v7168_v54 = vpop.eup %7167  ;;  %v3271_v11 = vld [vmem:[#allocation6 + $0x6] sm:$0x3] }
 0x42a   :  { %v2760_v56 = vsub.f32 1.0, %v7168_v54  ;;  %v2762_v61 = vmul.f32 %v7168_v54, %v7906_v44 }
 0x42b   :  { %v3008_v55 = vadd.f32 %v3007_v28, %v2779_v52 }
 0x42d   :  { %7173 = vtanh.f32 %v3008_v55 }
 0x42f   :  { %v7170_v57 = vpop.eup %7169 }
 0x430   :  { %v2761_v60 = vmul.f32 %v7170_v57, %v2760_v56  ;;  %v7172_v0 = vpop.eup %7171 }
 0x431   :  { %v3010_v8 = vsub.f32 1.0, %v7172_v0  ;;  %v3012_v14 = vmul.f32 %v7172_v0, %v7934_v51 }
 0x432   :  { %v2763_v62 = vadd.f32 %v2762_v61, %v2761_v60 }
 0x434   :  { %v7980_v2 = vsel %vm2769_vm2, %v2763_v62, %v7906_v44  ;;  %v2771_v5 = vsel %vm2769_vm2, %v2763_v62, 0.0  ;;  %v7993_v44 = vpop.permute.xlu1 %3017 }
 0x435   :  { %2773 = vst.msk [vmem:[#allocation8 + $0x6] sm:$0x3] %vm235_vm10, %v2771_v5  ;;  %6423 = vmatmul.mubr.msk.f32.vlgmr.msra.gmra.mrb[30].mxu0 %vm111_vm0, %v7980_v2  ;;  %6434 = vmatmul.mubr.msk.f32.vlgmr.msra.gmra.mrb[30].mxu1 %vm111_vm0, %v7980_v2  ;;  %vm3019_vm4 = vcmp.eq.s32.totalorder %v7993_v44, 1 }
 0x436   :  { %6928 = vmatpush3.bf16.msra.mxu0 %v7541_v19  ;;  %6934 = vmatpush3.bf16.msra.mxu1 %v7543_v20 }
 0x437   :  { %v7174_v9 = vpop.eup %7173  ;;  %6929 = vmatprep.subr.bf16.mxu0 %v7297_v6  ;;  %6935 = vmatprep.subr.bf16.mxu1 %v7297_v6 }
 0x438   :  { %6444 = vmatprep.mubr.msk.f32.mxu0 %vm7298_vm3, %v7299_v18  ;;  %6455 = vmatprep.mubr.msk.f32.mxu1 %vm7298_vm3, %v7299_v18  ;;  %v3011_v13 = vmul.f32 %v7174_v9, %v3010_v8 }
 0x43a   :  { %6931 = vmatpush3.bf16.msra.mxu0 %v7564_v26  ;;  %6937 = vmatpush3.bf16.msra.mxu1 %v7566_v27  ;;  %v3013_v16 = vadd.f32 %v3012_v14, %v3011_v13  ;;  %v3029_v13 = vld [vmem:[#allocation4 + $0x8] sm:$0x3] }
 0x43b   :  { %6938 = vmatprep.subr.bf16.mxu0 %v7297_v6  ;;  %6944 = vmatprep.subr.bf16.mxu1 %v7297_v6 }
 0x43c   :  { %v8008_v17 = vsel %vm3019_vm4, %v3013_v16, %v7934_v51  ;;  %v3021_v21 = vsel %vm3019_vm4, %v3013_v16, 0.0  ;;  %v3025_v51 = vld [vmem:[#allocation2 + $0x8] sm:$0x3] }
 0x43d   :  { %6445 = vmatmul.mubr.msk.f32.vlgmr.msra.gmra.mrb[32].mxu0 %vm111_vm0, %v7980_v2  ;;  %3023 = vst.msk [vmem:[#allocation9 + $0x8] sm:$0x3] %vm235_vm10, %v3021_v21  ;;  %6456 = vmatmul.mubr.msk.f32.vlgmr.msra.gmra.mrb[32].mxu1 %vm111_vm0, %v8008_v17 }
 0x43e   :  { %6940 = vmatpush3.bf16.msra.mxu0 %v7589_v33  ;;  %6946 = vmatpush3.bf16.msra.mxu1 %v7599_v36 }
 0x43f   :  { %6941 = vmatprep.subr.bf16.mxu0 %v7297_v6  ;;  %6947 = vmatprep.subr.bf16.mxu1 %v7297_v6 }
 0x440   :  { %6466 = vmatprep.mubr.msk.f32.mxu0 %vm7298_vm3, %v7299_v18  ;;  %6477 = vmatprep.mubr.msk.f32.mxu1 %vm7298_vm3, %v7299_v18 }
 0x442   :  { %6943 = vmatpush3.bf16.msra.mxu0 %v7611_v39  ;;  %6949 = vmatpush3.bf16.msra.mxu1 %v7618_v41 }
 0x443   :  { %6950 = vmatprep.subr.bf16.mxu0 %v7297_v6  ;;  %6956 = vmatprep.subr.bf16.mxu1 %v7297_v6 }
 0x445   :  { %6467 = vmatmul.mubr.msk.f32.vlgmr.msra.gmra.mrb[34].mxu0 %vm111_vm0, %v8008_v17  ;;  %6478 = vmatmul.mubr.msk.f32.vlgmr.msra.gmra.mrb[34].mxu1 %vm111_vm0, %v8008_v17 }
 0x446   :  { %6952 = vmatpush3.bf16.msra.mxu0 %v7493_v3  ;;  %6958 = vmatpush3.bf16.msra.mxu1 %v7495_v4 }
 0x447   :  { %6953 = vmatprep.subr.bf16.mxu0 %v7297_v6  ;;  %6959 = vmatprep.subr.bf16.mxu1 %v7297_v6 }
 0x448   :  { %6488 = vmatprep.mubr.msk.f32.mxu0 %vm7298_vm3, %v7299_v18  ;;  %6499 = vmatprep.mubr.msk.f32.mxu1 %vm7298_vm3, %v7299_v18 }
 0x44a   :  { %6955 = vmatpush3.bf16.msra.mxu0 %v7516_v10  ;;  %6961 = vmatpush3.bf16.msra.mxu1 %v7518_v12 }
 0x44b   :  { %6962 = vmatprep.subr.bf16.mxu0 %v7297_v6  ;;  %6968 = vmatprep.subr.bf16.mxu1 %v7297_v6 }
 0x508   :  { %v3099_v58 = vpop.f32.mrb[30].mxu0  ;;  %v3176_v22 = vpop.f32.mrb[30].mxu1 }
 0x509   :  { %v3103_v25 = vadd.f32 %v3099_v58, %v3025_v51  ;;  %v6424_v29 = vpop.f32.mrb[31].mxu0  ;;  %v6435_v1 = vpop.f32.mrb[31].mxu1  ;;  %v3180_v34 = vadd.f32 %v3176_v22, %v3027_v31 }
 0x50b   :  { %v5729_v30 = vmul.f32 -1.442695, %v3103_v25  ;;  %v5731_v35 = vmul.f32 -1.442695, %v3180_v34  ;;  %v3273_v25 = vld [vmem:[#allocation7 + $0x6] sm:$0x3] }
 0x50d   :  { %7175 = vpow2.f32 %v5729_v30 }
 0x50e   :  { %7177 = vpow2.f32 %v5731_v35 }
 0x510   :  { %v3253_v37 = vpop.f32.mrb[32].mxu0  ;;  %v3343_v43 = vpop.f32.mrb[32].mxu1 }
 0x511   :  { %v6446_v45 = vpop.f32.mrb[33].mxu0  ;;  %v3347_v46 = vadd.f32 %v3343_v43, %v3269_v40  ;;  %v6457_v47 = vpop.f32.mrb[33].mxu1  ;;  %v3254_v5 = vadd.f32 %v7748_v32, %v3253_v37 }
 0x513   :  { %v5734_v15 = vmul.f32 -1.442695, %v3347_v46 }
 0x515   :  { %7179 = vpow2.f32 %v5734_v15 }
 0x517   :  { %v7176_v48 = vpop.eup %7175 }
 0x518   :  { %v3107_v50 = vadd.f32 1.0, %v7176_v48  ;;  %v3420_v28 = vpop.f32.mrb[34].mxu0  ;;  %v3497_v52 = vpop.f32.mrb[34].mxu1 }
 0x519   :  { %v3424_v54 = vadd.f32 %v3420_v28, %v3271_v11  ;;  %v6468_v55 = vpop.f32.mrb[35].mxu0  ;;  %v6479_v56 = vpop.f32.mrb[35].mxu1  ;;  %v3498_v51 = vadd.f32 %v7754_v42, %v3497_v52 }
 0x51a   :  { %7181 = vrcp.f32 %v3107_v50  ;;  %v7178_v60 = vpop.eup %7177 }
 0x51b   :  { %v5736_v57 = vmul.f32 -1.442695, %v3424_v54  ;;  %v3184_v0 = vadd.f32 1.0, %v7178_v60  ;;  %v3515_v54 = vld [vmem:[#allocation3 + $0xa] sm:$0x3] }
 0x51c   :  { %v3757_v60 = vld [vmem:[#allocation5 + $0x4] sm:$0x3] }
 0x51d   :  { %7183 = vpow2.f32 %v5736_v57 }
 0x51f   :  { %v7180_v61 = vpop.eup %7179 }
 0x520   :  { %v3351_v62 = vadd.f32 1.0, %v7180_v61 }
 0x522   :  { %7185 = vrcp.f32 %v3351_v62 }
 0x523   :  { %7187 = vrcp.f32 %v3184_v0 }
 0x524   :  { %v7182_v8 = vpop.eup %7181 }
 0x525   :  { %v3257_v9 = vmul.f32 %v7182_v8, %v3254_v5 }
 0x527   :  { %v7184_v14 = vpop.eup %7183  ;;  %v3258_v16 = vadd.f32 %v3257_v9, %v3029_v13 }
 0x528   :  { %v3428_v21 = vadd.f32 1.0, %v7184_v14  ;;  %v3759_v14 = vld [vmem:[#allocation6 + $0x4] sm:$0x3] }
 0x529   :  { %7189 = vtanh.f32 %v3258_v16 }
 0x52a   :  { %7191 = vrcp.f32 %v3428_v21 }
 0x52c   :  { %v7186_v58 = vpop.eup %7185 }
 0x52d   :  { %v3501_v22 = vmul.f32 %v7186_v58, %v3498_v51  ;;  %v7188_v29 = vpop.eup %7187 }
 0x52e   :  { %v3260_v30 = vsub.f32 1.0, %v7188_v29  ;;  %v3262_v34 = vmul.f32 %v7188_v29, %v7980_v2 }
 0x52f   :  { %v3502_v1 = vadd.f32 %v3501_v22, %v3273_v25 }
 0x531   :  { %7193 = vtanh.f32 %v3502_v1 }
 0x533   :  { %v7190_v31 = vpop.eup %7189 }
 0x534   :  { %v3261_v32 = vmul.f32 %v7190_v31, %v3260_v30  ;;  %v7192_v37 = vpop.eup %7191 }
 0x535   :  { %v3504_v43 = vsub.f32 1.0, %v7192_v37  ;;  %v3506_v44 = vmul.f32 %v7192_v37, %v8008_v17 }
 0x536   :  { %v3263_v35 = vadd.f32 %v3262_v34, %v3261_v32  ;;  %v8116_v32 = vld [vmem:[%s8454_s5] ss:$0 sm:$0xff] }
 0x538   :  { %v8051_v40 = vsel %vm3019_vm4, %v3263_v35, %v7980_v2  ;;  %v3265_v42 = vsel %vm3019_vm4, %v3263_v35, 0.0 }
 0x539   :  { %3267 = vst.msk [vmem:[#allocation8 + $0x8] sm:$0x3] %vm235_vm10, %v3265_v42  ;;  %6489 = vmatmul.mubr.msk.f32.vlgmr.msra.gmra.mrb[36].mxu0 %vm111_vm0, %v8051_v40  ;;  %6500 = vmatmul.mubr.msk.f32.vlgmr.msra.gmra.mrb[36].mxu1 %vm111_vm0, %v8051_v40  ;;  %v3517_v42 = vld [vmem:[#allocation4 + $0xa] sm:$0x3] }
 0x53a   :  { %6964 = vmatpush3.bf16.msra.mxu0 %v7541_v19  ;;  %6970 = vmatpush3.bf16.msra.mxu1 %v7543_v20 }
 0x53b   :  { %v7194_v45 = vpop.eup %7193  ;;  %6965 = vmatprep.subr.bf16.mxu0 %v7297_v6  ;;  %6971 = vmatprep.subr.bf16.mxu1 %v7297_v6 }
 0x53c   :  { %6510 = vmatprep.mubr.msk.f32.mxu0 %vm7298_vm3, %v7299_v18  ;;  %6521 = vmatprep.mubr.msk.f32.mxu1 %vm7298_vm3, %v7299_v18  ;;  %v3505_v2 = vmul.f32 %v7194_v45, %v3504_v43 }
 0x53e   :  { %6967 = vmatpush3.bf16.msra.mxu0 %v7564_v26  ;;  %6973 = vmatpush3.bf16.msra.mxu1 %v7566_v27  ;;  %v3507_v46 = vadd.f32 %v3506_v44, %v3505_v2  ;;  %v8122_v44 = vld [vmem:[%s8454_s5 + $0x1] ss:$0 sm:$0xff] }
 0x53f   :  { %6974 = vmatprep.subr.bf16.mxu0 %v7297_v6  ;;  %6980 = vmatprep.subr.bf16.mxu1 %v7297_v6 }
 0x540   :  { %v8076_v47 = vsel %vm2769_vm2, %v3507_v46, %v8008_v17  ;;  %v3509_v15 = vsel %vm2769_vm2, %v3507_v46, 0.0 }
 0x541   :  { %6511 = vmatmul.mubr.msk.f32.vlgmr.msra.gmra.mrb[38].mxu0 %vm111_vm0, %v8051_v40  ;;  %3511 = vst.msk [vmem:[#allocation9 + $0x6] sm:$0x3] %vm235_vm10, %v3509_v15  ;;  %6522 = vmatmul.mubr.msk.f32.vlgmr.msra.gmra.mrb[38].mxu1 %vm111_vm0, %v8076_v47 }
 0x542   :  { %6976 = vmatpush3.bf16.msra.mxu0 %v7589_v33  ;;  %6982 = vmatpush3.bf16.msra.mxu1 %v7599_v36 }
 0x543   :  { %6977 = vmatprep.subr.bf16.mxu0 %v7297_v6  ;;  %6983 = vmatprep.subr.bf16.mxu1 %v7297_v6 }
 0x544   :  { %6532 = vmatprep.mubr.msk.f32.mxu0 %vm7298_vm3, %v7299_v18  ;;  %6543 = vmatprep.mubr.msk.f32.mxu1 %vm7298_vm3, %v7299_v18 }
 0x546   :  { %6979 = vmatpush3.bf16.msra.mxu0 %v7611_v39  ;;  %6985 = vmatpush3.bf16.msra.mxu1 %v7618_v41 }
 0x547   :  { %6986 = vmatprep.subr.bf16.mxu0 %v7297_v6  ;;  %6992 = vmatprep.subr.bf16.mxu1 %v7297_v6 }
 0x549   :  { %6533 = vmatmul.mubr.msk.f32.vlgmr.msra.gmra.mrb[40].mxu0 %vm111_vm0, %v8076_v47  ;;  %6544 = vmatmul.mubr.msk.f32.vlgmr.msra.gmra.mrb[40].mxu1 %vm111_vm0, %v8076_v47 }
 0x54a   :  { %6988 = vmatpush3.bf16.msra.mxu0 %v7493_v3  ;;  %6994 = vmatpush3.bf16.msra.mxu1 %v7495_v4 }
 0x54b   :  { %6989 = vmatprep.subr.bf16.mxu0 %v7297_v6  ;;  %6995 = vmatprep.subr.bf16.mxu1 %v7297_v6 }
 0x54c   :  { %6554 = vmatprep.mubr.msk.f32.mxu0 %vm7298_vm3, %v7299_v18  ;;  %6565 = vmatprep.mubr.msk.f32.mxu1 %vm7298_vm3, %v7299_v18 }
 0x54e   :  { %6991 = vmatpush3.bf16.msra.mxu0 %v7516_v10  ;;  %6997 = vmatpush3.bf16.msra.mxu1 %v7518_v12 }
 0x54f   :  { %6998 = vmatprep.subr.bf16.mxu0 %v7297_v6  ;;  %7004 = vmatprep.subr.bf16.mxu1 %v7297_v6 }
 0x60c   :  { %v3587_v17 = vpop.f32.mrb[36].mxu0  ;;  %v3664_v48 = vpop.f32.mrb[36].mxu1 }
 0x60d   :  { %v3591_v50 = vadd.f32 %v3587_v17, %v3513_v59  ;;  %v6490_v11 = vpop.f32.mrb[37].mxu0  ;;  %v6501_v28 = vpop.f32.mrb[37].mxu1  ;;  %v3668_v55 = vadd.f32 %v3664_v48, %v3515_v54  ;;  %v3761_v17 = vld [vmem:[#allocation7 + $0x4] sm:$0x3] }
 0x60f   :  { %v5739_v52 = vmul.f32 -1.442695, %v3591_v50  ;;  %v5741_v56 = vmul.f32 -1.442695, %v3668_v55 }
 0x611   :  { %7195 = vpow2.f32 %v5739_v52 }
 0x612   :  { %7197 = vpow2.f32 %v5741_v56 }
 0x614   :  { %v3741_v57 = vpop.f32.mrb[38].mxu0  ;;  %v3831_v61 = vpop.f32.mrb[38].mxu1 }
 0x615   :  { %v6512_v62 = vpop.f32.mrb[39].mxu0  ;;  %v3835_v0 = vadd.f32 %v3831_v61, %v3757_v60  ;;  %v6523_v5 = vpop.f32.mrb[39].mxu1  ;;  %v3742_v34 = vadd.f32 %v8116_v32, %v3741_v57 }
 0x617   :  { %v5744_v8 = vmul.f32 -1.442695, %v3835_v0 }
 0x619   :  { %7199 = vpow2.f32 %v5744_v8 }
 0x61b   :  { %v7196_v9 = vpop.eup %7195 }
 0x61c   :  { %v3595_v13 = vadd.f32 1.0, %v7196_v9  ;;  %v3908_v16 = vpop.f32.mrb[40].mxu0  ;;  %v3985_v21 = vpop.f32.mrb[40].mxu1 }
 0x61d   :  { %v3912_v51 = vadd.f32 %v3908_v16, %v3759_v14  ;;  %v6534_v58 = vpop.f32.mrb[41].mxu0  ;;  %v6545_v22 = vpop.f32.mrb[41].mxu1  ;;  %v3986_v46 = vadd.f32 %v8122_v44, %v3985_v21  ;;  %v4003_v16 = vld [vmem:[#allocation3 + $0xc] sm:$0x3] }
 0x61e   :  { %7201 = vrcp.f32 %v3595_v13  ;;  %v7198_v29 = vpop.eup %7197  ;;  %v4245_v22 = vld [vmem:[#allocation5 + $0x2] sm:$0x3] }
 0x61f   :  { %v5746_v25 = vmul.f32 -1.442695, %v3912_v51  ;;  %v3672_v31 = vadd.f32 1.0, %v7198_v29 }
 0x621   :  { %7203 = vpow2.f32 %v5746_v25 }
 0x623   :  { %v7200_v1 = vpop.eup %7199 }
 0x624   :  { %v3839_v30 = vadd.f32 1.0, %v7200_v1 }
 0x626   :  { %7205 = vrcp.f32 %v3839_v30 }
 0x627   :  { %7207 = vrcp.f32 %v3672_v31 }
 0x628   :  { %v7202_v35 = vpop.eup %7201 }
 0x629   :  { %v3745_v37 = vmul.f32 %v7202_v35, %v3742_v34  ;;  %v4247_v34 = vld [vmem:[#allocation6 + $0x2] sm:$0x3] }
 0x62b   :  { %v7204_v43 = vpop.eup %7203  ;;  %v3746_v45 = vadd.f32 %v3745_v37, %v3517_v42 }
 0x62c   :  { %v3916_v2 = vadd.f32 1.0, %v7204_v43 }
 0x62d   :  { %7209 = vtanh.f32 %v3746_v45 }
 0x62e   :  { %7211 = vrcp.f32 %v3916_v2 }
 0x630   :  { %v7206_v15 = vpop.eup %7205 }
 0x631   :  { %v3989_v59 = vmul.f32 %v7206_v15, %v3986_v46  ;;  %v7208_v48 = vpop.eup %7207 }
 0x632   :  { %v3748_v11 = vsub.f32 1.0, %v7208_v48  ;;  %v3750_v54 = vmul.f32 %v7208_v48, %v8051_v40 }
 0x633   :  { %v3990_v50 = vadd.f32 %v3989_v59, %v3761_v17 }
 0x635   :  { %7213 = vtanh.f32 %v3990_v50 }
 0x637   :  { %v7210_v28 = vpop.eup %7209 }
 0x638   :  { %v3749_v52 = vmul.f32 %v7210_v28, %v3748_v11  ;;  %v7212_v56 = vpop.eup %7211  ;;  %v4005_v28 = vld [vmem:[#allocation4 + $0xc] sm:$0x3] }
 0x639   :  { %v3992_v61 = vsub.f32 1.0, %v7212_v56 }
 0x63a   :  { %v3751_v55 = vadd.f32 %v3750_v54, %v3749_v52 }
 0x63c   :  { %v8129_v57 = vsel %vm2519_vm1, %v3751_v55, %v8051_v40  ;;  %v3753_v60 = vsel %vm2519_vm1, %v3751_v55, 0.0  ;;  %v3994_v40 = vmul.f32 %v7212_v56, %v8076_v47 }
 0x63d   :  { %3755 = vst.msk [vmem:[#allocation8 + $0xa] sm:$0x3] %vm235_vm10, %v3753_v60  ;;  %6555 = vmatmul.mubr.msk.f32.vlgmr.msra.gmra.mrb[42].mxu0 %vm111_vm0, %v8129_v57  ;;  %6566 = vmatmul.mubr.msk.f32.vlgmr.msra.gmra.mrb[42].mxu1 %vm111_vm0, %v8129_v57 }
 0x63e   :  { %7000 = vmatpush3.bf16.msra.mxu0 %v7541_v19  ;;  %7006 = vmatpush3.bf16.msra.mxu1 %v7543_v20 }
 0x63f   :  { %v7214_v62 = vpop.eup %7213  ;;  %7001 = vmatprep.subr.bf16.mxu0 %v7297_v6  ;;  %7007 = vmatprep.subr.bf16.mxu1 %v7297_v6 }
 0x640   :  { %6576 = vmatprep.mubr.msk.f32.mxu0 %vm7298_vm3, %v7299_v18  ;;  %6587 = vmatprep.mubr.msk.f32.mxu1 %vm7298_vm3, %v7299_v18  ;;  %v3993_v49 = vmul.f32 %v7214_v62, %v3992_v61  ;;  %v4249_v62 = vld [vmem:[#allocation7 + $0x2] sm:$0x3] }
 0x642   :  { %7003 = vmatpush3.bf16.msra.mxu0 %v7564_v26  ;;  %7009 = vmatpush3.bf16.msra.mxu1 %v7566_v27  ;;  %v3995_v0 = vadd.f32 %v3994_v40, %v3993_v49 }
 0x643   :  { %7010 = vmatprep.subr.bf16.mxu0 %v7297_v6  ;;  %7016 = vmatprep.subr.bf16.mxu1 %v7297_v6 }
 0x644   :  { %v8154_v5 = vsel %vm2269_vm15, %v3995_v0, %v8076_v47  ;;  %v3997_v8 = vsel %vm2269_vm15, %v3995_v0, 0.0 }
 0x645   :  { %6577 = vmatmul.mubr.msk.f32.vlgmr.msra.gmra.mrb[44].mxu0 %vm111_vm0, %v8129_v57  ;;  %3999 = vst.msk [vmem:[#allocation9 + $0x4] sm:$0x3] %vm235_vm10, %v3997_v8  ;;  %6588 = vmatmul.mubr.msk.f32.vlgmr.msra.gmra.mrb[44].mxu1 %vm111_vm0, %v8154_v5 }
 0x646   :  { %7012 = vmatpush3.bf16.msra.mxu0 %v7589_v33  ;;  %7018 = vmatpush3.bf16.msra.mxu1 %v7599_v36 }
 0x647   :  { %7013 = vmatprep.subr.bf16.mxu0 %v7297_v6  ;;  %7019 = vmatprep.subr.bf16.mxu1 %v7297_v6 }
 0x648   :  { %6598 = vmatprep.mubr.msk.f32.mxu0 %vm7298_vm3, %v7299_v18  ;;  %6609 = vmatprep.mubr.msk.f32.mxu1 %vm7298_vm3, %v7299_v18 }
 0x64a   :  { %7015 = vmatpush3.bf16.msra.mxu0 %v7611_v39  ;;  %7021 = vmatpush3.bf16.msra.mxu1 %v7618_v41 }
 0x64b   :  { %7022 = vmatprep.subr.bf16.mxu0 %v7297_v6  ;;  %7028 = vmatprep.subr.bf16.mxu1 %v7297_v6 }
 0x64d   :  { %6599 = vmatmul.mubr.msk.f32.vlgmr.msra.gmra.mrb[46].mxu0 %vm111_vm0, %v8154_v5  ;;  %6610 = vmatmul.mubr.msk.f32.vlgmr.msra.gmra.mrb[46].mxu1 %vm111_vm0, %v8154_v5 }
 0x64e   :  { %7024 = vmatpush3.bf16.msra.mxu0 %v7493_v3  ;;  %7030 = vmatpush3.bf16.msra.mxu1 %v7495_v4  ;;  %v4001_v3 = vld [vmem:[#allocation2 + $0xc] sm:$0x3] }
 0x64f   :  { %7025 = vmatprep.subr.bf16.mxu0 %v7297_v6  ;;  %7031 = vmatprep.subr.bf16.mxu1 %v7297_v6 }
 0x650   :  { %6620 = vmatprep.mubr.msk.f32.mxu0 %vm7298_vm3, %v7299_v18  ;;  %6631 = vmatprep.mubr.msk.f32.mxu1 %vm7298_vm3, %v7299_v18 }
 0x652   :  { %7027 = vmatpush3.bf16.msra.mxu0 %v7516_v10  ;;  %7033 = vmatpush3.bf16.msra.mxu1 %v7518_v12 }
 0x653   :  { %7034 = vmatprep.subr.bf16.mxu0 %v7297_v6  ;;  %7040 = vmatprep.subr.bf16.mxu1 %v7297_v6 }
 0x710   :  { %v4075_v4 = vpop.f32.mrb[42].mxu0  ;;  %v4152_v38 = vpop.f32.mrb[42].mxu1 }
 0x711   :  { %v4079_v47 = vadd.f32 %v4075_v4, %v4001_v3  ;;  %v6556_v9 = vpop.f32.mrb[43].mxu0  ;;  %v6567_v13 = vpop.f32.mrb[43].mxu1  ;;  %v4156_v21 = vadd.f32 %v4152_v38, %v4003_v16 }
 0x713   :  { %v5749_v14 = vmul.f32 -1.442695, %v4079_v47  ;;  %v5751_v51 = vmul.f32 -1.442695, %v4156_v21 }
 0x715   :  { %7215 = vpow2.f32 %v5749_v14 }
 0x716   :  { %7217 = vpow2.f32 %v5751_v51 }
 0x718   :  { %v4229_v58 = vpop.f32.mrb[44].mxu0  ;;  %v4319_v10 = vpop.f32.mrb[44].mxu1 }
 0x719   :  { %v6578_v25 = vpop.f32.mrb[45].mxu0  ;;  %v4323_v12 = vadd.f32 %v4319_v10, %v4245_v22  ;;  %v6589_v29 = vpop.f32.mrb[45].mxu1  ;;  %v4230_v48 = vadd.f32 %v8116_v32, %v4229_v58  ;;  %v4489_v58 = vld [vmem:[#allocation2 + $0xe] sm:$0x3] }
 0x71b   :  { %v5754_v1 = vmul.f32 -1.442695, %v4323_v12 }
 0x71d   :  { %7219 = vpow2.f32 %v5754_v1 }
 0x71f   :  { %v7216_v30 = vpop.eup %7215 }
 0x720   :  { %v4083_v31 = vadd.f32 1.0, %v7216_v30  ;;  %v4396_v35 = vpop.f32.mrb[46].mxu0  ;;  %v4473_v37 = vpop.f32.mrb[46].mxu1  ;;  %v4491_v30 = vld [vmem:[#allocation3 + $0xe] sm:$0x3] }
 0x721   :  { %v4400_v42 = vadd.f32 %v4396_v35, %v4247_v34  ;;  %v6600_v43 = vpop.f32.mrb[47].mxu0  ;;  %v6611_v45 = vpop.f32.mrb[47].mxu1  ;;  %v4474_v56 = vadd.f32 %v8122_v44, %v4473_v37  ;;  %v4731_v37 = vld [vmem:[#allocation5] sm:$0x3] }
 0x722   :  { %7221 = vrcp.f32 %v4083_v31  ;;  %v7218_v46 = vpop.eup %7217 }
 0x723   :  { %v5756_v2 = vmul.f32 -1.442695, %v4400_v42  ;;  %v4160_v17 = vadd.f32 1.0, %v7218_v46 }
 0x725   :  { %7223 = vpow2.f32 %v5756_v2 }
 0x727   :  { %v7220_v15 = vpop.eup %7219 }
 0x728   :  { %v4327_v59 = vadd.f32 1.0, %v7220_v15 }
 0x72a   :  { %7225 = vrcp.f32 %v4327_v59 }
 0x72b   :  { %7227 = vrcp.f32 %v4160_v17  ;;  %v4732_v17 = vld [vmem:[#allocation6] sm:$0x3] }
 0x72c   :  { %v7222_v50 = vpop.eup %7221 }
 0x72d   :  { %v4233_v11 = vmul.f32 %v7222_v50, %v4230_v48 }
 0x72f   :  { %v7224_v52 = vpop.eup %7223  ;;  %v4234_v54 = vadd.f32 %v4233_v11, %v4005_v28 }
 0x730   :  { %v4404_v55 = vadd.f32 1.0, %v7224_v52 }
 0x731   :  { %7229 = vtanh.f32 %v4234_v54 }
 0x732   :  { %7231 = vrcp.f32 %v4404_v55 }
 0x734   :  { %v7226_v60 = vpop.eup %7225 }
 0x735   :  { %v4477_v61 = vmul.f32 %v7226_v60, %v4474_v56  ;;  %v7228_v49 = vpop.eup %7227 }
 0x736   :  { %v4236_v0 = vsub.f32 1.0, %v7228_v49  ;;  %v4238_v4 = vmul.f32 %v7228_v49, %v8129_v57 }
 0x737   :  { %v4478_v40 = vadd.f32 %v4477_v61, %v4249_v62 }
 0x739   :  { %7233 = vtanh.f32 %v4478_v40 }
 0x73b   :  { %v7230_v8 = vpop.eup %7229 }
 0x73c   :  { %v4237_v3 = vmul.f32 %v7230_v8, %v4236_v0  ;;  %v7232_v47 = vpop.eup %7231  ;;  %v4493_v0 = vld [vmem:[#allocation4 + $0xe] sm:$0x3] }
 0x73d   :  { %v4480_v14 = vsub.f32 1.0, %v7232_v47 }
 0x73e   :  { %v4239_v38 = vadd.f32 %v4238_v4, %v4237_v3 }
 0x740   :  { %v8197_v9 = vsel %vm2019_vm14, %v4239_v38, %v8129_v57  ;;  %v4241_v13 = vsel %vm2019_vm14, %v4239_v38, 0.0  ;;  %v4482_v57 = vmul.f32 %v7232_v47, %v8154_v5 }
 0x741   :  { %4243 = vst.msk [vmem:[#allocation8 + $0xc] sm:$0x3] %vm235_vm10, %v4241_v13  ;;  %6621 = vmatmul.mubr.msk.f32.vlgmr.msra.gmra.mrb[48].mxu0 %vm111_vm0, %v8197_v9  ;;  %6632 = vmatmul.mubr.msk.f32.vlgmr.msra.gmra.mrb[48].mxu1 %vm111_vm0, %v8197_v9 }
 0x742   :  { %7036 = vmatpush3.bf16.msra.mxu0 %v7541_v19  ;;  %7042 = vmatpush3.bf16.msra.mxu1 %v7543_v20 }
 0x743   :  { %v7234_v16 = vpop.eup %7233  ;;  %7037 = vmatprep.subr.bf16.mxu0 %v7297_v6  ;;  %7043 = vmatprep.subr.bf16.mxu1 %v7297_v6 }
 0x744   :  { %6642 = vmatprep.mubr.msk.f32.mxu0 %vm7298_vm3, %v7299_v18  ;;  %6653 = vmatprep.mubr.msk.f32.mxu1 %vm7298_vm3, %v7299_v18  ;;  %v4481_v23 = vmul.f32 %v7234_v16, %v4480_v14  ;;  %v4733_v14 = vld [vmem:[#allocation7] sm:$0x3] }
 0x746   :  { %7039 = vmatpush3.bf16.msra.mxu0 %v7564_v26  ;;  %7045 = vmatpush3.bf16.msra.mxu1 %v7566_v27  ;;  %v4483_v19 = vadd.f32 %v4482_v57, %v4481_v23  ;;  %v5768_v26 = vld [vmem:[%s8455_s6 + $0x20] sm:$0xff]  ;;  %v5769_v27 = vld [vmem:[%s8455_s6 + $0x28] sm:$0xff] }
 0x747   :  { %7046 = vmatprep.subr.bf16.mxu0 %v7297_v6  ;;  %7052 = vmatprep.subr.bf16.mxu1 %v7297_v6 }
 0x748   :  { %v8222_v20 = vsel %vm1769_vm13, %v4483_v19, %v8154_v5  ;;  %v4485_v21 = vsel %vm1769_vm13, %v4483_v19, 0.0  ;;  %v4987_v5 = vld [vmem:[%s8455_s6 + $0x8] sm:$0xff] }
 0x749   :  { %6643 = vmatmul.mubr.msk.f32.vlgmr.msra.gmra.mrb[50].mxu0 %vm111_vm0, %v8197_v9  ;;  %4487 = vst.msk [vmem:[#allocation9 + $0x2] sm:$0x3] %vm235_vm10, %v4485_v21  ;;  %6654 = vmatmul.mubr.msk.f32.vlgmr.msra.gmra.mrb[50].mxu1 %vm111_vm0, %v8222_v20  ;;  %v8266_v51 = vpack.c.bf16 %v4987_v5, %v4986_v7 }
 0x74a   :  { %7048 = vmatpush3.bf16.msra.mxu0 %v7589_v33  ;;  %7054 = vmatpush3.bf16.msra.mxu1 %v7599_v36  ;;  %v5770_v33 = vld [vmem:[%s8455_s6 + $0x30] sm:$0xff]  ;;  %v7058_v36 = vpack.c.bf16 %v5769_v27, %v5768_v26 }
 0x74b   :  { %7049 = vmatprep.subr.bf16.mxu0 %v7297_v6  ;;  %7055 = vmatprep.subr.bf16.mxu1 %v7297_v6 }
 0x74c   :  { %6664 = vmatprep.mubr.msk.f32.mxu0 %vm7298_vm3, %v7299_v18  ;;  %6675 = vmatprep.mubr.msk.f32.mxu1 %vm7298_vm3, %v7299_v18 }
 0x74e   :  { %7051 = vmatpush3.bf16.msra.mxu0 %v7611_v39  ;;  %7057 = vmatpush3.bf16.msra.mxu1 %v7618_v41  ;;  %v5771_v39 = vld [vmem:[%s8455_s6 + $0x38] sm:$0xff] }
 0x74f   :  { %7074 = vmatprep.subr.bf16.mxu1 %v7297_v6  ;;  %v7062_v41 = vpack.c.bf16 %v5771_v39, %v5770_v33  ;;  %7059 = vmatprep.subr.bf16.mxu0 %v7058_v36 }
 0x751   :  { %6665 = vmatmul.mubr.msk.f32.vlgmr.msra.gmra.mrb[52].mxu0 %vm111_vm0, %v8222_v20  ;;  %6676 = vmatmul.mubr.msk.f32.vlgmr.msra.gmra.mrb[52].mxu1 %vm111_vm0, %v8222_v20 }
 0x752   :  { %6708 = vmatprep.mubr.msk.f32.mxu1 %vm7298_vm3, %v7299_v18  ;;  %7061 = vmatpush3.bf16.msra.mxu0 %v7058_v36 }
 0x753   :  { %7063 = vmatprep.subr.bf16.mxu0 %v7062_v41 }
 0x756   :  { %7065 = vmatpush3.bf16.msra.mxu0 %v7062_v41 }
 0x757   :  { %7067 = vmatprep.subr.bf16.mxu0 %v8266_v51 }
 0x814   :  { %v4563_v22 = vpop.f32.mrb[48].mxu0  ;;  %v4640_v10 = vpop.f32.mrb[48].mxu1 }
 0x815   :  { %v4567_v25 = vadd.f32 %v4563_v22, %v4489_v58  ;;  %v6622_v12 = vpop.f32.mrb[49].mxu0  ;;  %v6633_v29 = vpop.f32.mrb[49].mxu1  ;;  %v4644_v31 = vadd.f32 %v4640_v10, %v4491_v30  ;;  %v8281_v58 = vld [vmem:[#allocation9 + $0x4] sm:$0x3]  ;;  %v8283_v22 = vld [vmem:[#allocation8 + $0x6] sm:$0x3] }
 0x816   :  { %v8287_v10 = vld [vmem:[#allocation9 + $0xc] sm:$0x3]  ;;  %v8293_v12 = vld [vmem:[#allocation8 + $0x2] sm:$0x3]  ;;  %v5125_v30 = vcombine.low %v8295_v53, %v8283_v22 }
 0x817   :  { %v5759_v1 = vmul.f32 -1.442695, %v4567_v25  ;;  %v5761_v34 = vmul.f32 -1.442695, %v4644_v31  ;;  %v8289_v25 = vld [vmem:[#allocation9 + $0x6] sm:$0x3] }
 0x818   :  { %v5004_v29 = vcombine.low %v8281_v58, %v8289_v25 }
 0x819   :  { %7235 = vpow2.f32 %v5759_v1  ;;  %v8299_v1 = vld [vmem:[#allocation9 + $0xe] sm:$0x3] }
 0x81a   :  { %7237 = vpow2.f32 %v5761_v34  ;;  %v8305_v34 = vld [vmem:[#allocation9 + $0x2] sm:$0x3] }
 0x81c   :  { %v4717_v35 = vpop.f32.mrb[50].mxu0  ;;  %v4803_v42 = vpop.f32.mrb[50].mxu1 }
 0x81d   :  { %v6644_v43 = vpop.f32.mrb[51].mxu0  ;;  %v4807_v45 = vadd.f32 %v4803_v42, %v4731_v37  ;;  %v6655_v2 = vpop.f32.mrb[51].mxu1  ;;  %v4718_v62 = vadd.f32 %v8116_v32, %v4717_v35  ;;  %v5021_v35 = vcombine.low %v8287_v10, %v8299_v1  ;;  %v8309_v37 = vld [vmem:[#allocation8] sm:$0x3] }
 0x81e   :  { %v5124_v43 = vcombine.low %v8309_v37, %v8293_v12 }
 0x81f   :  { %v5764_v46 = vmul.f32 -1.442695, %v4807_v45 }
 0x821   :  { %7239 = vpow2.f32 %v5764_v46  ;;  %v5018_v46 = vrot.slane %v5004_v29, %v7398_v24 }
 0x823   :  { %v7236_v15 = vpop.eup %7235 }
 0x824   :  { %v4571_v59 = vadd.f32 1.0, %v7236_v15  ;;  %v4880_v48 = vpop.f32.mrb[52].mxu0  ;;  %v4957_v50 = vpop.f32.mrb[52].mxu1  ;;  %v5139_v15 = vrot.slane %v5125_v30, %v7398_v24 }
 0x825   :  { %v4884_v11 = vadd.f32 %v4880_v48, %v4732_v17  ;;  %v6666_v28 = vpop.f32.mrb[53].mxu0  ;;  %v6677_v52 = vpop.f32.mrb[53].mxu1  ;;  %v4958_v38 = vadd.f32 %v8122_v44, %v4957_v50  ;;  %v4989_v17 = vld [vmem:[%s8455_s6 + $0x18] sm:$0xff]  ;;  %v5035_v50 = vrot.slane %v5021_v35, %v7398_v24 }
 0x826   :  { %7241 = vrcp.f32 %v4571_v59  ;;  %v7238_v55 = vpop.eup %7237  ;;  %v4988_v59 = vld [vmem:[%s8455_s6 + $0x10] sm:$0xff]  ;;  %v5132_v28 = vrot.slane %v5124_v43, %v7398_v24  ;;  %v8329_v52 = vld [vmem:[#allocation8 + $0xa] sm:$0x3] }
 0x827   :  { %v5766_v54 = vmul.f32 -1.442695, %v4884_v11  ;;  %v4648_v61 = vadd.f32 1.0, %v7238_v55 }
 0x829   :  { %7243 = vpow2.f32 %v5766_v54  ;;  %v8331_v54 = vld [vmem:[#allocation8 + $0xc] sm:$0x3] }
 0x82b   :  { %v7240_v56 = vpop.eup %7239 }
 0x82c   :  { %v4811_v60 = vadd.f32 1.0, %v7240_v56  ;;  %v7070_v56 = vpack.c.bf16 %v4989_v17, %v4988_v59 }
 0x82e   :  { %7245 = vrcp.f32 %v4811_v60 }
 0x82f   :  { %7247 = vrcp.f32 %v4648_v61  ;;  %v5140_v61 = vcombine.low %v5132_v28, %v5139_v15 }
 0x830   :  { %v7242_v49 = vpop.eup %7241 }
 0x831   :  { %v4721_v40 = vmul.f32 %v7242_v49, %v4718_v62  ;;  %v8336_v62 = vld [vmem:[#allocation8 + $0x8] sm:$0x3] }
 0x832   :  { %v5141_v49 = vcombine.low %v8336_v62, %v8329_v52 }
 0x833   :  { %v7244_v8 = vpop.eup %7243  ;;  %v4722_v3 = vadd.f32 %v4721_v40, %v4493_v0 }
 0x834   :  { %v4888_v4 = vadd.f32 1.0, %v7244_v8  ;;  %v5149_v0 = vrot.slane %v5141_v49, %v7398_v24 }
 0x835   :  { %7249 = vtanh.f32 %v4722_v3 }
 0x836   :  { %7251 = vrcp.f32 %v4888_v4  ;;  %v5776_v4 = vld [vmem:[%s8456_s7] ss:$0 sm:$0xff] }
 0x838   :  { %v7246_v47 = vpop.eup %7245 }
 0x839   :  { %v4961_v13 = vmul.f32 %v7246_v47, %v4958_v38  ;;  %v7248_v16 = vpop.eup %7247 }
 0x83a   :  { %v4724_v57 = vsub.f32 1.0, %v7248_v16  ;;  %v4726_v32 = vmul.f32 %v7248_v16, %v8197_v9  ;;  %v8279_v9 = vld [vmem:[#allocation9 + $0x8] sm:$0x3] }
 0x83b   :  { %v4962_v23 = vadd.f32 %v4961_v13, %v4733_v14 }
 0x83d   :  { %7253 = vtanh.f32 %v4962_v23 }
 0x83f   :  { %v7250_v19 = vpop.eup %7249 }
 0x840   :  { %v4725_v21 = vmul.f32 %v7250_v19, %v4724_v57  ;;  %v7252_v27 = vpop.eup %7251 }
 0x841   :  { %v4964_v44 = vsub.f32 1.0, %v7252_v27  ;;  %v4966_v39 = vmul.f32 %v7252_v27, %v8222_v20  ;;  %v5020_v20 = vcombine.low %v8279_v9, %v8285_v63 }
 0x842   :  { %v4727_v26 = vadd.f32 %v4726_v32, %v4725_v21 }
 0x843   :  { %v5028_v45 = vrot.slane %v5020_v20, %v7398_v24 }
 0x844   :  { %v4728_v33 = vsel %vm1520_vm12, %v4727_v26, 0.0 }
 0x845   :  { %4730 = vst.msk [vmem:[#allocation8 + $0xe] sm:$0x3] %vm235_vm10, %v4728_v33  ;;  %v5036_v55 = vcombine.low %v5028_v45, %v5035_v50 }
 0x847   :  { %v7254_v36 = vpop.eup %7253 }
 0x848   :  { %v4965_v41 = vmul.f32 %v7254_v36, %v4964_v44 }
 0x84a   :  { %v4967_v7 = vadd.f32 %v4966_v39, %v4965_v41 }
 0x84c   :  { %v4968_v5 = vsel %vm1269_vm11, %v4967_v7, 0.0  ;;  %v8325_v48 = vld [vmem:[#allocation8 + $0xe] sm:$0x3]  ;;  %v5777_v7 = vld [vmem:[%s8457_s8] ss:$0 sm:$0xff] }
 0x84d   :  { %4969 = vst.msk [vmem:[#allocation9] sm:$0x3] %vm235_vm10, %v4968_v5  ;;  %v5142_v60 = vcombine.low %v8331_v54, %v8325_v48 }
 0x84f   :  { %v5156_v40 = vrot.slane %v5142_v60, %v7398_v24 }
 0x851   :  { %v5157_v8 = vcombine.low %v5149_v0, %v5156_v40 }
 0x854   :  { %v8303_v31 = vld [vmem:[#allocation9] sm:$0x3] }
 0x855   :  { %v5003_v42 = vcombine.low %v8303_v31, %v8305_v34 }
 0x857   :  { %v5011_v2 = vrot.slane %v5003_v42, %v7398_v24 }
 0x859   :  { %v5019_v11 = vcombine.low %v5011_v2, %v5018_v46 }
 0x85b   :  { %6686 = vmatprep.mubr.msk.f32.mxu0 %vm111_vm0, %v5019_v11 }
 0x85c   :  { %6687 = vmatmul.mubr.msk.f32.vlgmr.msra.gmra.mrb[54].mxu0 %vm111_vm0, %v5036_v55 }
 0x85d   :  { %7069 = vmatpush3.bf16.msra.mxu0 %v8266_v51  ;;  %6697 = vmatprep.mubr.msk.f32.mxu0 %vm111_vm0, %v5140_v61 }
 0x85e   :  { %7071 = vmatprep.subr.bf16.mxu0 %v7070_v56 }
 0x861   :  { %7073 = vmatpush3.bf16.msra.mxu0 %v7070_v56 }
 0x864   :  { %6698 = vmatmul.mubr.msk.f32.vlgmr.msra.gmra.mrb[54].mxu0 %vm111_vm0, %v5157_v8 }
 0x937   :  { %v6699_v3 = vpop.f32.mrb[54].mxu0 }
 0x938   :  { %v5256_v38 = vcombine.high %v6699_v3, %v6699_v3  ;;  %v5263_v47 = vrot.slane %v6699_v3, %v7398_v24  ;;  %v5228_v51 = vpop.f32.mrb[55].mxu0  ;;  %v5778_v3 = vld [vmem:[%s8458_s9 + $0x20] sm:$0xff] }
 0x939   :  { %v5239_v13 = vcombine.high %v5228_v51, %v5228_v51  ;;  %v5246_v14 = vrot.slane %v5228_v51, %v7398_v24  ;;  %v5781_v51 = vld [vmem:[%s8458_s9 + $0x38] sm:$0xff] }
 0x93a   :  { %v5270_v16 = vrot.slane %v5256_v38, %v7398_v24  ;;  %v5271_v23 = vcombine.high %v5263_v47, %v5263_v47  ;;  %v5292_v57 = vadd.f32 %v5776_v4, %v5263_v47  ;;  %v5780_v38 = vld [vmem:[%s8458_s9 + $0x30] sm:$0xff] }
 0x93b   :  { %v5253_v19 = vrot.slane %v5239_v13, %v7398_v24  ;;  %v5254_v32 = vcombine.high %v5246_v14, %v5246_v14  ;;  %v5288_v21 = vadd.f32 %v5776_v4, %v5246_v14  ;;  %v7078_v13 = vpack.c.bf16 %v5781_v51, %v5780_v38 }
 0x93c   :  { %v5293_v26 = vadd.f32 %v5776_v4, %v5271_v23  ;;  %v5294_v27 = vadd.f32 %v5776_v4, %v5270_v16  ;;  %7255 = vtanh.f32 %v5292_v57  ;;  %v5272_v39 = vcombine.high %v5270_v16, %v5270_v16 }
 0x93d   :  { %v5255_v33 = vcombine.high %v5253_v19, %v5253_v19  ;;  %v5289_v44 = vadd.f32 %v5776_v4, %v5254_v32  ;;  %7257 = vtanh.f32 %v5288_v21  ;;  %v5290_v36 = vadd.f32 %v5776_v4, %v5253_v19 }
 0x93e   :  { %7259 = vtanh.f32 %v5293_v26  ;;  %v5295_v24 = vadd.f32 %v5776_v4, %v5272_v39 }
 0x93f   :  { %7261 = vtanh.f32 %v5294_v27  ;;  %v5291_v41 = vadd.f32 %v5776_v4, %v5255_v33  ;;  %v5779_v4 = vld [vmem:[%s8458_s9 + $0x28] sm:$0xff] }
 0x940   :  { %7263 = vtanh.f32 %v5289_v44  ;;  %v7075_v47 = vpack.c.bf16 %v5779_v4, %v5778_v3 }
 0x941   :  { %7265 = vtanh.f32 %v5290_v36 }
 0x942   :  { %7267 = vtanh.f32 %v5291_v41  ;;  %7076 = vmatpush3.bf16.msra.mxu1 %v7075_v47 }
 0x943   :  { %7269 = vtanh.f32 %v5295_v24  ;;  %7077 = vmatprep.subr.bf16.mxu1 %v7297_v6 }
 0x946   :  { %v7256_v5 = vpop.eup %7255  ;;  %7079 = vmatpush3.bf16.msra.mxu1 %v7078_v13 }
 0x947   :  { %v7258_v20 = vpop.eup %7257  ;;  %v5315_v29 = vmul.f32 %v7256_v5, %v5777_v7  ;;  %7080 = vmatprep.subr.bf16.mxu1 %v7297_v6 }
 0x948   :  { %v7260_v30 = vpop.eup %7259  ;;  %v5311_v35 = vmul.f32 %v7258_v20, %v5777_v7 }
 0x949   :  { %v5331_v42 = vsel %vm235_vm10, %v5315_v29, 0.0  ;;  %v7262_v43 = vpop.eup %7261  ;;  %v5316_v2 = vmul.f32 %v7260_v30, %v5777_v7 }
 0x94a   :  { %5332 = vadd.xlane.f32.xlu1 %v5331_v42  ;;  %v5319_v45 = vsel %vm235_vm10, %v5311_v35, 0.0  ;;  %v7264_v46 = vpop.eup %7263  ;;  %v5317_v11 = vmul.f32 %v7262_v43, %v5777_v7 }
 0x94b   :  { %5320 = vadd.xlane.f32.xlu0 %v5319_v45  ;;  %v7266_v15 = vpop.eup %7265  ;;  %v5312_v59 = vmul.f32 %v7264_v46, %v5777_v7  ;;  %v5334_v50 = vsel %vm235_vm10, %v5316_v2, 0.0 }
 0x94c   :  { %v5313_v28 = vmul.f32 %v7266_v15, %v5777_v7  ;;  %v7268_v55 = vpop.eup %7267  ;;  %v5337_v56 = vsel %vm235_vm10, %v5317_v11, 0.0 }
 0x94d   :  { %v5322_v17 = vsel %vm235_vm10, %v5312_v59, 0.0  ;;  %v5314_v61 = vmul.f32 %v7268_v55, %v5777_v7  ;;  %v7270_v49 = vpop.eup %7269 }
 0x94e   :  { %5323 = vadd.xlane.f32.xlu1 %v5322_v17  ;;  %v5325_v60 = vsel %vm235_vm10, %v5313_v28, 0.0  ;;  %v5318_v0 = vmul.f32 %v7270_v49, %v5777_v7 }
 0x94f   :  { %5335 = vadd.xlane.f32.xlu0 %v5334_v50  ;;  %v5328_v40 = vsel %vm235_vm10, %v5314_v61, 0.0 }
 0x950   :  { %v5340_v8 = vsel %vm235_vm10, %v5318_v0, 0.0 }
 0x952   :  { %5338 = vadd.xlane.f32.xlu1 %v5337_v56 }
 0x953   :  { %5326 = vadd.xlane.f32.xlu0 %v5325_v60 }
 0x957   :  { %5329 = vadd.xlane.f32.xlu0 %v5328_v40 }
 0x95b   :  { %5341 = vadd.xlane.f32.xlu0 %v5340_v8 }
 0x9d7   :  { %v5333_v14 = vpop.xlane.xlu1 %5332 }
 0x9d8   :  { %v5321_v16 = vpop.xlane.xlu0 %5320  ;;  %v5348_v33 = vsel %vm5343_vm5, %v5333_v14, -inf }
 0x9d9   :  { %v5344_v44 = vsel %vm5343_vm5, %v5321_v16, -inf }
 0x9da   :  { %v5349_v20 = vmax.f32 %v5344_v44, %v5348_v33 }
 0x9db   :  { %v5324_v57 = vpop.xlane.xlu1 %5323 }
 0x9dc   :  { %v5336_v23 = vpop.xlane.xlu0 %5335  ;;  %v5345_v26 = vsel %vm5343_vm5, %v5324_v57, -inf }
 0x9dd   :  { %v5350_v27 = vsel %vm5343_vm5, %v5336_v23, -inf }
 0x9de   :  { %v5351_v41 = vmax.f32 %v5345_v26, %v5350_v27 }
 0x9df   :  { %v5339_v32 = vpop.xlane.xlu1 %5338 }
 0x9e0   :  { %v5327_v19 = vpop.xlane.xlu0 %5326  ;;  %v5352_v36 = vsel %vm5343_vm5, %v5339_v32, -inf  ;;  %v5356_v35 = vmax.f32 %v5349_v20, %v5351_v41 }
 0x9e1   :  { %v5346_v39 = vsel %vm5343_vm5, %v5327_v19, -inf }
 0x9e2   :  { %v5353_v29 = vmax.f32 %v5346_v39, %v5352_v36 }
 0x9e4   :  { %v5330_v21 = vpop.xlane.xlu0 %5329 }
 0x9e5   :  { %v5347_v24 = vsel %vm5343_vm5, %v5330_v21, -inf }
 0x9e8   :  { %v5342_v7 = vpop.xlane.xlu0 %5341 }
 0x9e9   :  { %v5354_v5 = vsel %vm5343_vm5, %v5342_v7, -inf }
 0x9ea   :  { %v5355_v30 = vmax.f32 %v5347_v24, %v5354_v5 }
 0x9ec   :  { %v5357_v42 = vmax.f32 %v5353_v29, %v5355_v30 }
 0x9ee   :  { %v5358_v43 = vmax.f32 %v5356_v35, %v5357_v42 }
 0x9f0   :  { %v5359_v45 = vsub.f32 %v5321_v16, %v5358_v43  ;;  %v5360_v2 = vsub.f32 %v5324_v57, %v5358_v43  ;;  %v5361_v46 = vsub.f32 %v5327_v19, %v5358_v43  ;;  %v5362_v15 = vsub.f32 %v5330_v21, %v5358_v43 }
 0x9f1   :  { %v5363_v59 = vsub.f32 %v5333_v14, %v5358_v43  ;;  %v5364_v28 = vsub.f32 %v5336_v23, %v5358_v43  ;;  %v5365_v56 = vsub.f32 %v5339_v32, %v5358_v43  ;;  %v5366_v61 = vsub.f32 %v5342_v7, %v5358_v43 }
 0x9f2   :  { %v5367_v17 = vmul.f32 1.442695, %v5359_v45  ;;  %v5369_v50 = vmul.f32 1.442695, %v5360_v2  ;;  %v5371_v11 = vmul.f32 1.442695, %v5361_v46 }
 0x9f3   :  { %v5373_v55 = vmul.f32 1.442695, %v5362_v15  ;;  %v5375_v60 = vmul.f32 1.442695, %v5363_v59  ;;  %v5377_v49 = vmul.f32 1.442695, %v5364_v28 }
 0x9f4   :  { %7271 = vpow2.f32 %v5367_v17  ;;  %v5379_v40 = vmul.f32 1.442695, %v5365_v56  ;;  %v5381_v0 = vmul.f32 1.442695, %v5366_v61 }
 0x9f5   :  { %7273 = vpow2.f32 %v5369_v50 }
 0x9f6   :  { %7275 = vpow2.f32 %v5371_v11 }
 0x9f7   :  { %7277 = vpow2.f32 %v5373_v55 }
 0x9f8   :  { %7279 = vpow2.f32 %v5375_v60 }
 0x9f9   :  { %7281 = vpow2.f32 %v5377_v49 }
 0x9fa   :  { %7283 = vpow2.f32 %v5379_v40 }
 0x9fb   :  { %7285 = vpow2.f32 %v5381_v0 }
 0x9fe   :  { %v7272_v8 = vpop.eup %7271 }
 0x9ff   :  { %v7274_v3 = vpop.eup %7273  ;;  %v5383_v4 = vsel %vm5343_vm5, %v7272_v8, 0.0 }
 0xa00   :  { %v7276_v38 = vpop.eup %7275  ;;  %v5384_v47 = vsel %vm5343_vm5, %v7274_v3, 0.0 }
 0xa01   :  { %v7278_v51 = vpop.eup %7277  ;;  %v5385_v13 = vadd.f32 %v5384_v47, %v5383_v4  ;;  %v5386_v14 = vsel %vm5343_vm5, %v7276_v38, 0.0 }
 0xa02   :  { %v7280_v16 = vpop.eup %7279  ;;  %v5388_v57 = vsel %vm5343_vm5, %v7278_v51, 0.0 }
 0xa03   :  { %v5387_v23 = vadd.f32 %v5386_v14, %v5385_v13  ;;  %v7282_v19 = vpop.eup %7281  ;;  %v5390_v21 = vsel %vm5343_vm5, %v7280_v16, 0.0 }
 0xa04   :  { %v7284_v26 = vpop.eup %7283  ;;  %v5392_v33 = vsel %vm5343_vm5, %v7282_v19, 0.0 }
 0xa05   :  { %v5389_v32 = vadd.f32 %v5388_v57, %v5387_v23  ;;  %v7286_v44 = vpop.eup %7285  ;;  %v5394_v39 = vsel %vm5343_vm5, %v7284_v26, 0.0 }
 0xa06   :  { %v5396_v7 = vsel %vm5343_vm5, %v7286_v44, 0.0 }
 0xa07   :  { %v5391_v27 = vadd.f32 %v5390_v21, %v5389_v32 }
 0xa09   :  { %v5393_v36 = vadd.f32 %v5392_v33, %v5391_v27  ;;  %v5455_v27 = vld [vmem:[%s8458_s9 + $0x10] sm:$0xff]  ;;  %v5456_v33 = vld [vmem:[%s8458_s9 + $0x18] sm:$0xff] }
 0xa0b   :  { %v5395_v41 = vadd.f32 %v5394_v39, %v5393_v36  ;;  %v7084_v39 = vpack.c.bf16 %v5456_v33, %v5455_v27 }
 0xa0d   :  { %v5397_v24 = vadd.f32 %v5396_v7, %v5395_v41 }
 0xa0f   :  { %7287 = vrcp.f32 %v5397_v24 }
 0xa19   :  { %v7288_v5 = vpop.eup %7287 }
 0xa1a   :  { %v5399_v20 = vmul.f32 %v7288_v5, %v7272_v8  ;;  %v5400_v29 = vmul.f32 %v7288_v5, %v7274_v3  ;;  %v5401_v30 = vmul.f32 %v7288_v5, %v7276_v38  ;;  %v5402_v35 = vmul.f32 %v7288_v5, %v7278_v51 }
 0xa1b   :  { %v5403_v42 = vmul.f32 %v7288_v5, %v7280_v16  ;;  %v5404_v2 = vmul.f32 %v7288_v5, %v7282_v19  ;;  %v5405_v50 = vmul.f32 %v7288_v5, %v7284_v26 }
 0xa1c   :  { %v5430_v43 = vmul.f32 %v5399_v20, %v8303_v31  ;;  %v5431_v45 = vmul.f32 %v5400_v29, %v8305_v34  ;;  %v5432_v46 = vmul.f32 %v5401_v30, %v8281_v58  ;;  %v5433_v15 = vmul.f32 %v5402_v35, %v8289_v25 }
 0xa1d   :  { %v5434_v28 = vmul.f32 %v5403_v42, %v8279_v9  ;;  %v5407_v56 = vmul.f32 %v5399_v20, %v8309_v37  ;;  %v5408_v31 = vmul.f32 %v5400_v29, %v8293_v12  ;;  %v5406_v34 = vmul.f32 %v7288_v5, %v7286_v44 }
 0xa1e   :  { %v5438_v59 = vsel %vm235_vm10, %v5430_v43, 0.0  ;;  %v5439_v17 = vsel %vm235_vm10, %v5431_v45, 0.0  ;;  %v5441_v55 = vsel %vm235_vm10, %v5432_v46, 0.0  ;;  %v5435_v60 = vmul.f32 %v5404_v2, %v8285_v63 }
 0xa1f   :  { %v5440_v11 = vadd.f32 %v5439_v17, %v5438_v59  ;;  %v5409_v25 = vmul.f32 %v5401_v30, %v8295_v53  ;;  %v5443_v61 = vsel %vm235_vm10, %v5433_v15, 0.0  ;;  %v5410_v49 = vmul.f32 %v5402_v35, %v8283_v22 }
 0xa20   :  { %v5415_v40 = vsel %vm235_vm10, %v5407_v56, 0.0  ;;  %v5416_v9 = vsel %vm235_vm10, %v5408_v31, 0.0  ;;  %v5436_v37 = vmul.f32 %v5405_v50, %v8287_v10  ;;  %v5445_v12 = vsel %vm235_vm10, %v5434_v28, 0.0  ;;  %v5453_v10 = vld [vmem:[%s8458_s9] sm:$0xff] }
 0xa21   :  { %v5442_v58 = vadd.f32 %v5441_v55, %v5440_v11  ;;  %v5417_v8 = vadd.f32 %v5416_v9, %v5415_v40  ;;  %v5411_v3 = vmul.f32 %v5403_v42, %v8336_v62  ;;  %v5418_v63 = vsel %vm235_vm10, %v5409_v25, 0.0  ;;  %v5454_v62 = vld [vmem:[%s8458_s9 + $0x8] sm:$0xff] }
 0xa22   :  { %v5437_v38 = vmul.f32 %v5406_v34, %v8299_v1  ;;  %v5447_v22 = vsel %vm235_vm10, %v5435_v60, 0.0  ;;  %v5412_v47 = vmul.f32 %v5404_v2, %v8329_v52  ;;  %v5420_v51 = vsel %vm235_vm10, %v5410_v49, 0.0 }
 0xa23   :  { %v5444_v0 = vadd.f32 %v5443_v61, %v5442_v58  ;;  %v5419_v53 = vadd.f32 %v5418_v63, %v5417_v8  ;;  %v5449_v16 = vsel %vm235_vm10, %v5436_v37, 0.0  ;;  %v5422_v1 = vsel %vm235_vm10, %v5411_v3, 0.0 }
 0xa24   :  { %v5451_v52 = vsel %vm235_vm10, %v5437_v38, 0.0  ;;  %v7081_v19 = vpack.c.bf16 %v5454_v62, %v5453_v10  ;;  %v5413_v32 = vmul.f32 %v5405_v50, %v8331_v54  ;;  %v5424_v21 = vsel %vm235_vm10, %v5412_v47, 0.0 }
 0xa25   :  { %v5446_v4 = vadd.f32 %v5445_v12, %v5444_v0  ;;  %v5421_v14 = vadd.f32 %v5420_v51, %v5419_v53  ;;  %v5414_v36 = vmul.f32 %v5406_v34, %v8325_v48  ;;  %v16_v48 = vstv %s8459_s10 }
 0xa26   :  { %v5426_v54 = vsel %vm235_vm10, %v5413_v32, 0.0  ;;  %17 = vst [vmem:[#allocation10] sm:$0x1] %v16_v48 }
 0xa27   :  { %v5448_v13 = vadd.f32 %v5447_v22, %v5446_v4  ;;  %v5423_v57 = vadd.f32 %v5422_v1, %v5421_v14  ;;  %v5428_v7 = vsel %vm235_vm10, %v5414_v36, 0.0 }
 0xa29   :  { %v5450_v23 = vadd.f32 %v5449_v16, %v5448_v13  ;;  %v5425_v44 = vadd.f32 %v5424_v21, %v5423_v57 }
 0xa2b   :  { %v5452_v26 = vadd.f32 %v5451_v52, %v5450_v23  ;;  %v5427_v41 = vadd.f32 %v5426_v54, %v5425_v44 }
 0xa2d   :  { %6709 = vmatmul.mubr.msk.f32.vlgmr.msra.gmra.mrb[54].mxu1 %vm111_vm0, %v5452_v26  ;;  %v5429_v24 = vadd.f32 %v5428_v7, %v5427_v41 }
 0xa2e   :  { %7082 = vmatpush3.bf16.msra.mxu1 %v7081_v19  ;;  %6719 = vmatprep.mubr.msk.f32.mxu1 %vm7298_vm3, %v7299_v18  ;;  %v5784_v18 = vld [vmem:[#allocation10] ss:$0 sm:$0xff]  ;;  %vm5622_vm3 = vcmask 1024  }
 0xa2f   :  { %7083 = vmatprep.subr.bf16.mxu1 %v7297_v6 }
 0xa32   :  { %7085 = vmatpush3.bf16.msra.mxu1 %v7084_v39 }
 0xa35   :  { %6720 = vmatmul.mubr.msk.f32.vlgmr.msra.gmra.mrb[56].mxu1 %vm111_vm0, %v5429_v24 }
 0xb00   :  { %v5531_v5 = vpop.f32.mrb[54].mxu1 }
 0xb01   :  { %v6710_v20 = vpop.f32.mrb[55].mxu1 }
 0xb08   :  { %v5604_v29 = vpop.f32.mrb[56].mxu1 }
 0xb09   :  { %v5605_v30 = vadd.f32 %v5604_v29, %v5531_v5  ;;  %v6721_v35 = vpop.f32.mrb[57].mxu1 }
 0xb0b   :  { %v5615_v42 = vadd.f32 %v5784_v18, %v5605_v30 }
 0xb0d   :  { %v5785_v6 = vmul.f32 -1.442695, %v5615_v42 }
 0xb0f   :  { %7289 = vpow2.f32 %v5785_v6 }
 0xb19   :  { %v7290_v43 = vpop.eup %7289 }
 0xb1a   :  { %v5619_v45 = vadd.f32 1.0, %v7290_v43 }
 0xb1c   :  { %7291 = vrcp.f32 %v5619_v45 }
 0xb26   :  { %v7292_v2 = vpop.eup %7291 }
 0xb27   :  { %5623 = vst.msk [vmem:[%s8460_s11] sm:$0x3] %vm5622_vm3, %v7292_v2 }

</bundles_post_ra>
